<compile_context>
chip_gen: v5e
topology: v5e:2x2
jax: 0.10.0
libtpu: 0.0.40
codegen_flags: <defaults>
</compile_context>

<pallas_src>
import math
from itertools import combinations

import jax
import jax.numpy as jnp
from jax.experimental import pallas as pl
from jax.experimental.pallas import tpu as pltpu


def _round_up(n, m):
    return ((n + m - 1) // m) * m


# ------------------------------- fused kernel -------------------------------

def make_slc_kernel(*, M, L, H, Hg, B, T, penalty, diff):
    """Fused kernel: one lane-packed LSTM recurrence for all M modalities.

    Input refs (positional):
        x2d    : (T*B, Ipad)   bf16, time-major, all modality features packed
        w0_ih  : (Ipad, 4*Hg)  bf16, block-diag layer-0 input weights
        b0     : (1, 4*Hg)     f32,  packed layer-0 bias
        w0_hh  : (Hg, 4*Hg)    bf16, block-diag layer-0 recurrent weights
        per deep layer l=1..L-1:
          w_l  : (2*Hg, 4*Hg)  bf16, [W_ih_l ; W_hh_l] stacked, block-diag
          b_l  : (1, 4*Hg)     f32
        lam    : (1, H)        f32
    Outputs:
        h_out  : (B, H)        f32
        hlist  : (M, B, H)     f32
    """
    f32 = jnp.float32
    bf16 = jnp.bfloat16

    def sig(v):                       # sigmoid via tanh: single EUP op
        return 0.5 * (jnp.tanh(0.5 * v) + 1.0)

    def kernel(*refs):
        x2d = refs[0][...]
        w0_ih = refs[1][...]
        b0 = refs[2][...]
        w0_hh = refs[3][...]
        deep_w, deep_b = [], []
        p = 4
        for _ in range(L - 1):
            deep_w.append(refs[p][...])
            # bias broadcast hoisted out of the time loop (JAX does not CSE it)
            deep_b.append(jnp.broadcast_to(refs[p + 1][...], (B, 4 * Hg)))
            p += 2
        lam = refs[p][...]
        h_out_ref = refs[p + 1]
        hlist_ref = refs[p + 2]

        # Hoisted layer-0 projection for ALL timesteps (bias folded in); this
        # is the only place x is touched and it is off the dependent chain.
        xp = jnp.dot(x2d, w0_ih, preferred_element_type=f32) + b0   # (T*B, 4Hg)

        hs = [jnp.zeros((B, Hg), f32) for _ in range(L)]
        cs = [jnp.zeros((B, Hg), f32) for _ in range(L)]

        def cell(g, c):
            i_g = sig(g[:, 0 * Hg:1 * Hg])      # 128-lane aligned views
            f_g = sig(g[:, 1 * Hg:2 * Hg])
            g_g = jnp.tanh(g[:, 2 * Hg:3 * Hg])
            o_g = sig(g[:, 3 * Hg:4 * Hg])
            c_new = f_g * c + i_g * g_g
            return o_g * jnp.tanh(c_new), c_new

        # T and L are tiny & static -> fully unrolled recurrence.
        for t in range(T):
            g0 = xp[t * B:(t + 1) * B, :] + jnp.dot(
                hs[0].astype(bf16), w0_hh, preferred_element_type=f32)
            hs[0], cs[0] = cell(g0, cs[0])
            for l in range(1, L):
                lhs = jnp.concatenate([hs[l - 1], hs[l]], axis=1).astype(bf16)
                g = jnp.dot(lhs, deep_w[l - 1],
                            preferred_element_type=f32) + deep_b[l - 1]
                hs[l], cs[l] = cell(g, cs[l])
            # TODO(synk): inter-layer dropout(p=0.5) is identity in eval();
            # training-mode stochastic dropout is not implemented.

        # Epilogue: split fused state back into per-modality h, then combine.
        h_last = hs[L - 1]                                   # (B, Hg)
        h_mods = [h_last[:, m * H:(m + 1) * H] for m in range(M)]
        for m in range(M):
            hlist_ref[m] = h_mods[m]

        h = h_mods[0]
        for m in range(1, M):
            h = h + h_mods[m]
        h = h * (1.0 / M)

        if penalty:
            pen = None
            for a, b in combinations(range(M), 2):
                d = jnp.abs(h_mods[a] - h_mods[b])
                pen = d if pen is None else pen + d
            if pen is None:
                pen = jnp.zeros_like(h)
            out = lam * (h - pen) if diff else h - lam * pen
        else:
            out = lam * h if diff else h

        h_out_ref[...] = out.astype(h_out_ref.dtype)

    return kernel


# ------------------------------ wrapper / packing ----------------------------

def _pack_params(mod_names, modalities, params, H, L):
    """Block-diagonal, lane-aligned packing of all modality LSTM weights."""
    M = len(mod_names)
    sizes = [len(modalities[n]) for n in mod_names]
    Itot = sum(sizes)
    Ipad = _round_up(max(Itot, 1), 128)        # lane-aligned contraction dim
    Hg = _round_up(M * H, 128)                 # per-gate lane-aligned group

    w0_ih = jnp.zeros((Ipad, 4 * Hg), jnp.float32)
    w0_hh = jnp.zeros((Hg, 4 * Hg), jnp.float32)
    b0 = jnp.zeros((1, 4 * Hg), jnp.float32)
    off = 0
    for m, name in enumerate(mod_names):
        w_ih, w_hh, b = params[name][0]        # (I_m,4H), (H,4H), (1,4H)
        I_m = sizes[m]
        for gi in range(4):
            c0 = gi * Hg + m * H
            w0_ih = w0_ih.at[off:off + I_m, c0:c0 + H].set(w_ih[:, gi * H:(gi + 1) * H])
            w0_hh = w0_hh.at[m * H:(m + 1) * H, c0:c0 + H].set(w_hh[:, gi * H:(gi + 1) * H])
            b0 = b0.at[0, c0:c0 + H].set(b[0, gi * H:(gi + 1) * H])
        off += I_m

    deep = []
    for l in range(1, L):
        w_l = jnp.zeros((2 * Hg, 4 * Hg), jnp.float32)
        b_l = jnp.zeros((1, 4 * Hg), jnp.float32)
        for m, name in enumerate(mod_names):
            w_ih, w_hh, b = params[name][l]    # (H,4H), (H,4H), (1,4H)
            for gi in range(4):
                c0 = gi * Hg + m * H
                w_l = w_l.at[m * H:(m + 1) * H, c0:c0 + H].set(w_ih[:, gi * H:(gi + 1) * H])
                w_l = w_l.at[Hg + m * H:Hg + (m + 1) * H, c0:c0 + H].set(w_hh[:, gi * H:(gi + 1) * H])
                b_l = b_l.at[0, c0:c0 + H].set(b[0, gi * H:(gi + 1) * H])
        deep.append((w_l, b_l))
    return w0_ih, b0, w0_hh, deep, Ipad, Hg, Itot


def slc_co_forward(x, modalities, params, lam, *, penalty, diff,
                   num_layers, hidden):
    """Run the fused SLC_co forward. Returns (h_out, h_list)."""
    mod_names = list(modalities.keys())
    M = len(mod_names)
    B, T, _ = x.shape
    H = hidden
    L = num_layers
    bf16 = jnp.bfloat16

    w0_ih, b0, w0_hh, deep, Ipad, Hg, Itot = _pack_params(
        mod_names, modalities, params, H, L)

    # Pack all modality features along the lane axis, time-major, flattened.
    x_cat = jnp.concatenate(
        [x[:, :, jnp.array(modalities[n])] for n in mod_names], axis=-1)
    x_cat = jnp.pad(x_cat, ((0, 0), (0, 0), (0, Ipad - Itot)))
    x2d = jnp.transpose(x_cat, (1, 0, 2)).reshape(T * B, Ipad)

    lam2d = jnp.broadcast_to(
        jnp.asarray(lam, jnp.float32).reshape(1, -1), (1, H))

    inputs = [x2d.astype(bf16), w0_ih.astype(bf16), b0, w0_hh.astype(bf16)]
    for (w_l, b_l) in deep:
        inputs += [w_l.astype(bf16), b_l]
    inputs.append(lam2d)

    kernel = make_slc_kernel(M=M, L=L, H=H, Hg=Hg, B=B, T=T,
                             penalty=penalty, diff=diff)

    vmem = pltpu.MemorySpace.VMEM
    h_out, h_stack = pl.pallas_call(
        kernel,
        out_shape=(jax.ShapeDtypeStruct((B, H), jnp.float32),
                   jax.ShapeDtypeStruct((M, B, H), jnp.float32)),
        in_specs=[pl.BlockSpec(memory_space=vmem)] * len(inputs),
        out_specs=(pl.BlockSpec(memory_space=vmem),
                   pl.BlockSpec(memory_space=vmem)),
    )(*inputs)

    return h_out, [h_stack[m] for m in range(M)]


# ----------------------------- pure-JAX reference ----------------------------

def _lstm_ref(x_mod, layers):
    """x_mod: (B, T, I); layers: list of (w_ih (I_l,4H), w_hh (H,4H), b (1,4H)).
    Matches the kernel's numerics: bf16 MXU operands, f32 accumulation/state."""
    B, T, _ = x_mod.shape
    H = layers[0][1].shape[0]
    bf16 = jnp.bfloat16
    hs = [jnp.zeros((B, H), jnp.float32) for _ in layers]
    cs = [jnp.zeros((B, H), jnp.float32) for _ in layers]
    for t in range(T):
        inp = x_mod[:, t, :]
        for l, (w_ih, w_hh, b) in enumerate(layers):
            g = (jnp.dot(inp.astype(bf16), w_ih.astype(bf16),
                         preferred_element_type=jnp.float32)
                 + jnp.dot(hs[l].astype(bf16), w_hh.astype(bf16),
                           preferred_element_type=jnp.float32)
                 + b)
            i_g = jax.nn.sigmoid(g[:, 0 * H:1 * H])
            f_g = jax.nn.sigmoid(g[:, 1 * H:2 * H])
            g_g = jnp.tanh(g[:, 2 * H:3 * H])
            o_g = jax.nn.sigmoid(g[:, 3 * H:4 * H])
            cs[l] = f_g * cs[l] + i_g * g_g
            hs[l] = o_g * jnp.tanh(cs[l])
            inp = hs[l]
    return hs[-1]


def slc_co_ref(x, modalities, params, lam, penalty, diff):
    h_list = []
    for name, idxs in modalities.items():
        xm = x[:, :, jnp.array(idxs)]
        h_list.append(_lstm_ref(xm, params[name]))
    h = h_list[0]
    for hm in h_list[1:]:
        h = h + hm
    h = h / float(len(h_list))
    if penalty:
        pen = None
        for a, b in combinations(h_list, 2):
            d = jnp.abs(a - b)
            pen = d if pen is None else pen + d
        if pen is None:
            pen = jnp.zeros_like(h)
        out = lam * (h - pen) if diff else h - lam * pen
    else:
        out = lam * h if diff else h
    return out, h_list


def init_lstm_params(key, input_size, hidden, num_layers):
    """PyTorch nn.LSTM default init: U(-1/sqrt(H), 1/sqrt(H)); layout (in, 4H),
    gate order (i, f, g, o); the two biases are summed."""
    layers = []
    bound = 1.0 / math.sqrt(hidden)
    for l in range(num_layers):
        in_l = input_size if l == 0 else hidden
        key, k1, k2, k3, k4 = jax.random.split(key, 5)
        w_ih = jax.random.uniform(k1, (in_l, 4 * hidden), jnp.float32, -bound, bound)
        w_hh = jax.random.uniform(k2, (hidden, 4 * hidden), jnp.float32, -bound, bound)
        b_ih = jax.random.uniform(k3, (4 * hidden,), jnp.float32, -bound, bound)
        b_hh = jax.random.uniform(k4, (4 * hidden,), jnp.float32, -bound, bound)
        layers.append((w_ih, w_hh, (b_ih + b_hh).reshape(1, 4 * hidden)))
    return layers


if __name__ == "__main__":
    B, T = 2, 8                 # batch, sequence length
    F_TOTAL = 12                # total input features (split across modalities)
    HIDDEN_DIMS = 2             # nn.LSTM num_layers
    OUTPUT_DIM = 32             # nn.LSTM hidden_size (= module output_dim)
    PENALTY, SIG, DIFF = True, False, False

    modalities = {
        "m0": [0, 1, 2, 3],
        "m1": [4, 5, 6, 7, 8],
        "m2": [9, 10, 11],
    }

    key = jax.random.PRNGKey(0)
    key, kx = jax.random.split(key)
    x = jax.random.normal(kx, (B, T, F_TOTAL), jnp.float32)

    params = {}
    for name in modalities:
        key, kp = jax.random.split(key)
        params[name] = init_lstm_params(kp, len(modalities[name]),
                                        OUTPUT_DIM, HIDDEN_DIMS)

    lam = (jnp.ones((1,), jnp.float32) if SIG
           else jnp.ones((OUTPUT_DIM,), jnp.float32))

    h_out, h_list = slc_co_forward(x, modalities, params, lam,
                                   penalty=PENALTY, diff=DIFF,
                                   num_layers=HIDDEN_DIMS, hidden=OUTPUT_DIM)
    jax.block_until_ready(h_out)

    ref_out, ref_hlist = slc_co_ref(x, modalities, params, lam, PENALTY, DIFF)

    assert h_out.shape == (B, OUTPUT_DIM)
    assert len(h_list) == len(modalities)
    assert jnp.allclose(h_out, ref_out, atol=1e-3, rtol=1e-3)
    for a, b in zip(h_list, ref_hlist):
        assert a.shape == (B, OUTPUT_DIM)
        assert jnp.allclose(a, b, atol=1e-3, rtol=1e-3)

    print("KERNEL_OK")
</pallas_src>

<mosaic_0001>
module attributes {stable_mosaic.version = 11 : i64} {
  func.func @kernel(%arg0: memref<16x128xbf16, #tpu.memory_space<vmem>>, %arg1: memref<128x512xbf16, #tpu.memory_space<vmem>>, %arg2: memref<1x512xf32, #tpu.memory_space<vmem>>, %arg3: memref<128x512xbf16, #tpu.memory_space<vmem>>, %arg4: memref<256x512xbf16, #tpu.memory_space<vmem>>, %arg5: memref<1x512xf32, #tpu.memory_space<vmem>>, %arg6: memref<1x32xf32, #tpu.memory_space<vmem>>, %arg7: memref<2x32xf32, #tpu.memory_space<vmem>>, %arg8: memref<3x2x32xf32, #tpu.memory_space<vmem>>) attributes {dimension_semantics = [], scalar_prefetch = 0 : i64, scratch_operands = 0 : i64, tpu.core_type = #tpu.core_type<tc>} {
    %c0 = arith.constant 0 : index
    %c0_0 = arith.constant 0 : index
    %0 = vector.load %arg0[%c0, %c0_0] : memref<16x128xbf16, #tpu.memory_space<vmem>>, vector<16x128xbf16>
    %c0_1 = arith.constant 0 : index
    %c0_2 = arith.constant 0 : index
    %1 = vector.load %arg1[%c0_1, %c0_2] : memref<128x512xbf16, #tpu.memory_space<vmem>>, vector<128x512xbf16>
    %c0_3 = arith.constant 0 : index
    %c0_4 = arith.constant 0 : index
    %2 = vector.load %arg2[%c0_3, %c0_4] : memref<1x512xf32, #tpu.memory_space<vmem>>, vector<1x512xf32>
    %c0_5 = arith.constant 0 : index
    %c0_6 = arith.constant 0 : index
    %3 = vector.load %arg3[%c0_5, %c0_6] : memref<128x512xbf16, #tpu.memory_space<vmem>>, vector<128x512xbf16>
    %c0_7 = arith.constant 0 : index
    %c0_8 = arith.constant 0 : index
    %4 = vector.load %arg4[%c0_7, %c0_8] : memref<256x512xbf16, #tpu.memory_space<vmem>>, vector<256x512xbf16>
    %c0_9 = arith.constant 0 : index
    %c0_10 = arith.constant 0 : index
    %5 = vector.load %arg5[%c0_9, %c0_10] : memref<1x512xf32, #tpu.memory_space<vmem>>, vector<1x512xf32>
    %6 = vector.shape_cast %5 : vector<1x512xf32> to vector<1x512xf32>
    %7 = vector.broadcast %6 : vector<1x512xf32> to vector<2x512xf32>
    %c0_11 = arith.constant 0 : index
    %c0_12 = arith.constant 0 : index
    %8 = vector.load %arg6[%c0_11, %c0_12] : memref<1x32xf32, #tpu.memory_space<vmem>>, vector<1x32xf32>
    %cst = arith.constant dense<0.000000e+00> : vector<16x512xf32>
    %9 = tpu.matmul %0, %1, %cst {dimension_numbers = #tpu.dot_dimension_numbers<[1], [0], [0], [1], [0, 0, 1, 1], [], []>} : vector<16x128xbf16>, vector<128x512xbf16>, vector<16x512xf32> -> vector<16x512xf32>
    %10 = vector.broadcast %2 : vector<1x512xf32> to vector<16x512xf32>
    %11 = arith.addf %9, %10 : vector<16x512xf32>
    %cst_13 = arith.constant 0.000000e+00 : f32
    %12 = vector.broadcast %cst_13 : f32 to vector<2x128xf32>
    %cst_14 = arith.constant 0.000000e+00 : f32
    %13 = vector.broadcast %cst_14 : f32 to vector<2x128xf32>
    %cst_15 = arith.constant 0.000000e+00 : f32
    %14 = vector.broadcast %cst_15 : f32 to vector<2x128xf32>
    %cst_16 = arith.constant 0.000000e+00 : f32
    %15 = vector.broadcast %cst_16 : f32 to vector<2x128xf32>
    %16 = vector.extract_strided_slice %11 {offsets = [0, 0], sizes = [2, 512], strides = [1, 1]} : vector<16x512xf32> to vector<2x512xf32>
    %17 = arith.truncf %12 : vector<2x128xf32> to vector<2x128xbf16>
    %cst_17 = arith.constant dense<0.000000e+00> : vector<2x512xf32>
    %18 = tpu.matmul %17, %3, %cst_17 {dimension_numbers = #tpu.dot_dimension_numbers<[1], [0], [0], [1], [0, 0, 1, 1], [], []>} : vector<2x128xbf16>, vector<128x512xbf16>, vector<2x512xf32> -> vector<2x512xf32>
    %19 = arith.addf %16, %18 : vector<2x512xf32>
    %20 = vector.extract_strided_slice %19 {offsets = [0, 0], sizes = [2, 128], strides = [1, 1]} : vector<2x512xf32> to vector<2x128xf32>
    %cst_18 = arith.constant 5.000000e-01 : f32
    %21 = vector.broadcast %cst_18 : f32 to vector<2x128xf32>
    %22 = arith.mulf %21, %20 : vector<2x128xf32>
    %23 = math.tanh %22 : vector<2x128xf32>
    %cst_19 = arith.constant 1.000000e+00 : f32
    %24 = vector.broadcast %cst_19 : f32 to vector<2x128xf32>
    %25 = arith.addf %23, %24 : vector<2x128xf32>
    %cst_20 = arith.constant 5.000000e-01 : f32
    %26 = vector.broadcast %cst_20 : f32 to vector<2x128xf32>
    %27 = arith.mulf %26, %25 : vector<2x128xf32>
    %28 = vector.extract_strided_slice %19 {offsets = [0, 128], sizes = [2, 128], strides = [1, 1]} : vector<2x512xf32> to vector<2x128xf32>
    %cst_21 = arith.constant 5.000000e-01 : f32
    %29 = vector.broadcast %cst_21 : f32 to vector<2x128xf32>
    %30 = arith.mulf %29, %28 : vector<2x128xf32>
    %31 = math.tanh %30 : vector<2x128xf32>
    %cst_22 = arith.constant 1.000000e+00 : f32
    %32 = vector.broadcast %cst_22 : f32 to vector<2x128xf32>
    %33 = arith.addf %31, %32 : vector<2x128xf32>
    %cst_23 = arith.constant 5.000000e-01 : f32
    %34 = vector.broadcast %cst_23 : f32 to vector<2x128xf32>
    %35 = arith.mulf %34, %33 : vector<2x128xf32>
    %36 = vector.extract_strided_slice %19 {offsets = [0, 256], sizes = [2, 128], strides = [1, 1]} : vector<2x512xf32> to vector<2x128xf32>
    %37 = math.tanh %36 : vector<2x128xf32>
    %38 = vector.extract_strided_slice %19 {offsets = [0, 384], sizes = [2, 128], strides = [1, 1]} : vector<2x512xf32> to vector<2x128xf32>
    %cst_24 = arith.constant 5.000000e-01 : f32
    %39 = vector.broadcast %cst_24 : f32 to vector<2x128xf32>
    %40 = arith.mulf %39, %38 : vector<2x128xf32>
    %41 = math.tanh %40 : vector<2x128xf32>
    %cst_25 = arith.constant 1.000000e+00 : f32
    %42 = vector.broadcast %cst_25 : f32 to vector<2x128xf32>
    %43 = arith.addf %41, %42 : vector<2x128xf32>
    %cst_26 = arith.constant 5.000000e-01 : f32
    %44 = vector.broadcast %cst_26 : f32 to vector<2x128xf32>
    %45 = arith.mulf %44, %43 : vector<2x128xf32>
    %46 = arith.mulf %35, %14 : vector<2x128xf32>
    %47 = arith.mulf %27, %37 : vector<2x128xf32>
    %48 = arith.addf %46, %47 : vector<2x128xf32>
    %49 = math.tanh %48 : vector<2x128xf32>
    %50 = arith.mulf %45, %49 : vector<2x128xf32>
    %51 = tpu.concatenate %50, %13 in 1 : vector<2x128xf32>, vector<2x128xf32> -> vector<2x256xf32>
    %52 = arith.truncf %51 : vector<2x256xf32> to vector<2x256xbf16>
    %cst_27 = arith.constant dense<0.000000e+00> : vector<2x512xf32>
    %53 = tpu.matmul %52, %4, %cst_27 {dimension_numbers = #tpu.dot_dimension_numbers<[1], [0], [0], [1], [0, 0, 1, 1], [], []>} : vector<2x256xbf16>, vector<256x512xbf16>, vector<2x512xf32> -> vector<2x512xf32>
    %54 = arith.addf %53, %7 : vector<2x512xf32>
    %55 = vector.extract_strided_slice %54 {offsets = [0, 0], sizes = [2, 128], strides = [1, 1]} : vector<2x512xf32> to vector<2x128xf32>
    %cst_28 = arith.constant 5.000000e-01 : f32
    %56 = vector.broadcast %cst_28 : f32 to vector<2x128xf32>
    %57 = arith.mulf %56, %55 : vector<2x128xf32>
    %58 = math.tanh %57 : vector<2x128xf32>
    %cst_29 = arith.constant 1.000000e+00 : f32
    %59 = vector.broadcast %cst_29 : f32 to vector<2x128xf32>
    %60 = arith.addf %58, %59 : vector<2x128xf32>
    %cst_30 = arith.constant 5.000000e-01 : f32
    %61 = vector.broadcast %cst_30 : f32 to vector<2x128xf32>
    %62 = arith.mulf %61, %60 : vector<2x128xf32>
    %63 = vector.extract_strided_slice %54 {offsets = [0, 128], sizes = [2, 128], strides = [1, 1]} : vector<2x512xf32> to vector<2x128xf32>
    %cst_31 = arith.constant 5.000000e-01 : f32
    %64 = vector.broadcast %cst_31 : f32 to vector<2x128xf32>
    %65 = arith.mulf %64, %63 : vector<2x128xf32>
    %66 = math.tanh %65 : vector<2x128xf32>
    %cst_32 = arith.constant 1.000000e+00 : f32
    %67 = vector.broadcast %cst_32 : f32 to vector<2x128xf32>
    %68 = arith.addf %66, %67 : vector<2x128xf32>
    %cst_33 = arith.constant 5.000000e-01 : f32
    %69 = vector.broadcast %cst_33 : f32 to vector<2x128xf32>
    %70 = arith.mulf %69, %68 : vector<2x128xf32>
    %71 = vector.extract_strided_slice %54 {offsets = [0, 256], sizes = [2, 128], strides = [1, 1]} : vector<2x512xf32> to vector<2x128xf32>
    %72 = math.tanh %71 : vector<2x128xf32>
    %73 = vector.extract_strided_slice %54 {offsets = [0, 384], sizes = [2, 128], strides = [1, 1]} : vector<2x512xf32> to vector<2x128xf32>
    %cst_34 = arith.constant 5.000000e-01 : f32
    %74 = vector.broadcast %cst_34 : f32 to vector<2x128xf32>
    %75 = arith.mulf %74, %73 : vector<2x128xf32>
    %76 = math.tanh %75 : vector<2x128xf32>
    %cst_35 = arith.constant 1.000000e+00 : f32
    %77 = vector.broadcast %cst_35 : f32 to vector<2x128xf32>
    %78 = arith.addf %76, %77 : vector<2x128xf32>
    %cst_36 = arith.constant 5.000000e-01 : f32
    %79 = vector.broadcast %cst_36 : f32 to vector<2x128xf32>
    %80 = arith.mulf %79, %78 : vector<2x128xf32>
    %81 = arith.mulf %70, %15 : vector<2x128xf32>
    %82 = arith.mulf %62, %72 : vector<2x128xf32>
    %83 = arith.addf %81, %82 : vector<2x128xf32>
    %84 = math.tanh %83 : vector<2x128xf32>
    %85 = arith.mulf %80, %84 : vector<2x128xf32>
    %86 = vector.extract_strided_slice %11 {offsets = [2, 0], sizes = [2, 512], strides = [1, 1]} : vector<16x512xf32> to vector<2x512xf32>
    %87 = arith.truncf %50 : vector<2x128xf32> to vector<2x128xbf16>
    %cst_37 = arith.constant dense<0.000000e+00> : vector<2x512xf32>
    %88 = tpu.matmul %87, %3, %cst_37 {dimension_numbers = #tpu.dot_dimension_numbers<[1], [0], [0], [1], [0, 0, 1, 1], [], []>} : vector<2x128xbf16>, vector<128x512xbf16>, vector<2x512xf32> -> vector<2x512xf32>
    %89 = arith.addf %86, %88 : vector<2x512xf32>
    %90 = vector.extract_strided_slice %89 {offsets = [0, 0], sizes = [2, 128], strides = [1, 1]} : vector<2x512xf32> to vector<2x128xf32>
    %cst_38 = arith.constant 5.000000e-01 : f32
    %91 = vector.broadcast %cst_38 : f32 to vector<2x128xf32>
    %92 = arith.mulf %91, %90 : vector<2x128xf32>
    %93 = math.tanh %92 : vector<2x128xf32>
    %cst_39 = arith.constant 1.000000e+00 : f32
    %94 = vector.broadcast %cst_39 : f32 to vector<2x128xf32>
    %95 = arith.addf %93, %94 : vector<2x128xf32>
    %cst_40 = arith.constant 5.000000e-01 : f32
    %96 = vector.broadcast %cst_40 : f32 to vector<2x128xf32>
    %97 = arith.mulf %96, %95 : vector<2x128xf32>
    %98 = vector.extract_strided_slice %89 {offsets = [0, 128], sizes = [2, 128], strides = [1, 1]} : vector<2x512xf32> to vector<2x128xf32>
    %cst_41 = arith.constant 5.000000e-01 : f32
    %99 = vector.broadcast %cst_41 : f32 to vector<2x128xf32>
    %100 = arith.mulf %99, %98 : vector<2x128xf32>
    %101 = math.tanh %100 : vector<2x128xf32>
    %cst_42 = arith.constant 1.000000e+00 : f32
    %102 = vector.broadcast %cst_42 : f32 to vector<2x128xf32>
    %103 = arith.addf %101, %102 : vector<2x128xf32>
    %cst_43 = arith.constant 5.000000e-01 : f32
    %104 = vector.broadcast %cst_43 : f32 to vector<2x128xf32>
    %105 = arith.mulf %104, %103 : vector<2x128xf32>
    %106 = vector.extract_strided_slice %89 {offsets = [0, 256], sizes = [2, 128], strides = [1, 1]} : vector<2x512xf32> to vector<2x128xf32>
    %107 = math.tanh %106 : vector<2x128xf32>
    %108 = vector.extract_strided_slice %89 {offsets = [0, 384], sizes = [2, 128], strides = [1, 1]} : vector<2x512xf32> to vector<2x128xf32>
    %cst_44 = arith.constant 5.000000e-01 : f32
    %109 = vector.broadcast %cst_44 : f32 to vector<2x128xf32>
    %110 = arith.mulf %109, %108 : vector<2x128xf32>
    %111 = math.tanh %110 : vector<2x128xf32>
    %cst_45 = arith.constant 1.000000e+00 : f32
    %112 = vector.broadcast %cst_45 : f32 to vector<2x128xf32>
    %113 = arith.addf %111, %112 : vector<2x128xf32>
    %cst_46 = arith.constant 5.000000e-01 : f32
    %114 = vector.broadcast %cst_46 : f32 to vector<2x128xf32>
    %115 = arith.mulf %114, %113 : vector<2x128xf32>
    %116 = arith.mulf %105, %48 : vector<2x128xf32>
    %117 = arith.mulf %97, %107 : vector<2x128xf32>
    %118 = arith.addf %116, %117 : vector<2x128xf32>
    %119 = math.tanh %118 : vector<2x128xf32>
    %120 = arith.mulf %115, %119 : vector<2x128xf32>
    %121 = tpu.concatenate %120, %85 in 1 : vector<2x128xf32>, vector<2x128xf32> -> vector<2x256xf32>
    %122 = arith.truncf %121 : vector<2x256xf32> to vector<2x256xbf16>
    %cst_47 = arith.constant dense<0.000000e+00> : vector<2x512xf32>
    %123 = tpu.matmul %122, %4, %cst_47 {dimension_numbers = #tpu.dot_dimension_numbers<[1], [0], [0], [1], [0, 0, 1, 1], [], []>} : vector<2x256xbf16>, vector<256x512xbf16>, vector<2x512xf32> -> vector<2x512xf32>
    %124 = arith.addf %123, %7 : vector<2x512xf32>
    %125 = vector.extract_strided_slice %124 {offsets = [0, 0], sizes = [2, 128], strides = [1, 1]} : vector<2x512xf32> to vector<2x128xf32>
    %cst_48 = arith.constant 5.000000e-01 : f32
    %126 = vector.broadcast %cst_48 : f32 to vector<2x128xf32>
    %127 = arith.mulf %126, %125 : vector<2x128xf32>
    %128 = math.tanh %127 : vector<2x128xf32>
    %cst_49 = arith.constant 1.000000e+00 : f32
    %129 = vector.broadcast %cst_49 : f32 to vector<2x128xf32>
    %130 = arith.addf %128, %129 : vector<2x128xf32>
    %cst_50 = arith.constant 5.000000e-01 : f32
    %131 = vector.broadcast %cst_50 : f32 to vector<2x128xf32>
    %132 = arith.mulf %131, %130 : vector<2x128xf32>
    %133 = vector.extract_strided_slice %124 {offsets = [0, 128], sizes = [2, 128], strides = [1, 1]} : vector<2x512xf32> to vector<2x128xf32>
    %cst_51 = arith.constant 5.000000e-01 : f32
    %134 = vector.broadcast %cst_51 : f32 to vector<2x128xf32>
    %135 = arith.mulf %134, %133 : vector<2x128xf32>
    %136 = math.tanh %135 : vector<2x128xf32>
    %cst_52 = arith.constant 1.000000e+00 : f32
    %137 = vector.broadcast %cst_52 : f32 to vector<2x128xf32>
    %138 = arith.addf %136, %137 : vector<2x128xf32>
    %cst_53 = arith.constant 5.000000e-01 : f32
    %139 = vector.broadcast %cst_53 : f32 to vector<2x128xf32>
    %140 = arith.mulf %139, %138 : vector<2x128xf32>
    %141 = vector.extract_strided_slice %124 {offsets = [0, 256], sizes = [2, 128], strides = [1, 1]} : vector<2x512xf32> to vector<2x128xf32>
    %142 = math.tanh %141 : vector<2x128xf32>
    %143 = vector.extract_strided_slice %124 {offsets = [0, 384], sizes = [2, 128], strides = [1, 1]} : vector<2x512xf32> to vector<2x128xf32>
    %cst_54 = arith.constant 5.000000e-01 : f32
    %144 = vector.broadcast %cst_54 : f32 to vector<2x128xf32>
    %145 = arith.mulf %144, %143 : vector<2x128xf32>
    %146 = math.tanh %145 : vector<2x128xf32>
    %cst_55 = arith.constant 1.000000e+00 : f32
    %147 = vector.broadcast %cst_55 : f32 to vector<2x128xf32>
    %148 = arith.addf %146, %147 : vector<2x128xf32>
    %cst_56 = arith.constant 5.000000e-01 : f32
    %149 = vector.broadcast %cst_56 : f32 to vector<2x128xf32>
    %150 = arith.mulf %149, %148 : vector<2x128xf32>
    %151 = arith.mulf %140, %83 : vector<2x128xf32>
    %152 = arith.mulf %132, %142 : vector<2x128xf32>
    %153 = arith.addf %151, %152 : vector<2x128xf32>
    %154 = math.tanh %153 : vector<2x128xf32>
    %155 = arith.mulf %150, %154 : vector<2x128xf32>
    %156 = vector.extract_strided_slice %11 {offsets = [4, 0], sizes = [2, 512], strides = [1, 1]} : vector<16x512xf32> to vector<2x512xf32>
    %157 = arith.truncf %120 : vector<2x128xf32> to vector<2x128xbf16>
    %cst_57 = arith.constant dense<0.000000e+00> : vector<2x512xf32>
    %158 = tpu.matmul %157, %3, %cst_57 {dimension_numbers = #tpu.dot_dimension_numbers<[1], [0], [0], [1], [0, 0, 1, 1], [], []>} : vector<2x128xbf16>, vector<128x512xbf16>, vector<2x512xf32> -> vector<2x512xf32>
    %159 = arith.addf %156, %158 : vector<2x512xf32>
    %160 = vector.extract_strided_slice %159 {offsets = [0, 0], sizes = [2, 128], strides = [1, 1]} : vector<2x512xf32> to vector<2x128xf32>
    %cst_58 = arith.constant 5.000000e-01 : f32
    %161 = vector.broadcast %cst_58 : f32 to vector<2x128xf32>
    %162 = arith.mulf %161, %160 : vector<2x128xf32>
    %163 = math.tanh %162 : vector<2x128xf32>
    %cst_59 = arith.constant 1.000000e+00 : f32
    %164 = vector.broadcast %cst_59 : f32 to vector<2x128xf32>
    %165 = arith.addf %163, %164 : vector<2x128xf32>
    %cst_60 = arith.constant 5.000000e-01 : f32
    %166 = vector.broadcast %cst_60 : f32 to vector<2x128xf32>
    %167 = arith.mulf %166, %165 : vector<2x128xf32>
    %168 = vector.extract_strided_slice %159 {offsets = [0, 128], sizes = [2, 128], strides = [1, 1]} : vector<2x512xf32> to vector<2x128xf32>
    %cst_61 = arith.constant 5.000000e-01 : f32
    %169 = vector.broadcast %cst_61 : f32 to vector<2x128xf32>
    %170 = arith.mulf %169, %168 : vector<2x128xf32>
    %171 = math.tanh %170 : vector<2x128xf32>
    %cst_62 = arith.constant 1.000000e+00 : f32
    %172 = vector.broadcast %cst_62 : f32 to vector<2x128xf32>
    %173 = arith.addf %171, %172 : vector<2x128xf32>
    %cst_63 = arith.constant 5.000000e-01 : f32
    %174 = vector.broadcast %cst_63 : f32 to vector<2x128xf32>
    %175 = arith.mulf %174, %173 : vector<2x128xf32>
    %176 = vector.extract_strided_slice %159 {offsets = [0, 256], sizes = [2, 128], strides = [1, 1]} : vector<2x512xf32> to vector<2x128xf32>
    %177 = math.tanh %176 : vector<2x128xf32>
    %178 = vector.extract_strided_slice %159 {offsets = [0, 384], sizes = [2, 128], strides = [1, 1]} : vector<2x512xf32> to vector<2x128xf32>
    %cst_64 = arith.constant 5.000000e-01 : f32
    %179 = vector.broadcast %cst_64 : f32 to vector<2x128xf32>
    %180 = arith.mulf %179, %178 : vector<2x128xf32>
    %181 = math.tanh %180 : vector<2x128xf32>
    %cst_65 = arith.constant 1.000000e+00 : f32
    %182 = vector.broadcast %cst_65 : f32 to vector<2x128xf32>
    %183 = arith.addf %181, %182 : vector<2x128xf32>
    %cst_66 = arith.constant 5.000000e-01 : f32
    %184 = vector.broadcast %cst_66 : f32 to vector<2x128xf32>
    %185 = arith.mulf %184, %183 : vector<2x128xf32>
    %186 = arith.mulf %175, %118 : vector<2x128xf32>
    %187 = arith.mulf %167, %177 : vector<2x128xf32>
    %188 = arith.addf %186, %187 : vector<2x128xf32>
    %189 = math.tanh %188 : vector<2x128xf32>
    %190 = arith.mulf %185, %189 : vector<2x128xf32>
    %191 = tpu.concatenate %190, %155 in 1 : vector<2x128xf32>, vector<2x128xf32> -> vector<2x256xf32>
    %192 = arith.truncf %191 : vector<2x256xf32> to vector<2x256xbf16>
    %cst_67 = arith.constant dense<0.000000e+00> : vector<2x512xf32>
    %193 = tpu.matmul %192, %4, %cst_67 {dimension_numbers = #tpu.dot_dimension_numbers<[1], [0], [0], [1], [0, 0, 1, 1], [], []>} : vector<2x256xbf16>, vector<256x512xbf16>, vector<2x512xf32> -> vector<2x512xf32>
    %194 = arith.addf %193, %7 : vector<2x512xf32>
    %195 = vector.extract_strided_slice %194 {offsets = [0, 0], sizes = [2, 128], strides = [1, 1]} : vector<2x512xf32> to vector<2x128xf32>
    %cst_68 = arith.constant 5.000000e-01 : f32
    %196 = vector.broadcast %cst_68 : f32 to vector<2x128xf32>
    %197 = arith.mulf %196, %195 : vector<2x128xf32>
    %198 = math.tanh %197 : vector<2x128xf32>
    %cst_69 = arith.constant 1.000000e+00 : f32
    %199 = vector.broadcast %cst_69 : f32 to vector<2x128xf32>
    %200 = arith.addf %198, %199 : vector<2x128xf32>
    %cst_70 = arith.constant 5.000000e-01 : f32
    %201 = vector.broadcast %cst_70 : f32 to vector<2x128xf32>
    %202 = arith.mulf %201, %200 : vector<2x128xf32>
    %203 = vector.extract_strided_slice %194 {offsets = [0, 128], sizes = [2, 128], strides = [1, 1]} : vector<2x512xf32> to vector<2x128xf32>
    %cst_71 = arith.constant 5.000000e-01 : f32
    %204 = vector.broadcast %cst_71 : f32 to vector<2x128xf32>
    %205 = arith.mulf %204, %203 : vector<2x128xf32>
    %206 = math.tanh %205 : vector<2x128xf32>
    %cst_72 = arith.constant 1.000000e+00 : f32
    %207 = vector.broadcast %cst_72 : f32 to vector<2x128xf32>
    %208 = arith.addf %206, %207 : vector<2x128xf32>
    %cst_73 = arith.constant 5.000000e-01 : f32
    %209 = vector.broadcast %cst_73 : f32 to vector<2x128xf32>
    %210 = arith.mulf %209, %208 : vector<2x128xf32>
    %211 = vector.extract_strided_slice %194 {offsets = [0, 256], sizes = [2, 128], strides = [1, 1]} : vector<2x512xf32> to vector<2x128xf32>
    %212 = math.tanh %211 : vector<2x128xf32>
    %213 = vector.extract_strided_slice %194 {offsets = [0, 384], sizes = [2, 128], strides = [1, 1]} : vector<2x512xf32> to vector<2x128xf32>
    %cst_74 = arith.constant 5.000000e-01 : f32
    %214 = vector.broadcast %cst_74 : f32 to vector<2x128xf32>
    %215 = arith.mulf %214, %213 : vector<2x128xf32>
    %216 = math.tanh %215 : vector<2x128xf32>
    %cst_75 = arith.constant 1.000000e+00 : f32
    %217 = vector.broadcast %cst_75 : f32 to vector<2x128xf32>
    %218 = arith.addf %216, %217 : vector<2x128xf32>
    %cst_76 = arith.constant 5.000000e-01 : f32
    %219 = vector.broadcast %cst_76 : f32 to vector<2x128xf32>
    %220 = arith.mulf %219, %218 : vector<2x128xf32>
    %221 = arith.mulf %210, %153 : vector<2x128xf32>
    %222 = arith.mulf %202, %212 : vector<2x128xf32>
    %223 = arith.addf %221, %222 : vector<2x128xf32>
    %224 = math.tanh %223 : vector<2x128xf32>
    %225 = arith.mulf %220, %224 : vector<2x128xf32>
    %226 = vector.extract_strided_slice %11 {offsets = [6, 0], sizes = [2, 512], strides = [1, 1]} : vector<16x512xf32> to vector<2x512xf32>
    %227 = arith.truncf %190 : vector<2x128xf32> to vector<2x128xbf16>
    %cst_77 = arith.constant dense<0.000000e+00> : vector<2x512xf32>
    %228 = tpu.matmul %227, %3, %cst_77 {dimension_numbers = #tpu.dot_dimension_numbers<[1], [0], [0], [1], [0, 0, 1, 1], [], []>} : vector<2x128xbf16>, vector<128x512xbf16>, vector<2x512xf32> -> vector<2x512xf32>
    %229 = arith.addf %226, %228 : vector<2x512xf32>
    %230 = vector.extract_strided_slice %229 {offsets = [0, 0], sizes = [2, 128], strides = [1, 1]} : vector<2x512xf32> to vector<2x128xf32>
    %cst_78 = arith.constant 5.000000e-01 : f32
    %231 = vector.broadcast %cst_78 : f32 to vector<2x128xf32>
    %232 = arith.mulf %231, %230 : vector<2x128xf32>
    %233 = math.tanh %232 : vector<2x128xf32>
    %cst_79 = arith.constant 1.000000e+00 : f32
    %234 = vector.broadcast %cst_79 : f32 to vector<2x128xf32>
    %235 = arith.addf %233, %234 : vector<2x128xf32>
    %cst_80 = arith.constant 5.000000e-01 : f32
    %236 = vector.broadcast %cst_80 : f32 to vector<2x128xf32>
    %237 = arith.mulf %236, %235 : vector<2x128xf32>
    %238 = vector.extract_strided_slice %229 {offsets = [0, 128], sizes = [2, 128], strides = [1, 1]} : vector<2x512xf32> to vector<2x128xf32>
    %cst_81 = arith.constant 5.000000e-01 : f32
    %239 = vector.broadcast %cst_81 : f32 to vector<2x128xf32>
    %240 = arith.mulf %239, %238 : vector<2x128xf32>
    %241 = math.tanh %240 : vector<2x128xf32>
    %cst_82 = arith.constant 1.000000e+00 : f32
    %242 = vector.broadcast %cst_82 : f32 to vector<2x128xf32>
    %243 = arith.addf %241, %242 : vector<2x128xf32>
    %cst_83 = arith.constant 5.000000e-01 : f32
    %244 = vector.broadcast %cst_83 : f32 to vector<2x128xf32>
    %245 = arith.mulf %244, %243 : vector<2x128xf32>
    %246 = vector.extract_strided_slice %229 {offsets = [0, 256], sizes = [2, 128], strides = [1, 1]} : vector<2x512xf32> to vector<2x128xf32>
    %247 = math.tanh %246 : vector<2x128xf32>
    %248 = vector.extract_strided_slice %229 {offsets = [0, 384], sizes = [2, 128], strides = [1, 1]} : vector<2x512xf32> to vector<2x128xf32>
    %cst_84 = arith.constant 5.000000e-01 : f32
    %249 = vector.broadcast %cst_84 : f32 to vector<2x128xf32>
    %250 = arith.mulf %249, %248 : vector<2x128xf32>
    %251 = math.tanh %250 : vector<2x128xf32>
    %cst_85 = arith.constant 1.000000e+00 : f32
    %252 = vector.broadcast %cst_85 : f32 to vector<2x128xf32>
    %253 = arith.addf %251, %252 : vector<2x128xf32>
    %cst_86 = arith.constant 5.000000e-01 : f32
    %254 = vector.broadcast %cst_86 : f32 to vector<2x128xf32>
    %255 = arith.mulf %254, %253 : vector<2x128xf32>
    %256 = arith.mulf %245, %188 : vector<2x128xf32>
    %257 = arith.mulf %237, %247 : vector<2x128xf32>
    %258 = arith.addf %256, %257 : vector<2x128xf32>
    %259 = math.tanh %258 : vector<2x128xf32>
    %260 = arith.mulf %255, %259 : vector<2x128xf32>
    %261 = tpu.concatenate %260, %225 in 1 : vector<2x128xf32>, vector<2x128xf32> -> vector<2x256xf32>
    %262 = arith.truncf %261 : vector<2x256xf32> to vector<2x256xbf16>
    %cst_87 = arith.constant dense<0.000000e+00> : vector<2x512xf32>
    %263 = tpu.matmul %262, %4, %cst_87 {dimension_numbers = #tpu.dot_dimension_numbers<[1], [0], [0], [1], [0, 0, 1, 1], [], []>} : vector<2x256xbf16>, vector<256x512xbf16>, vector<2x512xf32> -> vector<2x512xf32>
    %264 = arith.addf %263, %7 : vector<2x512xf32>
    %265 = vector.extract_strided_slice %264 {offsets = [0, 0], sizes = [2, 128], strides = [1, 1]} : vector<2x512xf32> to vector<2x128xf32>
    %cst_88 = arith.constant 5.000000e-01 : f32
    %266 = vector.broadcast %cst_88 : f32 to vector<2x128xf32>
    %267 = arith.mulf %266, %265 : vector<2x128xf32>
    %268 = math.tanh %267 : vector<2x128xf32>
    %cst_89 = arith.constant 1.000000e+00 : f32
    %269 = vector.broadcast %cst_89 : f32 to vector<2x128xf32>
    %270 = arith.addf %268, %269 : vector<2x128xf32>
    %cst_90 = arith.constant 5.000000e-01 : f32
    %271 = vector.broadcast %cst_90 : f32 to vector<2x128xf32>
    %272 = arith.mulf %271, %270 : vector<2x128xf32>
    %273 = vector.extract_strided_slice %264 {offsets = [0, 128], sizes = [2, 128], strides = [1, 1]} : vector<2x512xf32> to vector<2x128xf32>
    %cst_91 = arith.constant 5.000000e-01 : f32
    %274 = vector.broadcast %cst_91 : f32 to vector<2x128xf32>
    %275 = arith.mulf %274, %273 : vector<2x128xf32>
    %276 = math.tanh %275 : vector<2x128xf32>
    %cst_92 = arith.constant 1.000000e+00 : f32
    %277 = vector.broadcast %cst_92 : f32 to vector<2x128xf32>
    %278 = arith.addf %276, %277 : vector<2x128xf32>
    %cst_93 = arith.constant 5.000000e-01 : f32
    %279 = vector.broadcast %cst_93 : f32 to vector<2x128xf32>
    %280 = arith.mulf %279, %278 : vector<2x128xf32>
    %281 = vector.extract_strided_slice %264 {offsets = [0, 256], sizes = [2, 128], strides = [1, 1]} : vector<2x512xf32> to vector<2x128xf32>
    %282 = math.tanh %281 : vector<2x128xf32>
    %283 = vector.extract_strided_slice %264 {offsets = [0, 384], sizes = [2, 128], strides = [1, 1]} : vector<2x512xf32> to vector<2x128xf32>
    %cst_94 = arith.constant 5.000000e-01 : f32
    %284 = vector.broadcast %cst_94 : f32 to vector<2x128xf32>
    %285 = arith.mulf %284, %283 : vector<2x128xf32>
    %286 = math.tanh %285 : vector<2x128xf32>
    %cst_95 = arith.constant 1.000000e+00 : f32
    %287 = vector.broadcast %cst_95 : f32 to vector<2x128xf32>
    %288 = arith.addf %286, %287 : vector<2x128xf32>
    %cst_96 = arith.constant 5.000000e-01 : f32
    %289 = vector.broadcast %cst_96 : f32 to vector<2x128xf32>
    %290 = arith.mulf %289, %288 : vector<2x128xf32>
    %291 = arith.mulf %280, %223 : vector<2x128xf32>
    %292 = arith.mulf %272, %282 : vector<2x128xf32>
    %293 = arith.addf %291, %292 : vector<2x128xf32>
    %294 = math.tanh %293 : vector<2x128xf32>
    %295 = arith.mulf %290, %294 : vector<2x128xf32>
    %296 = vector.extract_strided_slice %11 {offsets = [8, 0], sizes = [2, 512], strides = [1, 1]} : vector<16x512xf32> to vector<2x512xf32>
    %297 = arith.truncf %260 : vector<2x128xf32> to vector<2x128xbf16>
    %cst_97 = arith.constant dense<0.000000e+00> : vector<2x512xf32>
    %298 = tpu.matmul %297, %3, %cst_97 {dimension_numbers = #tpu.dot_dimension_numbers<[1], [0], [0], [1], [0, 0, 1, 1], [], []>} : vector<2x128xbf16>, vector<128x512xbf16>, vector<2x512xf32> -> vector<2x512xf32>
    %299 = arith.addf %296, %298 : vector<2x512xf32>
    %300 = vector.extract_strided_slice %299 {offsets = [0, 0], sizes = [2, 128], strides = [1, 1]} : vector<2x512xf32> to vector<2x128xf32>
    %cst_98 = arith.constant 5.000000e-01 : f32
    %301 = vector.broadcast %cst_98 : f32 to vector<2x128xf32>
    %302 = arith.mulf %301, %300 : vector<2x128xf32>
    %303 = math.tanh %302 : vector<2x128xf32>
    %cst_99 = arith.constant 1.000000e+00 : f32
    %304 = vector.broadcast %cst_99 : f32 to vector<2x128xf32>
    %305 = arith.addf %303, %304 : vector<2x128xf32>
    %cst_100 = arith.constant 5.000000e-01 : f32
    %306 = vector.broadcast %cst_100 : f32 to vector<2x128xf32>
    %307 = arith.mulf %306, %305 : vector<2x128xf32>
    %308 = vector.extract_strided_slice %299 {offsets = [0, 128], sizes = [2, 128], strides = [1, 1]} : vector<2x512xf32> to vector<2x128xf32>
    %cst_101 = arith.constant 5.000000e-01 : f32
    %309 = vector.broadcast %cst_101 : f32 to vector<2x128xf32>
    %310 = arith.mulf %309, %308 : vector<2x128xf32>
    %311 = math.tanh %310 : vector<2x128xf32>
    %cst_102 = arith.constant 1.000000e+00 : f32
    %312 = vector.broadcast %cst_102 : f32 to vector<2x128xf32>
    %313 = arith.addf %311, %312 : vector<2x128xf32>
    %cst_103 = arith.constant 5.000000e-01 : f32
    %314 = vector.broadcast %cst_103 : f32 to vector<2x128xf32>
    %315 = arith.mulf %314, %313 : vector<2x128xf32>
    %316 = vector.extract_strided_slice %299 {offsets = [0, 256], sizes = [2, 128], strides = [1, 1]} : vector<2x512xf32> to vector<2x128xf32>
    %317 = math.tanh %316 : vector<2x128xf32>
    %318 = vector.extract_strided_slice %299 {offsets = [0, 384], sizes = [2, 128], strides = [1, 1]} : vector<2x512xf32> to vector<2x128xf32>
    %cst_104 = arith.constant 5.000000e-01 : f32
    %319 = vector.broadcast %cst_104 : f32 to vector<2x128xf32>
    %320 = arith.mulf %319, %318 : vector<2x128xf32>
    %321 = math.tanh %320 : vector<2x128xf32>
    %cst_105 = arith.constant 1.000000e+00 : f32
    %322 = vector.broadcast %cst_105 : f32 to vector<2x128xf32>
    %323 = arith.addf %321, %322 : vector<2x128xf32>
    %cst_106 = arith.constant 5.000000e-01 : f32
    %324 = vector.broadcast %cst_106 : f32 to vector<2x128xf32>
    %325 = arith.mulf %324, %323 : vector<2x128xf32>
    %326 = arith.mulf %315, %258 : vector<2x128xf32>
    %327 = arith.mulf %307, %317 : vector<2x128xf32>
    %328 = arith.addf %326, %327 : vector<2x128xf32>
    %329 = math.tanh %328 : vector<2x128xf32>
    %330 = arith.mulf %325, %329 : vector<2x128xf32>
    %331 = tpu.concatenate %330, %295 in 1 : vector<2x128xf32>, vector<2x128xf32> -> vector<2x256xf32>
    %332 = arith.truncf %331 : vector<2x256xf32> to vector<2x256xbf16>
    %cst_107 = arith.constant dense<0.000000e+00> : vector<2x512xf32>
    %333 = tpu.matmul %332, %4, %cst_107 {dimension_numbers = #tpu.dot_dimension_numbers<[1], [0], [0], [1], [0, 0, 1, 1], [], []>} : vector<2x256xbf16>, vector<256x512xbf16>, vector<2x512xf32> -> vector<2x512xf32>
    %334 = arith.addf %333, %7 : vector<2x512xf32>
    %335 = vector.extract_strided_slice %334 {offsets = [0, 0], sizes = [2, 128], strides = [1, 1]} : vector<2x512xf32> to vector<2x128xf32>
    %cst_108 = arith.constant 5.000000e-01 : f32
    %336 = vector.broadcast %cst_108 : f32 to vector<2x128xf32>
    %337 = arith.mulf %336, %335 : vector<2x128xf32>
    %338 = math.tanh %337 : vector<2x128xf32>
    %cst_109 = arith.constant 1.000000e+00 : f32
    %339 = vector.broadcast %cst_109 : f32 to vector<2x128xf32>
    %340 = arith.addf %338, %339 : vector<2x128xf32>
    %cst_110 = arith.constant 5.000000e-01 : f32
    %341 = vector.broadcast %cst_110 : f32 to vector<2x128xf32>
    %342 = arith.mulf %341, %340 : vector<2x128xf32>
    %343 = vector.extract_strided_slice %334 {offsets = [0, 128], sizes = [2, 128], strides = [1, 1]} : vector<2x512xf32> to vector<2x128xf32>
    %cst_111 = arith.constant 5.000000e-01 : f32
    %344 = vector.broadcast %cst_111 : f32 to vector<2x128xf32>
    %345 = arith.mulf %344, %343 : vector<2x128xf32>
    %346 = math.tanh %345 : vector<2x128xf32>
    %cst_112 = arith.constant 1.000000e+00 : f32
    %347 = vector.broadcast %cst_112 : f32 to vector<2x128xf32>
    %348 = arith.addf %346, %347 : vector<2x128xf32>
    %cst_113 = arith.constant 5.000000e-01 : f32
    %349 = vector.broadcast %cst_113 : f32 to vector<2x128xf32>
    %350 = arith.mulf %349, %348 : vector<2x128xf32>
    %351 = vector.extract_strided_slice %334 {offsets = [0, 256], sizes = [2, 128], strides = [1, 1]} : vector<2x512xf32> to vector<2x128xf32>
    %352 = math.tanh %351 : vector<2x128xf32>
    %353 = vector.extract_strided_slice %334 {offsets = [0, 384], sizes = [2, 128], strides = [1, 1]} : vector<2x512xf32> to vector<2x128xf32>
    %cst_114 = arith.constant 5.000000e-01 : f32
    %354 = vector.broadcast %cst_114 : f32 to vector<2x128xf32>
    %355 = arith.mulf %354, %353 : vector<2x128xf32>
    %356 = math.tanh %355 : vector<2x128xf32>
    %cst_115 = arith.constant 1.000000e+00 : f32
    %357 = vector.broadcast %cst_115 : f32 to vector<2x128xf32>
    %358 = arith.addf %356, %357 : vector<2x128xf32>
    %cst_116 = arith.constant 5.000000e-01 : f32
    %359 = vector.broadcast %cst_116 : f32 to vector<2x128xf32>
    %360 = arith.mulf %359, %358 : vector<2x128xf32>
    %361 = arith.mulf %350, %293 : vector<2x128xf32>
    %362 = arith.mulf %342, %352 : vector<2x128xf32>
    %363 = arith.addf %361, %362 : vector<2x128xf32>
    %364 = math.tanh %363 : vector<2x128xf32>
    %365 = arith.mulf %360, %364 : vector<2x128xf32>
    %366 = vector.extract_strided_slice %11 {offsets = [10, 0], sizes = [2, 512], strides = [1, 1]} : vector<16x512xf32> to vector<2x512xf32>
    %367 = arith.truncf %330 : vector<2x128xf32> to vector<2x128xbf16>
    %cst_117 = arith.constant dense<0.000000e+00> : vector<2x512xf32>
    %368 = tpu.matmul %367, %3, %cst_117 {dimension_numbers = #tpu.dot_dimension_numbers<[1], [0], [0], [1], [0, 0, 1, 1], [], []>} : vector<2x128xbf16>, vector<128x512xbf16>, vector<2x512xf32> -> vector<2x512xf32>
    %369 = arith.addf %366, %368 : vector<2x512xf32>
    %370 = vector.extract_strided_slice %369 {offsets = [0, 0], sizes = [2, 128], strides = [1, 1]} : vector<2x512xf32> to vector<2x128xf32>
    %cst_118 = arith.constant 5.000000e-01 : f32
    %371 = vector.broadcast %cst_118 : f32 to vector<2x128xf32>
    %372 = arith.mulf %371, %370 : vector<2x128xf32>
    %373 = math.tanh %372 : vector<2x128xf32>
    %cst_119 = arith.constant 1.000000e+00 : f32
    %374 = vector.broadcast %cst_119 : f32 to vector<2x128xf32>
    %375 = arith.addf %373, %374 : vector<2x128xf32>
    %cst_120 = arith.constant 5.000000e-01 : f32
    %376 = vector.broadcast %cst_120 : f32 to vector<2x128xf32>
    %377 = arith.mulf %376, %375 : vector<2x128xf32>
    %378 = vector.extract_strided_slice %369 {offsets = [0, 128], sizes = [2, 128], strides = [1, 1]} : vector<2x512xf32> to vector<2x128xf32>
    %cst_121 = arith.constant 5.000000e-01 : f32
    %379 = vector.broadcast %cst_121 : f32 to vector<2x128xf32>
    %380 = arith.mulf %379, %378 : vector<2x128xf32>
    %381 = math.tanh %380 : vector<2x128xf32>
    %cst_122 = arith.constant 1.000000e+00 : f32
    %382 = vector.broadcast %cst_122 : f32 to vector<2x128xf32>
    %383 = arith.addf %381, %382 : vector<2x128xf32>
    %cst_123 = arith.constant 5.000000e-01 : f32
    %384 = vector.broadcast %cst_123 : f32 to vector<2x128xf32>
    %385 = arith.mulf %384, %383 : vector<2x128xf32>
    %386 = vector.extract_strided_slice %369 {offsets = [0, 256], sizes = [2, 128], strides = [1, 1]} : vector<2x512xf32> to vector<2x128xf32>
    %387 = math.tanh %386 : vector<2x128xf32>
    %388 = vector.extract_strided_slice %369 {offsets = [0, 384], sizes = [2, 128], strides = [1, 1]} : vector<2x512xf32> to vector<2x128xf32>
    %cst_124 = arith.constant 5.000000e-01 : f32
    %389 = vector.broadcast %cst_124 : f32 to vector<2x128xf32>
    %390 = arith.mulf %389, %388 : vector<2x128xf32>
    %391 = math.tanh %390 : vector<2x128xf32>
    %cst_125 = arith.constant 1.000000e+00 : f32
    %392 = vector.broadcast %cst_125 : f32 to vector<2x128xf32>
    %393 = arith.addf %391, %392 : vector<2x128xf32>
    %cst_126 = arith.constant 5.000000e-01 : f32
    %394 = vector.broadcast %cst_126 : f32 to vector<2x128xf32>
    %395 = arith.mulf %394, %393 : vector<2x128xf32>
    %396 = arith.mulf %385, %328 : vector<2x128xf32>
    %397 = arith.mulf %377, %387 : vector<2x128xf32>
    %398 = arith.addf %396, %397 : vector<2x128xf32>
    %399 = math.tanh %398 : vector<2x128xf32>
    %400 = arith.mulf %395, %399 : vector<2x128xf32>
    %401 = tpu.concatenate %400, %365 in 1 : vector<2x128xf32>, vector<2x128xf32> -> vector<2x256xf32>
    %402 = arith.truncf %401 : vector<2x256xf32> to vector<2x256xbf16>
    %cst_127 = arith.constant dense<0.000000e+00> : vector<2x512xf32>
    %403 = tpu.matmul %402, %4, %cst_127 {dimension_numbers = #tpu.dot_dimension_numbers<[1], [0], [0], [1], [0, 0, 1, 1], [], []>} : vector<2x256xbf16>, vector<256x512xbf16>, vector<2x512xf32> -> vector<2x512xf32>
    %404 = arith.addf %403, %7 : vector<2x512xf32>
    %405 = vector.extract_strided_slice %404 {offsets = [0, 0], sizes = [2, 128], strides = [1, 1]} : vector<2x512xf32> to vector<2x128xf32>
    %cst_128 = arith.constant 5.000000e-01 : f32
    %406 = vector.broadcast %cst_128 : f32 to vector<2x128xf32>
    %407 = arith.mulf %406, %405 : vector<2x128xf32>
    %408 = math.tanh %407 : vector<2x128xf32>
    %cst_129 = arith.constant 1.000000e+00 : f32
    %409 = vector.broadcast %cst_129 : f32 to vector<2x128xf32>
    %410 = arith.addf %408, %409 : vector<2x128xf32>
    %cst_130 = arith.constant 5.000000e-01 : f32
    %411 = vector.broadcast %cst_130 : f32 to vector<2x128xf32>
    %412 = arith.mulf %411, %410 : vector<2x128xf32>
    %413 = vector.extract_strided_slice %404 {offsets = [0, 128], sizes = [2, 128], strides = [1, 1]} : vector<2x512xf32> to vector<2x128xf32>
    %cst_131 = arith.constant 5.000000e-01 : f32
    %414 = vector.broadcast %cst_131 : f32 to vector<2x128xf32>
    %415 = arith.mulf %414, %413 : vector<2x128xf32>
    %416 = math.tanh %415 : vector<2x128xf32>
    %cst_132 = arith.constant 1.000000e+00 : f32
    %417 = vector.broadcast %cst_132 : f32 to vector<2x128xf32>
    %418 = arith.addf %416, %417 : vector<2x128xf32>
    %cst_133 = arith.constant 5.000000e-01 : f32
    %419 = vector.broadcast %cst_133 : f32 to vector<2x128xf32>
    %420 = arith.mulf %419, %418 : vector<2x128xf32>
    %421 = vector.extract_strided_slice %404 {offsets = [0, 256], sizes = [2, 128], strides = [1, 1]} : vector<2x512xf32> to vector<2x128xf32>
    %422 = math.tanh %421 : vector<2x128xf32>
    %423 = vector.extract_strided_slice %404 {offsets = [0, 384], sizes = [2, 128], strides = [1, 1]} : vector<2x512xf32> to vector<2x128xf32>
    %cst_134 = arith.constant 5.000000e-01 : f32
    %424 = vector.broadcast %cst_134 : f32 to vector<2x128xf32>
    %425 = arith.mulf %424, %423 : vector<2x128xf32>
    %426 = math.tanh %425 : vector<2x128xf32>
    %cst_135 = arith.constant 1.000000e+00 : f32
    %427 = vector.broadcast %cst_135 : f32 to vector<2x128xf32>
    %428 = arith.addf %426, %427 : vector<2x128xf32>
    %cst_136 = arith.constant 5.000000e-01 : f32
    %429 = vector.broadcast %cst_136 : f32 to vector<2x128xf32>
    %430 = arith.mulf %429, %428 : vector<2x128xf32>
    %431 = arith.mulf %420, %363 : vector<2x128xf32>
    %432 = arith.mulf %412, %422 : vector<2x128xf32>
    %433 = arith.addf %431, %432 : vector<2x128xf32>
    %434 = math.tanh %433 : vector<2x128xf32>
    %435 = arith.mulf %430, %434 : vector<2x128xf32>
    %436 = vector.extract_strided_slice %11 {offsets = [12, 0], sizes = [2, 512], strides = [1, 1]} : vector<16x512xf32> to vector<2x512xf32>
    %437 = arith.truncf %400 : vector<2x128xf32> to vector<2x128xbf16>
    %cst_137 = arith.constant dense<0.000000e+00> : vector<2x512xf32>
    %438 = tpu.matmul %437, %3, %cst_137 {dimension_numbers = #tpu.dot_dimension_numbers<[1], [0], [0], [1], [0, 0, 1, 1], [], []>} : vector<2x128xbf16>, vector<128x512xbf16>, vector<2x512xf32> -> vector<2x512xf32>
    %439 = arith.addf %436, %438 : vector<2x512xf32>
    %440 = vector.extract_strided_slice %439 {offsets = [0, 0], sizes = [2, 128], strides = [1, 1]} : vector<2x512xf32> to vector<2x128xf32>
    %cst_138 = arith.constant 5.000000e-01 : f32
    %441 = vector.broadcast %cst_138 : f32 to vector<2x128xf32>
    %442 = arith.mulf %441, %440 : vector<2x128xf32>
    %443 = math.tanh %442 : vector<2x128xf32>
    %cst_139 = arith.constant 1.000000e+00 : f32
    %444 = vector.broadcast %cst_139 : f32 to vector<2x128xf32>
    %445 = arith.addf %443, %444 : vector<2x128xf32>
    %cst_140 = arith.constant 5.000000e-01 : f32
    %446 = vector.broadcast %cst_140 : f32 to vector<2x128xf32>
    %447 = arith.mulf %446, %445 : vector<2x128xf32>
    %448 = vector.extract_strided_slice %439 {offsets = [0, 128], sizes = [2, 128], strides = [1, 1]} : vector<2x512xf32> to vector<2x128xf32>
    %cst_141 = arith.constant 5.000000e-01 : f32
    %449 = vector.broadcast %cst_141 : f32 to vector<2x128xf32>
    %450 = arith.mulf %449, %448 : vector<2x128xf32>
    %451 = math.tanh %450 : vector<2x128xf32>
    %cst_142 = arith.constant 1.000000e+00 : f32
    %452 = vector.broadcast %cst_142 : f32 to vector<2x128xf32>
    %453 = arith.addf %451, %452 : vector<2x128xf32>
    %cst_143 = arith.constant 5.000000e-01 : f32
    %454 = vector.broadcast %cst_143 : f32 to vector<2x128xf32>
    %455 = arith.mulf %454, %453 : vector<2x128xf32>
    %456 = vector.extract_strided_slice %439 {offsets = [0, 256], sizes = [2, 128], strides = [1, 1]} : vector<2x512xf32> to vector<2x128xf32>
    %457 = math.tanh %456 : vector<2x128xf32>
    %458 = vector.extract_strided_slice %439 {offsets = [0, 384], sizes = [2, 128], strides = [1, 1]} : vector<2x512xf32> to vector<2x128xf32>
    %cst_144 = arith.constant 5.000000e-01 : f32
    %459 = vector.broadcast %cst_144 : f32 to vector<2x128xf32>
    %460 = arith.mulf %459, %458 : vector<2x128xf32>
    %461 = math.tanh %460 : vector<2x128xf32>
    %cst_145 = arith.constant 1.000000e+00 : f32
    %462 = vector.broadcast %cst_145 : f32 to vector<2x128xf32>
    %463 = arith.addf %461, %462 : vector<2x128xf32>
    %cst_146 = arith.constant 5.000000e-01 : f32
    %464 = vector.broadcast %cst_146 : f32 to vector<2x128xf32>
    %465 = arith.mulf %464, %463 : vector<2x128xf32>
    %466 = arith.mulf %455, %398 : vector<2x128xf32>
    %467 = arith.mulf %447, %457 : vector<2x128xf32>
    %468 = arith.addf %466, %467 : vector<2x128xf32>
    %469 = math.tanh %468 : vector<2x128xf32>
    %470 = arith.mulf %465, %469 : vector<2x128xf32>
    %471 = tpu.concatenate %470, %435 in 1 : vector<2x128xf32>, vector<2x128xf32> -> vector<2x256xf32>
    %472 = arith.truncf %471 : vector<2x256xf32> to vector<2x256xbf16>
    %cst_147 = arith.constant dense<0.000000e+00> : vector<2x512xf32>
    %473 = tpu.matmul %472, %4, %cst_147 {dimension_numbers = #tpu.dot_dimension_numbers<[1], [0], [0], [1], [0, 0, 1, 1], [], []>} : vector<2x256xbf16>, vector<256x512xbf16>, vector<2x512xf32> -> vector<2x512xf32>
    %474 = arith.addf %473, %7 : vector<2x512xf32>
    %475 = vector.extract_strided_slice %474 {offsets = [0, 0], sizes = [2, 128], strides = [1, 1]} : vector<2x512xf32> to vector<2x128xf32>
    %cst_148 = arith.constant 5.000000e-01 : f32
    %476 = vector.broadcast %cst_148 : f32 to vector<2x128xf32>
    %477 = arith.mulf %476, %475 : vector<2x128xf32>
    %478 = math.tanh %477 : vector<2x128xf32>
    %cst_149 = arith.constant 1.000000e+00 : f32
    %479 = vector.broadcast %cst_149 : f32 to vector<2x128xf32>
    %480 = arith.addf %478, %479 : vector<2x128xf32>
    %cst_150 = arith.constant 5.000000e-01 : f32
    %481 = vector.broadcast %cst_150 : f32 to vector<2x128xf32>
    %482 = arith.mulf %481, %480 : vector<2x128xf32>
    %483 = vector.extract_strided_slice %474 {offsets = [0, 128], sizes = [2, 128], strides = [1, 1]} : vector<2x512xf32> to vector<2x128xf32>
    %cst_151 = arith.constant 5.000000e-01 : f32
    %484 = vector.broadcast %cst_151 : f32 to vector<2x128xf32>
    %485 = arith.mulf %484, %483 : vector<2x128xf32>
    %486 = math.tanh %485 : vector<2x128xf32>
    %cst_152 = arith.constant 1.000000e+00 : f32
    %487 = vector.broadcast %cst_152 : f32 to vector<2x128xf32>
    %488 = arith.addf %486, %487 : vector<2x128xf32>
    %cst_153 = arith.constant 5.000000e-01 : f32
    %489 = vector.broadcast %cst_153 : f32 to vector<2x128xf32>
    %490 = arith.mulf %489, %488 : vector<2x128xf32>
    %491 = vector.extract_strided_slice %474 {offsets = [0, 256], sizes = [2, 128], strides = [1, 1]} : vector<2x512xf32> to vector<2x128xf32>
    %492 = math.tanh %491 : vector<2x128xf32>
    %493 = vector.extract_strided_slice %474 {offsets = [0, 384], sizes = [2, 128], strides = [1, 1]} : vector<2x512xf32> to vector<2x128xf32>
    %cst_154 = arith.constant 5.000000e-01 : f32
    %494 = vector.broadcast %cst_154 : f32 to vector<2x128xf32>
    %495 = arith.mulf %494, %493 : vector<2x128xf32>
    %496 = math.tanh %495 : vector<2x128xf32>
    %cst_155 = arith.constant 1.000000e+00 : f32
    %497 = vector.broadcast %cst_155 : f32 to vector<2x128xf32>
    %498 = arith.addf %496, %497 : vector<2x128xf32>
    %cst_156 = arith.constant 5.000000e-01 : f32
    %499 = vector.broadcast %cst_156 : f32 to vector<2x128xf32>
    %500 = arith.mulf %499, %498 : vector<2x128xf32>
    %501 = arith.mulf %490, %433 : vector<2x128xf32>
    %502 = arith.mulf %482, %492 : vector<2x128xf32>
    %503 = arith.addf %501, %502 : vector<2x128xf32>
    %504 = math.tanh %503 : vector<2x128xf32>
    %505 = arith.mulf %500, %504 : vector<2x128xf32>
    %506 = vector.extract_strided_slice %11 {offsets = [14, 0], sizes = [2, 512], strides = [1, 1]} : vector<16x512xf32> to vector<2x512xf32>
    %507 = arith.truncf %470 : vector<2x128xf32> to vector<2x128xbf16>
    %cst_157 = arith.constant dense<0.000000e+00> : vector<2x512xf32>
    %508 = tpu.matmul %507, %3, %cst_157 {dimension_numbers = #tpu.dot_dimension_numbers<[1], [0], [0], [1], [0, 0, 1, 1], [], []>} : vector<2x128xbf16>, vector<128x512xbf16>, vector<2x512xf32> -> vector<2x512xf32>
    %509 = arith.addf %506, %508 : vector<2x512xf32>
    %510 = vector.extract_strided_slice %509 {offsets = [0, 0], sizes = [2, 128], strides = [1, 1]} : vector<2x512xf32> to vector<2x128xf32>
    %cst_158 = arith.constant 5.000000e-01 : f32
    %511 = vector.broadcast %cst_158 : f32 to vector<2x128xf32>
    %512 = arith.mulf %511, %510 : vector<2x128xf32>
    %513 = math.tanh %512 : vector<2x128xf32>
    %cst_159 = arith.constant 1.000000e+00 : f32
    %514 = vector.broadcast %cst_159 : f32 to vector<2x128xf32>
    %515 = arith.addf %513, %514 : vector<2x128xf32>
    %cst_160 = arith.constant 5.000000e-01 : f32
    %516 = vector.broadcast %cst_160 : f32 to vector<2x128xf32>
    %517 = arith.mulf %516, %515 : vector<2x128xf32>
    %518 = vector.extract_strided_slice %509 {offsets = [0, 128], sizes = [2, 128], strides = [1, 1]} : vector<2x512xf32> to vector<2x128xf32>
    %cst_161 = arith.constant 5.000000e-01 : f32
    %519 = vector.broadcast %cst_161 : f32 to vector<2x128xf32>
    %520 = arith.mulf %519, %518 : vector<2x128xf32>
    %521 = math.tanh %520 : vector<2x128xf32>
    %cst_162 = arith.constant 1.000000e+00 : f32
    %522 = vector.broadcast %cst_162 : f32 to vector<2x128xf32>
    %523 = arith.addf %521, %522 : vector<2x128xf32>
    %cst_163 = arith.constant 5.000000e-01 : f32
    %524 = vector.broadcast %cst_163 : f32 to vector<2x128xf32>
    %525 = arith.mulf %524, %523 : vector<2x128xf32>
    %526 = vector.extract_strided_slice %509 {offsets = [0, 256], sizes = [2, 128], strides = [1, 1]} : vector<2x512xf32> to vector<2x128xf32>
    %527 = math.tanh %526 : vector<2x128xf32>
    %528 = vector.extract_strided_slice %509 {offsets = [0, 384], sizes = [2, 128], strides = [1, 1]} : vector<2x512xf32> to vector<2x128xf32>
    %cst_164 = arith.constant 5.000000e-01 : f32
    %529 = vector.broadcast %cst_164 : f32 to vector<2x128xf32>
    %530 = arith.mulf %529, %528 : vector<2x128xf32>
    %531 = math.tanh %530 : vector<2x128xf32>
    %cst_165 = arith.constant 1.000000e+00 : f32
    %532 = vector.broadcast %cst_165 : f32 to vector<2x128xf32>
    %533 = arith.addf %531, %532 : vector<2x128xf32>
    %cst_166 = arith.constant 5.000000e-01 : f32
    %534 = vector.broadcast %cst_166 : f32 to vector<2x128xf32>
    %535 = arith.mulf %534, %533 : vector<2x128xf32>
    %536 = arith.mulf %525, %468 : vector<2x128xf32>
    %537 = arith.mulf %517, %527 : vector<2x128xf32>
    %538 = arith.addf %536, %537 : vector<2x128xf32>
    %539 = math.tanh %538 : vector<2x128xf32>
    %540 = arith.mulf %535, %539 : vector<2x128xf32>
    %541 = tpu.concatenate %540, %505 in 1 : vector<2x128xf32>, vector<2x128xf32> -> vector<2x256xf32>
    %542 = arith.truncf %541 : vector<2x256xf32> to vector<2x256xbf16>
    %cst_167 = arith.constant dense<0.000000e+00> : vector<2x512xf32>
    %543 = tpu.matmul %542, %4, %cst_167 {dimension_numbers = #tpu.dot_dimension_numbers<[1], [0], [0], [1], [0, 0, 1, 1], [], []>} : vector<2x256xbf16>, vector<256x512xbf16>, vector<2x512xf32> -> vector<2x512xf32>
    %544 = arith.addf %543, %7 : vector<2x512xf32>
    %545 = vector.extract_strided_slice %544 {offsets = [0, 0], sizes = [2, 128], strides = [1, 1]} : vector<2x512xf32> to vector<2x128xf32>
    %cst_168 = arith.constant 5.000000e-01 : f32
    %546 = vector.broadcast %cst_168 : f32 to vector<2x128xf32>
    %547 = arith.mulf %546, %545 : vector<2x128xf32>
    %548 = math.tanh %547 : vector<2x128xf32>
    %cst_169 = arith.constant 1.000000e+00 : f32
    %549 = vector.broadcast %cst_169 : f32 to vector<2x128xf32>
    %550 = arith.addf %548, %549 : vector<2x128xf32>
    %cst_170 = arith.constant 5.000000e-01 : f32
    %551 = vector.broadcast %cst_170 : f32 to vector<2x128xf32>
    %552 = arith.mulf %551, %550 : vector<2x128xf32>
    %553 = vector.extract_strided_slice %544 {offsets = [0, 128], sizes = [2, 128], strides = [1, 1]} : vector<2x512xf32> to vector<2x128xf32>
    %cst_171 = arith.constant 5.000000e-01 : f32
    %554 = vector.broadcast %cst_171 : f32 to vector<2x128xf32>
    %555 = arith.mulf %554, %553 : vector<2x128xf32>
    %556 = math.tanh %555 : vector<2x128xf32>
    %cst_172 = arith.constant 1.000000e+00 : f32
    %557 = vector.broadcast %cst_172 : f32 to vector<2x128xf32>
    %558 = arith.addf %556, %557 : vector<2x128xf32>
    %cst_173 = arith.constant 5.000000e-01 : f32
    %559 = vector.broadcast %cst_173 : f32 to vector<2x128xf32>
    %560 = arith.mulf %559, %558 : vector<2x128xf32>
    %561 = vector.extract_strided_slice %544 {offsets = [0, 256], sizes = [2, 128], strides = [1, 1]} : vector<2x512xf32> to vector<2x128xf32>
    %562 = math.tanh %561 : vector<2x128xf32>
    %563 = vector.extract_strided_slice %544 {offsets = [0, 384], sizes = [2, 128], strides = [1, 1]} : vector<2x512xf32> to vector<2x128xf32>
    %cst_174 = arith.constant 5.000000e-01 : f32
    %564 = vector.broadcast %cst_174 : f32 to vector<2x128xf32>
    %565 = arith.mulf %564, %563 : vector<2x128xf32>
    %566 = math.tanh %565 : vector<2x128xf32>
    %cst_175 = arith.constant 1.000000e+00 : f32
    %567 = vector.broadcast %cst_175 : f32 to vector<2x128xf32>
    %568 = arith.addf %566, %567 : vector<2x128xf32>
    %cst_176 = arith.constant 5.000000e-01 : f32
    %569 = vector.broadcast %cst_176 : f32 to vector<2x128xf32>
    %570 = arith.mulf %569, %568 : vector<2x128xf32>
    %571 = arith.mulf %560, %503 : vector<2x128xf32>
    %572 = arith.mulf %552, %562 : vector<2x128xf32>
    %573 = arith.addf %571, %572 : vector<2x128xf32>
    %574 = math.tanh %573 : vector<2x128xf32>
    %575 = arith.mulf %570, %574 : vector<2x128xf32>
    %576 = vector.extract_strided_slice %575 {offsets = [0, 0], sizes = [2, 32], strides = [1, 1]} : vector<2x128xf32> to vector<2x32xf32>
    %577 = vector.extract_strided_slice %575 {offsets = [0, 32], sizes = [2, 32], strides = [1, 1]} : vector<2x128xf32> to vector<2x32xf32>
    %578 = vector.extract_strided_slice %575 {offsets = [0, 64], sizes = [2, 32], strides = [1, 1]} : vector<2x128xf32> to vector<2x32xf32>
    %c0_177 = arith.constant 0 : index
    %c0_178 = arith.constant 0 : index
    %c0_179 = arith.constant 0 : index
    %579 = vector.load %arg8[%c0_177, %c0_178, %c0_179] : memref<3x2x32xf32, #tpu.memory_space<vmem>>, vector<1x2x32xf32>
    %580 = vector.shape_cast %579 : vector<1x2x32xf32> to vector<2x32xf32>
    %581 = vector.shape_cast %576 : vector<2x32xf32> to vector<1x2x32xf32>
    tpu.vector_store %arg8[%c0_177, %c0_178, %c0_179], %581 {strides = array<i32>} : memref<3x2x32xf32, #tpu.memory_space<vmem>>, vector<1x2x32xf32>,
    %c1 = arith.constant 1 : index
    %c0_180 = arith.constant 0 : index
    %c0_181 = arith.constant 0 : index
    %582 = vector.load %arg8[%c1, %c0_180, %c0_181] : memref<3x2x32xf32, #tpu.memory_space<vmem>>, vector<1x2x32xf32>
    %583 = vector.shape_cast %582 : vector<1x2x32xf32> to vector<2x32xf32>
    %584 = vector.shape_cast %577 : vector<2x32xf32> to vector<1x2x32xf32>
    tpu.vector_store %arg8[%c1, %c0_180, %c0_181], %584 {strides = array<i32>} : memref<3x2x32xf32, #tpu.memory_space<vmem>>, vector<1x2x32xf32>,
    %c2 = arith.constant 2 : index
    %c0_182 = arith.constant 0 : index
    %c0_183 = arith.constant 0 : index
    %585 = vector.load %arg8[%c2, %c0_182, %c0_183] : memref<3x2x32xf32, #tpu.memory_space<vmem>>, vector<1x2x32xf32>
    %586 = vector.shape_cast %585 : vector<1x2x32xf32> to vector<2x32xf32>
    %587 = vector.shape_cast %578 : vector<2x32xf32> to vector<1x2x32xf32>
    tpu.vector_store %arg8[%c2, %c0_182, %c0_183], %587 {strides = array<i32>} : memref<3x2x32xf32, #tpu.memory_space<vmem>>, vector<1x2x32xf32>,
    %588 = arith.addf %576, %577 : vector<2x32xf32>
    %589 = arith.addf %588, %578 : vector<2x32xf32>
    %cst_184 = arith.constant 0.333333343 : f32
    %590 = vector.broadcast %cst_184 : f32 to vector<2x32xf32>
    %591 = arith.mulf %589, %590 : vector<2x32xf32>
    %592 = arith.subf %576, %577 : vector<2x32xf32>
    %593 = math.absf %592 : vector<2x32xf32>
    %594 = arith.subf %576, %578 : vector<2x32xf32>
    %595 = math.absf %594 : vector<2x32xf32>
    %596 = arith.addf %593, %595 : vector<2x32xf32>
    %597 = arith.subf %577, %578 : vector<2x32xf32>
    %598 = math.absf %597 : vector<2x32xf32>
    %599 = arith.addf %596, %598 : vector<2x32xf32>
    %600 = vector.broadcast %8 : vector<1x32xf32> to vector<2x32xf32>
    %601 = arith.mulf %600, %599 : vector<2x32xf32>
    %602 = arith.subf %591, %601 : vector<2x32xf32>
    %c0_185 = arith.constant 0 : index
    %c0_186 = arith.constant 0 : index
    %603 = vector.load %arg7[%c0_185, %c0_186] : memref<2x32xf32, #tpu.memory_space<vmem>>, vector<2x32xf32>
    tpu.vector_store %arg7[%c0_185, %c0_186], %602 {strides = array<i32>} : memref<2x32xf32, #tpu.memory_space<vmem>>, vector<2x32xf32>,
    return
  }
}

</mosaic_0001>

<bundles_post_ra>
// kernel: tpu_custom_call.1
= control target key start
LH: loop header
LB: loop body
LE: loop exit
PB: predicated region body
PF: predicated region fallthrough
CT: control target
= control target key end

     0   :  { %14 = vsyncpa [#allocation3], 0  ;;  %s5002_s0 = inlined_call_operand.hbm [shape: bf16[16,128], index: 0, kind: input, shape index: {}]   ;;  %s5003_s1 = inlined_call_operand.hbm [shape: bf16[128,512], index: 1, kind: input, shape index: {}]   ;;  %s5004_s2 = inlined_call_operand.hbm [shape: f32[1,512], index: 2, kind: input, shape index: {}]   ;;  %s5005_s3 = inlined_call_operand.hbm [shape: bf16[128,512], index: 3, kind: input, shape index: {}]   ;;  %s5006_s4 = inlined_call_operand.hbm [shape: bf16[256,512], index: 4, kind: input, shape index: {}]   ;;  %s5007_s5 = inlined_call_operand.vmem [shape: f32[1,512], index: 5, kind: input, shape index: {}]   ;;  %s5008_s6 = inlined_call_operand.vmem [shape: f32[1,32], index: 6, kind: input, shape index: {}]   ;;  %s5009_s7 = inlined_call_operand.hbm [shape: f32[2,32], index: 7, kind: output, shape index: {0}]   ;;  %s5010_s8 = inlined_call_operand.hbm [shape: f32[3,2,32], index: 8, kind: output, shape index: {1}]  }
   0x1   :  { %15 = vsyncpa [#allocation6], 0 }
   0x2   :  { %16 = vsyncpa [#allocation9], 0 }
   0x3   :  { %17 = vsyncpa [#allocation4], 0  ;;  %s36_s29 = sshll.u32 %s5003_s1, 4  ;;  %s37_s29 = int_to_ptr.hbm [resolvable:$true] %s36_s29 }
   0x4   :  { %18 = vsyncpa [#allocation13], 0  ;;  %s3760_s30 = smov [#allocation5]   ;;  %s60_s12 = sshll.u32 %s5005_s3, 4  ;;  %s61_s12 = int_to_ptr.hbm [resolvable:$true] %s60_s12 }
   0x5   :  { %s38_s9 = sshll.u32 %s3760_s30, 4  ;;  %s3761_s13 = smov 256   ;;  %s39_s9 = int_to_ptr.vmem [resolvable:$true] %s38_s9 }
   0x6   :  { %s3762_s14 = smov 16   ;;  %s3763_s15 = smov [#allocation8]  }
   0x7   :  { %44 = dma.hbm_to_vmem [thread:$0]  %s37_s29, 4096, %s39_s9, [#allocation6], %s3761_s13, %s3761_s13, %s3762_s14  }
   0x8   :  { %s62_s16 = sshll.u32 %s3763_s15, 4  ;;  %s23_s18 = sshll.u32 %s5002_s0, 4  ;;  %s63_s16 = int_to_ptr.vmem [resolvable:$true] %s62_s16  ;;  %s24_s18 = int_to_ptr.hbm [resolvable:$true] %s23_s18 }
   0x9   :  { %68 = dma.hbm_to_vmem [thread:$0]  %s61_s12, 4096, %s63_s16, [#allocation9], %s3761_s13, %s3761_s13, %s3762_s14  }
   0xa   :  { %s3764_s3 = smov [#allocation2]   ;;  %s50_s22 = sshll.u32 %s5004_s2, 4  ;;  %s51_s22 = int_to_ptr.hbm [resolvable:$true] %s50_s22 }
   0xb   :  { %s25_s19 = sshll.u32 %s3764_s3, 4  ;;  %s3765_s23 = smov 64   ;;  %s26_s19 = int_to_ptr.vmem [resolvable:$true] %s25_s19 }
   0xc   :  { %s3766_s24 = smov 4   ;;  %s3767_s0 = smov [#allocation7]  }
   0xd   :  { %31 = dma.hbm_to_vmem [thread:$0]  %s24_s18, 128, %s26_s19, [#allocation3], %s3765_s23, %s3765_s23, %s3766_s24  }
   0xe   :  { %s52_s25 = sshll.u32 %s3767_s0, 4  ;;  %s73_s28 = sshll.u32 %s5006_s4, 4  ;;  %s53_s25 = int_to_ptr.vmem [resolvable:$true] %s52_s25  ;;  %s74_s28 = int_to_ptr.hbm [resolvable:$true] %s73_s28 }
   0xf   :  { %55 = dma.hbm_to_vmem [thread:$0]  %s51_s22, 64, %s53_s25, [#allocation6]  }
  0x10   :  { %s3768_s29 = smov [#allocation10]  }
  0x11   :  { %s75_s30 = sshll.u32 %s3768_s29, 4  ;;  %s76_s30 = int_to_ptr.vmem [resolvable:$true] %s75_s30 }
  0x12   :  { %81 = dma.hbm_to_vmem [thread:$0]  %s74_s28, 8192, %s76_s30, [#allocation9], %s3761_s13, %s3761_s13, %s3762_s14  }
  0x13   :  { %3750 = dma.done.wait [#allocation3], 128  }
  0x14   :  { %3751 = vsyncadd [#allocation3], 4294967168 }
  0x15   :  { %3752 = dma.done.wait [#allocation6], 4160  }
  0x16   :  { %3753 = vsyncadd [#allocation6], 4294963136 }
  0x17   :  { %3754 = dma.done.wait [#allocation9], 12288  }
  0x18   :  { %3755 = vsyncadd [#allocation9], 4294955008  ;;  %v2878_v0 = vld [vmem:[#allocation5 + $0xe0] sm:$0xf]  ;;  %v3307_v1 = vld [vmem:[#allocation5 + $0xec] sm:$0xf0] }
  0x19   :  { %v3305_v2 = vld [vmem:[#allocation5 + $0xe4] sm:$0xf]  ;;  %v2879_v3 = vor.u32 %v3307_v1, %v2878_v0  ;;  %v2880_v4 = vld [vmem:[#allocation5 + $0xf0] sm:$0xf0]  ;;  %v2886_v5 = vld [vmem:[#allocation5 + $0xe8] sm:$0xf] }
  0x1a   :  { %v3308_v6 = vld [vmem:[#allocation5 + $0xf4] sm:$0xf0]  ;;  %v2883_v7 = vor.u32 %v3305_v2, %v2880_v4  ;;  %v3306_v9 = vld [vmem:[#allocation5 + $0xec] sm:$0xf]  ;;  %v2888_v10 = vld [vmem:[#allocation5 + $0xf8] sm:$0xf0] }
  0x1b   :  { %v2887_v8 = vor.u32 %v3308_v6, %v2886_v5  ;;  %v2862_v11 = vld [vmem:[#allocation5 + $0xc0] sm:$0xf]  ;;  %424 = vmatpush.bf16.msra.mxu0 %v2879_v3  ;;  %v2891_v12 = vor.u32 %v3306_v9, %v2888_v10  ;;  %v3303_v13 = vld [vmem:[#allocation5 + $0xcc] sm:$0xf0]  ;;  %v3301_v14 = vld [vmem:[#allocation5 + $0xc4] sm:$0xf] }
  0x1c   :  { %v2864_v15 = vld [vmem:[#allocation5 + $0xd0] sm:$0xf0]  ;;  %438 = vmatpush.bf16.msra.mxu1 %v2883_v7  ;;  %v2863_v16 = vor.u32 %v3303_v13, %v2862_v11  ;;  %v2870_v18 = vld [vmem:[#allocation5 + $0xc8] sm:$0xf]  ;;  %v3304_v19 = vld [vmem:[#allocation5 + $0xd4] sm:$0xf0] }
  0x1d   :  { %452 = vmatpush.bf16.msra.mxu2 %v2887_v8  ;;  %v2867_v17 = vor.u32 %v3301_v14, %v2864_v15  ;;  %v3302_v20 = vld [vmem:[#allocation5 + $0xcc] sm:$0xf]  ;;  %466 = vmatpush.bf16.msra.mxu3 %v2891_v12  ;;  %v2871_v21 = vor.u32 %v3304_v19, %v2870_v18  ;;  %v2872_v22 = vld [vmem:[#allocation5 + $0xd8] sm:$0xf0]  ;;  %v2846_v23 = vld [vmem:[#allocation5 + $0xa0] sm:$0xf] }
  0x1e   :  { %v3299_v24 = vld [vmem:[#allocation5 + $0xac] sm:$0xf0]  ;;  %v2875_v25 = vor.u32 %v3302_v20, %v2872_v22  ;;  %v3297_v26 = vld [vmem:[#allocation5 + $0xa4] sm:$0xf]  ;;  %v2848_v27 = vld [vmem:[#allocation5 + $0xb0] sm:$0xf0] }
  0x1f   :  { %v2854_v28 = vld [vmem:[#allocation5 + $0xa8] sm:$0xf]  ;;  %425 = vmatpush.bf16.msra.mxu0 %v2863_v16  ;;  %v2847_v29 = vor.u32 %v3299_v24, %v2846_v23  ;;  %v3300_v30 = vld [vmem:[#allocation5 + $0xb4] sm:$0xf0]  ;;  %v3298_v31 = vld [vmem:[#allocation5 + $0xac] sm:$0xf]  ;;  %v2851_v33 = vor.u32 %v3297_v26, %v2848_v27 }
  0x20   :  { %v2856_v32 = vld [vmem:[#allocation5 + $0xb8] sm:$0xf0]  ;;  %439 = vmatpush.bf16.msra.mxu1 %v2867_v17  ;;  %v2855_v34 = vor.u32 %v3300_v30, %v2854_v28  ;;  %v2830_v35 = vld [vmem:[#allocation5 + $0x80] sm:$0xf]  ;;  %v3295_v36 = vld [vmem:[#allocation5 + $0x8c] sm:$0xf0] }
  0x21   :  { %453 = vmatpush.bf16.msra.mxu2 %v2871_v21  ;;  %v3293_v37 = vld [vmem:[#allocation5 + $0x84] sm:$0xf]  ;;  %467 = vmatpush.bf16.msra.mxu3 %v2875_v25  ;;  %v2859_v38 = vor.u32 %v3298_v31, %v2856_v32  ;;  %v2832_v39 = vld [vmem:[#allocation5 + $0x90] sm:$0xf0]  ;;  %v2838_v40 = vld [vmem:[#allocation5 + $0x88] sm:$0xf]  ;;  %v2831_v44 = vor.u32 %v3295_v36, %v2830_v35 }
  0x22   :  { %v3296_v41 = vld [vmem:[#allocation5 + $0x94] sm:$0xf0]  ;;  %v3294_v42 = vld [vmem:[#allocation5 + $0x8c] sm:$0xf]  ;;  %v2840_v43 = vld [vmem:[#allocation5 + $0x98] sm:$0xf0]  ;;  %v2835_v45 = vor.u32 %v3293_v37, %v2832_v39 }
  0x23   :  { %426 = vmatpush.bf16.msra.mxu0 %v2847_v29  ;;  %v2839_v46 = vor.u32 %v3296_v41, %v2838_v40  ;;  %v2814_v47 = vld [vmem:[#allocation5 + $0x60] sm:$0xf]  ;;  %v3291_v48 = vld [vmem:[#allocation5 + $0x6c] sm:$0xf0]  ;;  %v3289_v49 = vld [vmem:[#allocation5 + $0x64] sm:$0xf]  ;;  %v2843_v50 = vor.u32 %v3294_v42, %v2840_v43 }
  0x24   :  { %440 = vmatpush.bf16.msra.mxu1 %v2851_v33  ;;  %v2816_v51 = vld [vmem:[#allocation5 + $0x70] sm:$0xf0]  ;;  %v2822_v52 = vld [vmem:[#allocation5 + $0x68] sm:$0xf]  ;;  %v3292_v53 = vld [vmem:[#allocation5 + $0x74] sm:$0xf0]  ;;  %v2815_v56 = vor.u32 %v3291_v48, %v2814_v47 }
  0x25   :  { %454 = vmatpush.bf16.msra.mxu2 %v2855_v34  ;;  %468 = vmatpush.bf16.msra.mxu3 %v2859_v38  ;;  %v3290_v54 = vld [vmem:[#allocation5 + $0x6c] sm:$0xf]  ;;  %v2824_v55 = vld [vmem:[#allocation5 + $0x78] sm:$0xf0]  ;;  %v2819_v57 = vor.u32 %v3289_v49, %v2816_v51  ;;  %v2823_v58 = vor.u32 %v3292_v53, %v2822_v52  ;;  %v2798_v59 = vld [vmem:[#allocation5 + $0x40] sm:$0xf] }
  0x26   :  { %v3287_v60 = vld [vmem:[#allocation5 + $0x4c] sm:$0xf0]  ;;  %v3285_v61 = vld [vmem:[#allocation5 + $0x44] sm:$0xf]  ;;  %v2827_v62 = vor.u32 %v3290_v54, %v2824_v55  ;;  %v2800_v63 = vld [vmem:[#allocation5 + $0x50] sm:$0xf0] }
  0x27   :  { %427 = vmatpush.bf16.msra.mxu0 %v2831_v44  ;;  %v2806_v0 = vld [vmem:[#allocation5 + $0x48] sm:$0xf]  ;;  %v3288_v1 = vld [vmem:[#allocation5 + $0x54] sm:$0xf0]  ;;  %v3286_v2 = vld [vmem:[#allocation5 + $0x4c] sm:$0xf]  ;;  %v2799_v4 = vor.u32 %v3287_v60, %v2798_v59  ;;  %v2803_v5 = vor.u32 %v3285_v61, %v2800_v63 }
  0x28   :  { %441 = vmatpush.bf16.msra.mxu1 %v2835_v45  ;;  %v2808_v3 = vld [vmem:[#allocation5 + $0x58] sm:$0xf0]  ;;  %v2807_v6 = vor.u32 %v3288_v1, %v2806_v0  ;;  %v2782_v7 = vld [vmem:[#allocation5 + $0x20] sm:$0xf]  ;;  %v3283_v8 = vld [vmem:[#allocation5 + $0x2c] sm:$0xf0] }
  0x29   :  { %455 = vmatpush.bf16.msra.mxu2 %v2839_v46  ;;  %469 = vmatpush.bf16.msra.mxu3 %v2843_v50  ;;  %v3281_v9 = vld [vmem:[#allocation5 + $0x24] sm:$0xf]  ;;  %v2811_v10 = vor.u32 %v3286_v2, %v2808_v3  ;;  %v2784_v11 = vld [vmem:[#allocation5 + $0x30] sm:$0xf0]  ;;  %v2790_v12 = vld [vmem:[#allocation5 + $0x28] sm:$0xf]  ;;  %v2783_v16 = vor.u32 %v3283_v8, %v2782_v7 }
  0x2a   :  { %v3284_v13 = vld [vmem:[#allocation5 + $0x34] sm:$0xf0]  ;;  %v3282_v14 = vld [vmem:[#allocation5 + $0x2c] sm:$0xf]  ;;  %v2792_v15 = vld [vmem:[#allocation5 + $0x38] sm:$0xf0]  ;;  %v2787_v19 = vor.u32 %v3281_v9, %v2784_v11 }
  0x2b   :  { %428 = vmatpush.bf16.msra.mxu0 %v2815_v56  ;;  %v2766_v17 = vld [vmem:[#allocation5] sm:$0xf]  ;;  %v3279_v18 = vld [vmem:[#allocation5 + $0xc] sm:$0xf0]  ;;  %v2791_v20 = vor.u32 %v3284_v13, %v2790_v12  ;;  %v3277_v21 = vld [vmem:[#allocation5 + $0x4] sm:$0xf]  ;;  %v2795_v24 = vor.u32 %v3282_v14, %v2792_v15 }
  0x2c   :  { %442 = vmatpush.bf16.msra.mxu1 %v2819_v57  ;;  %v2768_v22 = vld [vmem:[#allocation5 + $0x10] sm:$0xf0]  ;;  %v2774_v23 = vld [vmem:[#allocation5 + $0x8] sm:$0xf]  ;;  %v3280_v25 = vld [vmem:[#allocation5 + $0x14] sm:$0xf0]  ;;  %v2767_v31 = vor.u32 %v3279_v18, %v2766_v17 }
  0x2d   :  { %456 = vmatpush.bf16.msra.mxu2 %v2823_v58  ;;  %470 = vmatpush.bf16.msra.mxu3 %v2827_v62  ;;  %v3278_v26 = vld [vmem:[#allocation5 + $0xc] sm:$0xf]  ;;  %v2776_v27 = vld [vmem:[#allocation5 + $0x18] sm:$0xf0]  ;;  %v3006_v28 = vld [vmem:[#allocation8 + $0xe0] sm:$0xf]  ;;  %v2771_v35 = vor.u32 %v3277_v21, %v2768_v22  ;;  %v2775_v36 = vor.u32 %v3280_v25, %v2774_v23 }
  0x2e   :  { %v3339_v29 = vld [vmem:[#allocation8 + $0xec] sm:$0xf0]  ;;  %v3337_v30 = vld [vmem:[#allocation8 + $0xe4] sm:$0xf]  ;;  %v3008_v32 = vld [vmem:[#allocation8 + $0xf0] sm:$0xf0]  ;;  %v2779_v39 = vor.u32 %v3278_v26, %v2776_v27 }
  0x2f   :  { %429 = vmatpush.bf16.msra.mxu0 %v2799_v4  ;;  %v3014_v33 = vld [vmem:[#allocation8 + $0xe8] sm:$0xf]  ;;  %v3340_v34 = vld [vmem:[#allocation8 + $0xf4] sm:$0xf0]  ;;  %v3338_v37 = vld [vmem:[#allocation8 + $0xec] sm:$0xf]  ;;  %v3847_v40 = vor.u32 %v3339_v29, %v3006_v28  ;;  %v3849_v42 = vor.u32 %v3337_v30, %v3008_v32 }
  0x30   :  { %443 = vmatpush.bf16.msra.mxu1 %v2803_v5  ;;  %v3016_v38 = vld [vmem:[#allocation8 + $0xf8] sm:$0xf0]  ;;  %v2990_v41 = vld [vmem:[#allocation8 + $0xc0] sm:$0xf]  ;;  %v3851_v43 = vor.u32 %v3340_v34, %v3014_v33  ;;  %v3335_v44 = vld [vmem:[#allocation8 + $0xcc] sm:$0xf0] }
  0x31   :  { %457 = vmatpush.bf16.msra.mxu2 %v2807_v6  ;;  %471 = vmatpush.bf16.msra.mxu3 %v2811_v10  ;;  %5201 = vst [vmem:[#allocation19_spill] sm:$0xff] %v3849_v42  ;;  %v3333_v45 = vld [vmem:[#allocation8 + $0xc4] sm:$0xf]  ;;  %v2992_v46 = vld [vmem:[#allocation8 + $0xd0] sm:$0xf0]  ;;  %v3853_v47 = vor.u32 %v3338_v37, %v3016_v38  ;;  %v3856_v53 = vor.u32 %v3335_v44, %v2990_v41  ;;  %vm2691_vm0 = vcmask 254976  }
  0x32   :  { %v2998_v48 = vld [vmem:[#allocation8 + $0xc8] sm:$0xf]  ;;  %v3336_v49 = vld [vmem:[#allocation8 + $0xd4] sm:$0xf0]  ;;  %v3334_v51 = vld [vmem:[#allocation8 + $0xcc] sm:$0xf]  ;;  %v3860_v54 = vor.u32 %v3333_v45, %v2992_v46 }
  0x33   :  { %430 = vmatpush.bf16.msra.mxu0 %v2783_v16  ;;  %5202 = vst [vmem:[#allocation20_spill] sm:$0xff] %v3853_v47  ;;  %v3276_v50 = vld [vmem:[#allocation2] sm:$0xff]  ;;  %v3000_v52 = vld [vmem:[#allocation8 + $0xd8] sm:$0xf0]  ;;  %v3862_v55 = vor.u32 %v3336_v49, %v2998_v48  ;;  %v2974_v56 = vld [vmem:[#allocation8 + $0xa0] sm:$0xf] }
  0x34   :  { %444 = vmatpush.bf16.msra.mxu1 %v2787_v19  ;;  %5203 = vst [vmem:[#allocation21_spill] sm:$0xff] %v3860_v54  ;;  %v3331_v57 = vld [vmem:[#allocation8 + $0xac] sm:$0xf0]  ;;  %v3329_v58 = vld [vmem:[#allocation8 + $0xa4] sm:$0xf]  ;;  %v3865_v59 = vor.u32 %v3334_v51, %v3000_v52  ;;  %s3772_s9 = smov [#allocation12]  }
  0x35   :  { %458 = vmatpush.bf16.msra.mxu2 %v2791_v20  ;;  %472 = vmatpush.bf16.msra.mxu3 %v2795_v24  ;;  %v2976_v60 = vld [vmem:[#allocation8 + $0xb0] sm:$0xf0]  ;;  %v2982_v61 = vld [vmem:[#allocation8 + $0xa8] sm:$0xf]  ;;  %v3332_v62 = vld [vmem:[#allocation8 + $0xb4] sm:$0xf0]  ;;  %v3868_v1 = vor.u32 %v3331_v57, %v2974_v56 }
  0x36   :  { %5204 = vst [vmem:[#allocation22_spill] sm:$0xff] %v3865_v59  ;;  %v3330_v63 = vld [vmem:[#allocation8 + $0xac] sm:$0xf]  ;;  %v2984_v0 = vld [vmem:[#allocation8 + $0xb8] sm:$0xf0]  ;;  %v3872_v2 = vor.u32 %v3329_v58, %v2976_v60  ;;  %v3874_v3 = vor.u32 %v3332_v62, %v2982_v61  ;;  %s2738_s10 = sshll.u32 %s3772_s9, 4  ;;  %s2739_s10 = int_to_ptr.vmem [resolvable:$true] %s2738_s10 }
  0x37   :  { %431 = vmatpush.bf16.msra.mxu0 %v2767_v31  ;;  %v2958_v4 = vld [vmem:[#allocation8 + $0x80] sm:$0xf]  ;;  %v3327_v5 = vld [vmem:[#allocation8 + $0x8c] sm:$0xf0]  ;;  %v3325_v6 = vld [vmem:[#allocation8 + $0x84] sm:$0xf]  ;;  %v3877_v7 = vor.u32 %v3330_v63, %v2984_v0 }
  0x38   :  { %445 = vmatpush.bf16.msra.mxu1 %v2771_v35  ;;  %5205 = vst [vmem:[#allocation23_spill] sm:$0xff] %v3872_v2  ;;  %v2960_v8 = vld [vmem:[#allocation8 + $0x90] sm:$0xf0]  ;;  %v2966_v9 = vld [vmem:[#allocation8 + $0x88] sm:$0xf]  ;;  %v3880_v13 = vor.u32 %v3327_v5, %v2958_v4  ;;  %s2740_s13 = sshll.u32 %s5010_s8, 4  ;;  %s2741_s13 = int_to_ptr.hbm [resolvable:$true] %s2740_s13 }
  0x39   :  { %459 = vmatpush.bf16.msra.mxu2 %v2775_v36  ;;  %473 = vmatpush.bf16.msra.mxu3 %v2779_v39  ;;  %5206 = vst [vmem:[#allocation24_spill] sm:$0xff] %v3877_v7  ;;  %v3328_v10 = vld [vmem:[#allocation8 + $0x94] sm:$0xf0]  ;;  %v3326_v11 = vld [vmem:[#allocation8 + $0x8c] sm:$0xf]  ;;  %v3884_v14 = vor.u32 %v3325_v6, %v2960_v8  ;;  %s3773_s14 = smov 32  }
  0x3a   :  { %432 = vmatmul.bf16.vlgmr.msra.gmra.mxu0 %v3276_v50  ;;  %v2968_v12 = vld [vmem:[#allocation8 + $0x98] sm:$0xf0]  ;;  %v3886_v15 = vor.u32 %v3328_v10, %v2966_v9  ;;  %v2942_v16 = vld [vmem:[#allocation8 + $0x60] sm:$0xf]  ;;  %v3323_v17 = vld [vmem:[#allocation8 + $0x6c] sm:$0xf0] }
  0x3b   :  { %640 = vmatpush.bf16.msrb.mxu0 %v3847_v40  ;;  %446 = vmatmul.bf16.vlgmr.msra.gmra.mxu1 %v3276_v50  ;;  %5207 = vst [vmem:[#allocation25_spill] sm:$0xff] %v3884_v14  ;;  %v3321_v18 = vld [vmem:[#allocation8 + $0x64] sm:$0xf]  ;;  %v3889_v19 = vor.u32 %v3326_v11, %v2968_v12  ;;  %v2944_v20 = vld [vmem:[#allocation8 + $0x70] sm:$0xf0]  ;;  %v3892_v25 = vor.u32 %v3323_v17, %v2942_v16  ;;  %s3774_s15 = smov 2  }
  0x3c   :  { %653 = vmatpush.bf16.msrb.mxu1 %v3849_v42  ;;  %460 = vmatmul.bf16.vlgmr.msra.gmra.mxu2 %v3276_v50  ;;  %v2950_v21 = vld [vmem:[#allocation8 + $0x68] sm:$0xf]  ;;  %v3324_v22 = vld [vmem:[#allocation8 + $0x74] sm:$0xf0]  ;;  %v3322_v23 = vld [vmem:[#allocation8 + $0x6c] sm:$0xf]  ;;  %v3896_v26 = vor.u32 %v3321_v18, %v2944_v20 }
  0x3d   :  { %666 = vmatpush.bf16.msrb.mxu2 %v3851_v43  ;;  %679 = vmatpush.bf16.msrb.mxu3 %v3853_v47  ;;  %5208 = vst [vmem:[#allocation26_spill] sm:$0xff] %v3889_v19  ;;  %v2952_v24 = vld [vmem:[#allocation8 + $0x78] sm:$0xf0]  ;;  %v3898_v27 = vor.u32 %v3324_v22, %v2950_v21  ;;  %v2926_v28 = vld [vmem:[#allocation8 + $0x40] sm:$0xf]  ;;  %s3775_s8 = smov [#allocation11]  }
  0x3e   :  { %474 = vmatmul.bf16.vlgmr.msra.gmra.mxu3 %v3276_v50  ;;  %5209 = vst [vmem:[#allocation27_spill] sm:$0xff] %v3892_v25  ;;  %v3319_v29 = vld [vmem:[#allocation8 + $0x4c] sm:$0xf0]  ;;  %v3317_v30 = vld [vmem:[#allocation8 + $0x44] sm:$0xf]  ;;  %v3901_v31 = vor.u32 %v3322_v23, %v2952_v24  ;;  %s2728_s1 = sshll.u32 %s3775_s8, 4  ;;  %s2729_s1 = int_to_ptr.vmem [resolvable:$true] %s2728_s1 }
  0x3f   :  { %641 = vmatpush.bf16.msrb.mxu0 %v3856_v53  ;;  %5210 = vst [vmem:[#allocation28_spill] sm:$0xff] %v3896_v26  ;;  %v2928_v32 = vld [vmem:[#allocation8 + $0x50] sm:$0xf0]  ;;  %v2934_v33 = vld [vmem:[#allocation8 + $0x48] sm:$0xf]  ;;  %v3904_v37 = vor.u32 %v3319_v29, %v2926_v28  ;;  %s2730_s19 = sshll.u32 %s5009_s7, 4  ;;  %s2731_s19 = int_to_ptr.hbm [resolvable:$true] %s2730_s19 }
  0x40   :  { %654 = vmatpush.bf16.msrb.mxu1 %v3860_v54  ;;  %5211 = vst [vmem:[#allocation29_spill] sm:$0xff] %v3898_v27  ;;  %v3320_v34 = vld [vmem:[#allocation8 + $0x54] sm:$0xf0]  ;;  %v3318_v35 = vld [vmem:[#allocation8 + $0x4c] sm:$0xf]  ;;  %v3908_v39 = vor.u32 %v3317_v30, %v2928_v32 }
  0x41   :  { %667 = vmatpush.bf16.msrb.mxu2 %v3862_v55  ;;  %680 = vmatpush.bf16.msrb.mxu3 %v3865_v59  ;;  %5212 = vst [vmem:[#allocation30_spill] sm:$0xff] %v3901_v31  ;;  %v2936_v36 = vld [vmem:[#allocation8 + $0x58] sm:$0xf0]  ;;  %v2910_v38 = vld [vmem:[#allocation8 + $0x20] sm:$0xf]  ;;  %v3910_v41 = vor.u32 %v3320_v34, %v2934_v33 }
  0x42   :  { %5213 = vst [vmem:[#allocation31_spill] sm:$0xff] %v3904_v37  ;;  %v3315_v44 = vld [vmem:[#allocation8 + $0x2c] sm:$0xf0]  ;;  %v3313_v45 = vld [vmem:[#allocation8 + $0x24] sm:$0xf]  ;;  %v3913_v46 = vor.u32 %v3318_v35, %v2936_v36 }
  0x43   :  { %642 = vmatpush.bf16.msrb.mxu0 %v3868_v1  ;;  %5214 = vst [vmem:[#allocation32_spill] sm:$0xff] %v3908_v39  ;;  %v2912_v48 = vld [vmem:[#allocation8 + $0x30] sm:$0xf0]  ;;  %v2918_v49 = vld [vmem:[#allocation8 + $0x28] sm:$0xf]  ;;  %v3916_v56 = vor.u32 %v3315_v44, %v2910_v38  ;;  %v3769_v44 = vmov 0  }
  0x44   :  { %655 = vmatpush.bf16.msrb.mxu1 %v3872_v2  ;;  %5215 = vst [vmem:[#allocation33_spill] sm:$0xff] %v3910_v41  ;;  %v3316_v50 = vld [vmem:[#allocation8 + $0x34] sm:$0xf0]  ;;  %v3314_v51 = vld [vmem:[#allocation8 + $0x2c] sm:$0xf]  ;;  %v3920_v58 = vor.u32 %v3313_v45, %v2912_v48 }
  0x45   :  { %668 = vmatpush.bf16.msrb.mxu2 %v3874_v3  ;;  %681 = vmatpush.bf16.msrb.mxu3 %v3877_v7  ;;  %5216 = vst [vmem:[#allocation34_spill] sm:$0xff] %v3913_v46  ;;  %v2920_v52 = vld [vmem:[#allocation8 + $0x38] sm:$0xf0]  ;;  %v2894_v57 = vld [vmem:[#allocation8] sm:$0xf]  ;;  %v3922_v60 = vor.u32 %v3316_v50, %v2918_v49 }
  0x46   :  { %5217 = vst [vmem:[#allocation35_spill] sm:$0xff] %v3916_v56  ;;  %v3311_v61 = vld [vmem:[#allocation8 + $0xc] sm:$0xf0]  ;;  %v3309_v62 = vld [vmem:[#allocation8 + $0x4] sm:$0xf]  ;;  %v3925_v0 = vor.u32 %v3314_v51, %v2920_v52 }
  0x47   :  { %643 = vmatpush.bf16.msrb.mxu0 %v3880_v13  ;;  %5218 = vst [vmem:[#allocation36_spill] sm:$0xff] %v3920_v58  ;;  %v2896_v63 = vld [vmem:[#allocation8 + $0x10] sm:$0xf0]  ;;  %v2902_v4 = vld [vmem:[#allocation8 + $0x8] sm:$0xf]  ;;  %v3928_v11 = vor.u32 %v3311_v61, %v2894_v57 }
  0x48   :  { %656 = vmatpush.bf16.msrb.mxu1 %v3884_v14  ;;  %5219 = vst [vmem:[#allocation37_spill] sm:$0xff] %v3922_v60  ;;  %v3312_v5 = vld [vmem:[#allocation8 + $0x14] sm:$0xf0]  ;;  %v3310_v6 = vld [vmem:[#allocation8 + $0xc] sm:$0xf]  ;;  %v3932_v17 = vor.u32 %v3309_v62, %v2896_v63 }
  0x49   :  { %669 = vmatpush.bf16.msrb.mxu2 %v3886_v15  ;;  %682 = vmatpush.bf16.msrb.mxu3 %v3889_v19  ;;  %5220 = vst [vmem:[#allocation38_spill] sm:$0xff] %v3925_v0  ;;  %v2904_v8 = vld [vmem:[#allocation8 + $0x18] sm:$0xf0]  ;;  %v3262_v9 = vld [vmem:[#allocation10 + $0x1e0] sm:$0xf]  ;;  %v3934_v18 = vor.u32 %v3312_v5, %v2902_v4 }
  0x4a   :  { %v3403_v10 = vld [vmem:[#allocation10 + $0x1ec] sm:$0xf0]  ;;  %5221 = vst [vmem:[#allocation39_spill] sm:$0xff] %v3928_v11  ;;  %v3401_v12 = vld [vmem:[#allocation10 + $0x1e4] sm:$0xf]  ;;  %v3937_v20 = vor.u32 %v3310_v6, %v2904_v8 }
  0x4b   :  { %644 = vmatpush.bf16.msrb.mxu0 %v3892_v25  ;;  %v3264_v16 = vld [vmem:[#allocation10 + $0x1f0] sm:$0xf0]  ;;  %5222 = vst [vmem:[#allocation40_spill] sm:$0xff] %v3932_v17  ;;  %v3939_v21 = vor.u32 %v3403_v10, %v3262_v9  ;;  %v3246_v23 = vld [vmem:[#allocation10 + $0x1c0] sm:$0xf] }
  0x4c   :  { %657 = vmatpush.bf16.msrb.mxu1 %v3896_v26  ;;  %5223 = vst [vmem:[#allocation41_spill] sm:$0xff] %v3934_v18  ;;  %v3941_v22 = vor.u32 %v3401_v12, %v3264_v16  ;;  %v3399_v24 = vld [vmem:[#allocation10 + $0x1cc] sm:$0xf0]  ;;  %v3397_v28 = vld [vmem:[#allocation10 + $0x1c4] sm:$0xf] }
  0x4d   :  { %670 = vmatpush.bf16.msrb.mxu2 %v3898_v27  ;;  %683 = vmatpush.bf16.msrb.mxu3 %v3901_v31  ;;  %5224 = vst [vmem:[#allocation42_spill] sm:$0xff] %v3937_v20  ;;  %v3248_v29 = vld [vmem:[#allocation10 + $0x1d0] sm:$0xf0]  ;;  %v3134_v30 = vld [vmem:[#allocation10 + $0xe0] sm:$0xf]  ;;  %v3950_v36 = vor.u32 %v3399_v24, %v3246_v23 }
  0x4e   :  { %5225 = vst [vmem:[#allocation43_spill] sm:$0xff] %v3939_v21  ;;  %v3371_v32 = vld [vmem:[#allocation10 + $0xec] sm:$0xf0]  ;;  %v3369_v34 = vld [vmem:[#allocation10 + $0xe4] sm:$0xf]  ;;  %v3955_v45 = vor.u32 %v3397_v28, %v3248_v29 }
  0x4f   :  { %645 = vmatpush.bf16.msrb.mxu0 %v3904_v37  ;;  %v3946_v33 = vor.u32 %v3371_v32, %v3134_v30  ;;  %v3136_v35 = vld [vmem:[#allocation10 + $0xf0] sm:$0xf0]  ;;  %v3230_v48 = vld [vmem:[#allocation10 + $0x1a0] sm:$0xf]  ;;  %v3395_v49 = vld [vmem:[#allocation10 + $0x1ac] sm:$0xf0] }
  0x50   :  { %658 = vmatpush.bf16.msrb.mxu1 %v3908_v39  ;;  %v3952_v38 = vor.u32 %v3369_v34, %v3136_v35  ;;  %v3393_v50 = vld [vmem:[#allocation10 + $0x1a4] sm:$0xf]  ;;  %v3232_v51 = vld [vmem:[#allocation10 + $0x1b0] sm:$0xf0]  ;;  %v3959_v52 = vor.u32 %v3395_v49, %v3230_v48  ;;  %v3214_v61 = vld [vmem:[#allocation10 + $0x180] sm:$0xf] }
  0x51   :  { %671 = vmatpush.bf16.msrb.mxu2 %v3910_v41  ;;  %684 = vmatpush.bf16.msrb.mxu3 %v3913_v46  ;;  %5226 = vst [vmem:[#allocation44_spill] sm:$0xff] %v3946_v33  ;;  %v3963_v57 = vor.u32 %v3393_v50, %v3232_v51  ;;  %v3391_v62 = vld [vmem:[#allocation10 + $0x18c] sm:$0xf0]  ;;  %v3389_v63 = vld [vmem:[#allocation10 + $0x184] sm:$0xf] }
  0x52   :  { %5227 = vst [vmem:[#allocation45_spill] sm:$0xff] %v3952_v38  ;;  %v3216_v4 = vld [vmem:[#allocation10 + $0x190] sm:$0xf0]  ;;  %v3966_v5 = vor.u32 %v3391_v62, %v3214_v61  ;;  %v3198_v8 = vld [vmem:[#allocation10 + $0x160] sm:$0xf] }
  0x53   :  { %646 = vmatpush.bf16.msrb.mxu0 %v3916_v56  ;;  %v3969_v6 = vor.u32 %v3389_v63, %v3216_v4  ;;  %v3387_v9 = vld [vmem:[#allocation10 + $0x16c] sm:$0xf0]  ;;  %v3385_v10 = vld [vmem:[#allocation10 + $0x164] sm:$0xf]  ;;  %v3200_v12 = vld [vmem:[#allocation10 + $0x170] sm:$0xf0] }
  0x54   :  { %659 = vmatpush.bf16.msrb.mxu1 %v3920_v58  ;;  %5228 = vst [vmem:[#allocation46_spill] sm:$0xff] %v3966_v5  ;;  %v3972_v16 = vor.u32 %v3387_v9, %v3198_v8  ;;  %v3975_v23 = vor.u32 %v3385_v10, %v3200_v12  ;;  %v3182_v24 = vld [vmem:[#allocation10 + $0x140] sm:$0xf]  ;;  %v3383_v28 = vld [vmem:[#allocation10 + $0x14c] sm:$0xf0] }
  0x55   :  { %672 = vmatpush.bf16.msrb.mxu2 %v3922_v60  ;;  %685 = vmatpush.bf16.msrb.mxu3 %v3925_v0  ;;  %5229 = vst [vmem:[#allocation47_spill] sm:$0xff] %v3969_v6  ;;  %v3381_v29 = vld [vmem:[#allocation10 + $0x144] sm:$0xf]  ;;  %v3184_v30 = vld [vmem:[#allocation10 + $0x150] sm:$0xf0]  ;;  %v3978_v32 = vor.u32 %v3383_v28, %v3182_v24 }
  0x56   :  { %5230 = vst [vmem:[#allocation48_spill] sm:$0xff] %v3972_v16  ;;  %v3981_v34 = vor.u32 %v3381_v29, %v3184_v30  ;;  %v3166_v35 = vld [vmem:[#allocation10 + $0x120] sm:$0xf]  ;;  %v3377_v48 = vld [vmem:[#allocation10 + $0x124] sm:$0xf] }
  0x57   :  { %647 = vmatpush.bf16.msrb.mxu0 %v3928_v11  ;;  %5231 = vst [vmem:[#allocation49_spill] sm:$0xff] %v3975_v23  ;;  %v3168_v49 = vld [vmem:[#allocation10 + $0x130] sm:$0xf0]  ;;  %v3150_v61 = vld [vmem:[#allocation10 + $0x100] sm:$0xf] }
  0x58   :  { %660 = vmatpush.bf16.msrb.mxu1 %v3932_v17  ;;  %5232 = vst [vmem:[#allocation50_spill] sm:$0xff] %v3978_v32  ;;  %v3987_v51 = vor.u32 %v3377_v48, %v3168_v49  ;;  %v3375_v62 = vld [vmem:[#allocation10 + $0x10c] sm:$0xf0]  ;;  %v3373_v63 = vld [vmem:[#allocation10 + $0x104] sm:$0xf] }
  0x59   :  { %673 = vmatpush.bf16.msrb.mxu2 %v3934_v18  ;;  %686 = vmatpush.bf16.msrb.mxu3 %v3937_v20  ;;  %5233 = vst [vmem:[#allocation51_spill] sm:$0xff] %v3981_v34  ;;  %v3152_v4 = vld [vmem:[#allocation10 + $0x110] sm:$0xf0]  ;;  %v3270_v8 = vld [vmem:[#allocation10 + $0x1e8] sm:$0xf]  ;;  %v3990_v24 = vor.u32 %v3375_v62, %v3150_v61 }
  0x5a   :  { %648 = vmatmul.bf16.vlgmr.msrb.gmra.mxu0 %v3769_v44  ;;  %5235 = vst [vmem:[#allocation53_spill] sm:$0xff] %v3987_v51  ;;  %v3404_v9 = vld [vmem:[#allocation10 + $0x1f4] sm:$0xf0]  ;;  %v3402_v10 = vld [vmem:[#allocation10 + $0x1ec] sm:$0xf]  ;;  %v3993_v28 = vor.u32 %v3373_v63, %v3152_v4 }
  0x5b   :  { %661 = vmatmul.bf16.vlgmr.msrb.gmra.mxu1 %v3769_v44  ;;  %1036 = vmatpush.bf16.msra.mxu0 %v3946_v33  ;;  %v3272_v12 = vld [vmem:[#allocation10 + $0x1f8] sm:$0xf0]  ;;  %5236 = vst [vmem:[#allocation54_spill] sm:$0xff] %v3990_v24  ;;  %v3995_v29 = vor.u32 %v3404_v9, %v3270_v8  ;;  %v3398_v48 = vld [vmem:[#allocation10 + $0x1cc] sm:$0xf] }
  0x5c   :  { %1049 = vmatpush.bf16.msra.mxu1 %v3939_v21  ;;  %674 = vmatmul.bf16.vlgmr.msrb.gmra.mxu2 %v3769_v44  ;;  %5237 = vst [vmem:[#allocation55_spill] sm:$0xff] %v3993_v28  ;;  %v3997_v30 = vor.u32 %v3402_v10, %v3272_v12  ;;  %v3256_v49 = vld [vmem:[#allocation10 + $0x1d8] sm:$0xf0]  ;;  %v3118_v63 = vld [vmem:[#allocation10 + $0xc0] sm:$0xf] }
  0x5d   :  { %1075 = vmatpush.bf16.msra.mxu3 %v3941_v22  ;;  %1062 = vmatpush.bf16.msra.mxu2 %v3952_v38  ;;  %5238 = vst [vmem:[#allocation56_spill] sm:$0xff] %v3995_v29  ;;  %v4005_v62 = vor.u32 %v3398_v48, %v3256_v49  ;;  %v3367_v4 = vld [vmem:[#allocation10 + $0xcc] sm:$0xf0]  ;;  %v3365_v8 = vld [vmem:[#allocation10 + $0xc4] sm:$0xf] }
  0x5e   :  { %687 = vmatmul.bf16.vlgmr.msrb.gmra.mxu3 %v3769_v44  ;;  %v3379_v44 = vld [vmem:[#allocation10 + $0x12c] sm:$0xf0]  ;;  %5239 = vst [vmem:[#allocation57_spill] sm:$0xff] %v3997_v30  ;;  %v4009_v9 = vor.u32 %v3367_v4, %v3118_v63  ;;  %v3120_v10 = vld [vmem:[#allocation10 + $0xd0] sm:$0xf0] }
  0x5f   :  { %v3984_v50 = vor.u32 %v3379_v44, %v3166_v35  ;;  %v3254_v35 = vld [vmem:[#allocation10 + $0x1c8] sm:$0xf]  ;;  %v3400_v44 = vld [vmem:[#allocation10 + $0x1d4] sm:$0xf0]  ;;  %5241 = vst [vmem:[#allocation59_spill] sm:$0xff] %v4005_v62  ;;  %v4011_v33 = vor.u32 %v3365_v8, %v3120_v10 }
  0x60   :  { %1050 = vmatpush.bf16.msra.mxu1 %v3950_v36  ;;  %v4002_v61 = vor.u32 %v3400_v44, %v3254_v35  ;;  %5242 = vst [vmem:[#allocation60_spill] sm:$0xff] %v4009_v9  ;;  %v3238_v12 = vld [vmem:[#allocation10 + $0x1a8] sm:$0xf]  ;;  %v3396_v38 = vld [vmem:[#allocation10 + $0x1b4] sm:$0xf0]  ;;  %1037 = vmatpush.bf16.msra.mxu0 %v4009_v9 }
  0x61   :  { %1076 = vmatpush.bf16.msra.mxu3 %v3955_v45  ;;  %5234 = vst [vmem:[#allocation52_spill] sm:$0xff] %v3984_v50  ;;  %v4013_v35 = vor.u32 %v3396_v38, %v3238_v12  ;;  %v3394_v44 = vld [vmem:[#allocation10 + $0x1ac] sm:$0xf]  ;;  %v3240_v18 = vld [vmem:[#allocation10 + $0x1b8] sm:$0xf0]  ;;  %1063 = vmatpush.bf16.msra.mxu2 %v4011_v33 }
  0x62   :  { %5240 = vst [vmem:[#allocation58_spill] sm:$0xff] %v4002_v61  ;;  %v4016_v48 = vor.u32 %v3394_v44, %v3240_v18  ;;  %v3102_v49 = vld [vmem:[#allocation10 + $0xa0] sm:$0xf]  ;;  %v3363_v63 = vld [vmem:[#allocation10 + $0xac] sm:$0xf0] }
  0x63   :  { %5243 = vst [vmem:[#allocation61_spill] sm:$0xff] %v4011_v33  ;;  %v3361_v4 = vld [vmem:[#allocation10 + $0xa4] sm:$0xf]  ;;  %v4021_v11 = vor.u32 %v3363_v63, %v3102_v49  ;;  %v3104_v8 = vld [vmem:[#allocation10 + $0xb0] sm:$0xf0] }
  0x64   :  { %1051 = vmatpush.bf16.msra.mxu1 %v3959_v52  ;;  %5244 = vst [vmem:[#allocation62_spill] sm:$0xff] %v4013_v35  ;;  %v3222_v38 = vld [vmem:[#allocation10 + $0x188] sm:$0xf]  ;;  %v3392_v10 = vld [vmem:[#allocation10 + $0x194] sm:$0xf0]  ;;  %v4023_v12 = vor.u32 %v3361_v4, %v3104_v8 }
  0x65   :  { %1077 = vmatpush.bf16.msra.mxu3 %v3963_v57  ;;  %5245 = vst [vmem:[#allocation63_spill] sm:$0xff] %v4016_v48  ;;  %v4025_v60 = vor.u32 %v3392_v10, %v3222_v38  ;;  %v3390_v18 = vld [vmem:[#allocation10 + $0x18c] sm:$0xf]  ;;  %v3224_v44 = vld [vmem:[#allocation10 + $0x198] sm:$0xf0]  ;;  %1038 = vmatpush.bf16.msra.mxu0 %v4021_v11 }
  0x66   :  { %5246 = vst [vmem:[#allocation64_spill] sm:$0xff] %v4021_v11  ;;  %v3086_v9 = vld [vmem:[#allocation10 + $0x80] sm:$0xf]  ;;  %v4028_v33 = vor.u32 %v3390_v18, %v3224_v44  ;;  %v3359_v56 = vld [vmem:[#allocation10 + $0x8c] sm:$0xf0]  ;;  %1064 = vmatpush.bf16.msra.mxu2 %v4023_v12 }
  0x67   :  { %5247 = vst [vmem:[#allocation65_spill] sm:$0xff] %v4023_v12  ;;  %v3357_v41 = vld [vmem:[#allocation10 + $0x84] sm:$0xf]  ;;  %v3088_v37 = vld [vmem:[#allocation10 + $0x90] sm:$0xf0]  ;;  %v4032_v49 = vor.u32 %v3359_v56, %v3086_v9 }
  0x68   :  { %1052 = vmatpush.bf16.msra.mxu1 %v3966_v5  ;;  %5248 = vst [vmem:[#allocation66_spill] sm:$0xff] %v4025_v60  ;;  %v4034_v63 = vor.u32 %v3357_v41, %v3088_v37  ;;  %v3206_v4 = vld [vmem:[#allocation10 + $0x168] sm:$0xf]  ;;  %v3388_v8 = vld [vmem:[#allocation10 + $0x174] sm:$0xf0] }
  0x69   :  { %1078 = vmatpush.bf16.msra.mxu3 %v3969_v6  ;;  %5249 = vst [vmem:[#allocation67_spill] sm:$0xff] %v4028_v33  ;;  %v4037_v38 = vor.u32 %v3388_v8, %v3206_v4  ;;  %v3386_v10 = vld [vmem:[#allocation10 + $0x16c] sm:$0xf]  ;;  %v3208_v18 = vld [vmem:[#allocation10 + $0x178] sm:$0xf0]  ;;  %1039 = vmatpush.bf16.msra.mxu0 %v4032_v49 }
  0x6a   :  { %5250 = vst [vmem:[#allocation68_spill] sm:$0xff] %v4032_v49  ;;  %v4039_v44 = vor.u32 %v3386_v10, %v3208_v18  ;;  %1065 = vmatpush.bf16.msra.mxu2 %v4034_v63  ;;  %v3070_v56 = vld [vmem:[#allocation10 + $0x60] sm:$0xf]  ;;  %v3355_v9 = vld [vmem:[#allocation10 + $0x6c] sm:$0xf0] }
  0x6b   :  { %5251 = vst [vmem:[#allocation69_spill] sm:$0xff] %v4034_v63  ;;  %v3353_v37 = vld [vmem:[#allocation10 + $0x64] sm:$0xf]  ;;  %v4045_v41 = vor.u32 %v3355_v9, %v3070_v56  ;;  %v3072_v12 = vld [vmem:[#allocation10 + $0x70] sm:$0xf0] }
  0x6c   :  { %1053 = vmatpush.bf16.msra.mxu1 %v3972_v16  ;;  %5252 = vst [vmem:[#allocation70_spill] sm:$0xff] %v4037_v38  ;;  %v3190_v4 = vld [vmem:[#allocation10 + $0x148] sm:$0xf]  ;;  %v3384_v8 = vld [vmem:[#allocation10 + $0x154] sm:$0xf0]  ;;  %v4047_v11 = vor.u32 %v3353_v37, %v3072_v12 }
  0x6d   :  { %1079 = vmatpush.bf16.msra.mxu3 %v3975_v23  ;;  %5253 = vst [vmem:[#allocation71_spill] sm:$0xff] %v4039_v44  ;;  %v4049_v10 = vor.u32 %v3384_v8, %v3190_v4  ;;  %v3382_v18 = vld [vmem:[#allocation10 + $0x14c] sm:$0xf]  ;;  %v3192_v49 = vld [vmem:[#allocation10 + $0x158] sm:$0xf0]  ;;  %1040 = vmatpush.bf16.msra.mxu0 %v4045_v41 }
  0x6e   :  { %5254 = vst [vmem:[#allocation72_spill] sm:$0xff] %v4045_v41  ;;  %v3054_v27 = vld [vmem:[#allocation10 + $0x40] sm:$0xf]  ;;  %v4052_v63 = vor.u32 %v3382_v18, %v3192_v49  ;;  %v3349_v25 = vld [vmem:[#allocation10 + $0x44] sm:$0xf]  ;;  %1066 = vmatpush.bf16.msra.mxu2 %v4047_v11 }
  0x6f   :  { %5255 = vst [vmem:[#allocation73_spill] sm:$0xff] %v4047_v11  ;;  %v3174_v9 = vld [vmem:[#allocation10 + $0x128] sm:$0xf]  ;;  %v3380_v37 = vld [vmem:[#allocation10 + $0x134] sm:$0xf0] }
  0x70   :  { %1054 = vmatpush.bf16.msra.mxu1 %v3978_v32  ;;  %5256 = vst [vmem:[#allocation74_spill] sm:$0xff] %v4049_v10  ;;  %v3378_v4 = vld [vmem:[#allocation10 + $0x12c] sm:$0xf]  ;;  %v4061_v8 = vor.u32 %v3380_v37, %v3174_v9  ;;  %v3176_v49 = vld [vmem:[#allocation10 + $0x138] sm:$0xf0] }
  0x71   :  { %1080 = vmatpush.bf16.msra.mxu3 %v3981_v34  ;;  %5257 = vst [vmem:[#allocation75_spill] sm:$0xff] %v4052_v63  ;;  %v3038_v18 = vld [vmem:[#allocation10 + $0x20] sm:$0xf]  ;;  %v3347_v41 = vld [vmem:[#allocation10 + $0x2c] sm:$0xf0] }
  0x72   :  { %5260 = vst [vmem:[#allocation78_spill] sm:$0xff] %v4061_v8  ;;  %v3040_v11 = vld [vmem:[#allocation10 + $0x30] sm:$0xf0] }
  0x74   :  { %1055 = vmatpush.bf16.msra.mxu1 %v3984_v50 }
  0x75   :  { %1081 = vmatpush.bf16.msra.mxu3 %v3987_v51 }
  0x78   :  { %1056 = vmatpush.bf16.msra.mxu1 %v3990_v24 }
  0x79   :  { %1082 = vmatpush.bf16.msra.mxu3 %v3993_v28 }
  0x7c   :  { %1101 = vmatpush.bf16.msrb.mxu1 %v3995_v29 }
  0x7d   :  { %1127 = vmatpush.bf16.msrb.mxu3 %v3997_v30 }
  0x80   :  { %1102 = vmatpush.bf16.msrb.mxu1 %v4002_v61 }
  0x81   :  { %1128 = vmatpush.bf16.msrb.mxu3 %v4005_v62 }
  0x84   :  { %1103 = vmatpush.bf16.msrb.mxu1 %v4013_v35 }
  0x85   :  { %1129 = vmatpush.bf16.msrb.mxu3 %v4016_v48 }
  0x88   :  { %1104 = vmatpush.bf16.msrb.mxu1 %v4025_v60  ;;  %v3345_v60 = vld [vmem:[#allocation10 + $0x24] sm:$0xf] }
  0x89   :  { %1130 = vmatpush.bf16.msrb.mxu3 %v4028_v33  ;;  %v3056_v33 = vld [vmem:[#allocation10 + $0x50] sm:$0xf0]  ;;  %v4070_v9 = vor.u32 %v3345_v60, %v3040_v11  ;;  %v3022_v60 = vld [vmem:[#allocation10] sm:$0xf]  ;;  %v3343_v11 = vld [vmem:[#allocation10 + $0xc] sm:$0xf0] }
  0x8a   :  { %v4058_v12 = vor.u32 %v3349_v25, %v3056_v33  ;;  %v3770_v25 = vmov 0.0|0.0   ;;  %v3158_v33 = vld [vmem:[#allocation10 + $0x108] sm:$0xf] }
  0x8b   :  { %1057 = vmatmul.bf16.vlgmr.msra.gmra.mxu1 %v3770_v25  ;;  %5263 = vst [vmem:[#allocation81_spill] sm:$0xff] %v4070_v9  ;;  %1083 = vmatmul.bf16.vlgmr.msra.gmra.mxu3 %v3770_v25 }
  0x8c   :  { %1105 = vmatpush.bf16.msrb.mxu1 %v4037_v38  ;;  %v3351_v38 = vld [vmem:[#allocation10 + $0x4c] sm:$0xf0]  ;;  %5259 = vst [vmem:[#allocation77_spill] sm:$0xff] %v4058_v12  ;;  %1067 = vmatpush.bf16.msra.mxu2 %v4058_v12  ;;  %v3144_v12 = vld [vmem:[#allocation10 + $0xf8] sm:$0xf0] }
  0x8d   :  { %1131 = vmatpush.bf16.msrb.mxu3 %v4039_v44  ;;  %v4056_v56 = vor.u32 %v3351_v38, %v3054_v27  ;;  %v4063_v44 = vor.u32 %v3378_v4, %v3176_v49  ;;  %v4066_v27 = vor.u32 %v3347_v41, %v3038_v18  ;;  %v3376_v38 = vld [vmem:[#allocation10 + $0x114] sm:$0xf0]  ;;  %v3160_v4 = vld [vmem:[#allocation10 + $0x118] sm:$0xf0]  ;;  %v3341_v41 = vld [vmem:[#allocation10 + $0x4] sm:$0xf]  ;;  %v4083_v18 = vor.u32 %v3343_v11, %v3022_v60 }
  0x8e   :  { %v4072_v37 = vor.u32 %v3376_v38, %v3158_v33  ;;  %v3142_v33 = vld [vmem:[#allocation10 + $0xe8] sm:$0xf]  ;;  %v3372_v38 = vld [vmem:[#allocation10 + $0xf4] sm:$0xf0] }
  0x8f   :  { %5258 = vst [vmem:[#allocation76_spill] sm:$0xff] %v4056_v56  ;;  %1041 = vmatpush.bf16.msra.mxu0 %v4056_v56  ;;  %v3126_v60 = vld [vmem:[#allocation10 + $0xc8] sm:$0xf]  ;;  %v3368_v11 = vld [vmem:[#allocation10 + $0xd4] sm:$0xf0] }
  0x90   :  { %1106 = vmatpush.bf16.msrb.mxu1 %v4049_v10  ;;  %5261 = vst [vmem:[#allocation79_spill] sm:$0xff] %v4063_v44  ;;  %v3374_v10 = vld [vmem:[#allocation10 + $0x10c] sm:$0xf]  ;;  %1068 = vmatpush.bf16.msra.mxu2 %v4070_v9 }
  0x91   :  { %1132 = vmatpush.bf16.msrb.mxu3 %v4052_v63  ;;  %5262 = vst [vmem:[#allocation80_spill] sm:$0xff] %v4066_v27  ;;  %v4075_v49 = vor.u32 %v3374_v10, %v3160_v4  ;;  %v3024_v10 = vld [vmem:[#allocation10 + $0x10] sm:$0xf0]  ;;  %v3370_v9 = vld [vmem:[#allocation10 + $0xec] sm:$0xf] }
  0x92   :  { %5264 = vst [vmem:[#allocation82_spill] sm:$0xff] %v4072_v37  ;;  %v4085_v4 = vor.u32 %v3341_v41, %v3024_v10  ;;  %v4090_v56 = vor.u32 %v3370_v9, %v3144_v12  ;;  %v3366_v41 = vld [vmem:[#allocation10 + $0xcc] sm:$0xf]  ;;  %v4097_v10 = vor.u32 %v3368_v11, %v3126_v60  ;;  %v3110_v12 = vld [vmem:[#allocation10 + $0xa8] sm:$0xf] }
  0x93   :  { %5265 = vst [vmem:[#allocation83_spill] sm:$0xff] %v4075_v49  ;;  %1042 = vmatpush.bf16.msra.mxu0 %v4066_v27  ;;  %v4087_v27 = vor.u32 %v3372_v38, %v3142_v33  ;;  %v3128_v33 = vld [vmem:[#allocation10 + $0xd8] sm:$0xf0]  ;;  %v3364_v9 = vld [vmem:[#allocation10 + $0xb4] sm:$0xf0] }
  0x94   :  { %1107 = vmatpush.bf16.msrb.mxu1 %v4061_v8  ;;  %5266 = vst [vmem:[#allocation84_spill] sm:$0xff] %v4083_v18  ;;  %1069 = vmatpush.bf16.msra.mxu2 %v4085_v4  ;;  %v4099_v38 = vor.u32 %v3366_v41, %v3128_v33  ;;  %v3094_v41 = vld [vmem:[#allocation10 + $0x88] sm:$0xf]  ;;  %v3360_v33 = vld [vmem:[#allocation10 + $0x94] sm:$0xf0] }
  0x95   :  { %1133 = vmatpush.bf16.msrb.mxu3 %v4063_v44  ;;  %5267 = vst [vmem:[#allocation85_spill] sm:$0xff] %v4085_v4 }
  0x96   :  { %5268 = vst [vmem:[#allocation86_spill] sm:$0xff] %v4087_v27 }
  0x97   :  { %1043 = vmatpush.bf16.msra.mxu0 %v4083_v18  ;;  %5269 = vst [vmem:[#allocation87_spill] sm:$0xff] %v4090_v56 }
  0x98   :  { %1108 = vmatpush.bf16.msrb.mxu1 %v4072_v37  ;;  %1114 = vmatpush.bf16.msrb.mxu2 %v4090_v56  ;;  %5270 = vst [vmem:[#allocation88_spill] sm:$0xff] %v4097_v10 }
  0x99   :  { %1134 = vmatpush.bf16.msrb.mxu3 %v4075_v49  ;;  %5271 = vst [vmem:[#allocation89_spill] sm:$0xff] %v4099_v38 }
  0x9b   :  { %1088 = vmatpush.bf16.msrb.mxu0 %v4087_v27  ;;  %1109 = vmatmul.bf16.vlgmr.msrb.gmra.mxu1 %v3770_v25 }
  0x9c   :  { %1171 = vmatpush.bf16.msra.mxu1 %v3849_v42  ;;  %1115 = vmatpush.bf16.msrb.mxu2 %v4099_v38 }
  0x9d   :  { %1197 = vmatpush.bf16.msra.mxu3 %v3853_v47  ;;  %v3112_v47 = vld [vmem:[#allocation10 + $0xb8] sm:$0xf0] }
  0x9e   :  { %1135 = vmatmul.bf16.vlgmr.msrb.gmra.mxu3 %v3770_v25  ;;  %v3354_v25 = vld [vmem:[#allocation10 + $0x6c] sm:$0xf] }
  0x9f   :  { %1089 = vmatpush.bf16.msrb.mxu0 %v4097_v10 }
  0xa0   :  { %1172 = vmatpush.bf16.msra.mxu1 %v3860_v54  ;;  %v3362_v54 = vld [vmem:[#allocation10 + $0xac] sm:$0xf] }
  0xa1   :  { %1198 = vmatpush.bf16.msra.mxu3 %v3865_v59  ;;  %v4105_v59 = vor.u32 %v3364_v9, %v3110_v12  ;;  %v4107_v60 = vor.u32 %v3362_v54, %v3112_v47  ;;  %v4113_v12 = vor.u32 %v3360_v33, %v3094_v41  ;;  %v3096_v9 = vld [vmem:[#allocation10 + $0x98] sm:$0xf0]  ;;  %v3078_v47 = vld [vmem:[#allocation10 + $0x68] sm:$0xf]  ;;  %v3356_v54 = vld [vmem:[#allocation10 + $0x74] sm:$0xf0] }
  0xa2   :  { %v3062_v33 = vld [vmem:[#allocation10 + $0x48] sm:$0xf] }
  0xa3   :  { %5272 = vst [vmem:[#allocation90_spill] sm:$0xff] %v4105_v59  ;;  %1090 = vmatpush.bf16.msrb.mxu0 %v4105_v59  ;;  %1116 = vmatpush.bf16.msrb.mxu2 %v4107_v60 }
  0xa4   :  { %1173 = vmatpush.bf16.msra.mxu1 %v3872_v2  ;;  %5273 = vst [vmem:[#allocation91_spill] sm:$0xff] %v4107_v60 }
  0xa5   :  { %1199 = vmatpush.bf16.msra.mxu3 %v3877_v7  ;;  %v3358_v7 = vld [vmem:[#allocation10 + $0x8c] sm:$0xf]  ;;  %5274 = vst [vmem:[#allocation92_spill] sm:$0xff] %v4113_v12 }
  0xa6   :  { %v4115_v42 = vor.u32 %v3358_v7, %v3096_v9  ;;  %v3352_v9 = vld [vmem:[#allocation10 + $0x54] sm:$0xf0] }
  0xa7   :  { %1091 = vmatpush.bf16.msrb.mxu0 %v4113_v12 }
  0xa8   :  { %1174 = vmatpush.bf16.msra.mxu1 %v3884_v14  ;;  %5275 = vst [vmem:[#allocation93_spill] sm:$0xff] %v4115_v42  ;;  %1117 = vmatpush.bf16.msrb.mxu2 %v4115_v42  ;;  %v3080_v14 = vld [vmem:[#allocation10 + $0x78] sm:$0xf0] }
  0xa9   :  { %1200 = vmatpush.bf16.msra.mxu3 %v3889_v19  ;;  %v4121_v19 = vor.u32 %v3356_v54, %v3078_v47  ;;  %v4123_v60 = vor.u32 %v3354_v25, %v3080_v14  ;;  %v3064_v47 = vld [vmem:[#allocation10 + $0x58] sm:$0xf0] }
  0xaa   :  { %v4131_v54 = vld [vmem:[#allocation7] sm:$0xf] }
  0xab   :  { %5276 = vst [vmem:[#allocation94_spill] sm:$0xff] %v4121_v19  ;;  %1092 = vmatpush.bf16.msrb.mxu0 %v4121_v19 }
  0xac   :  { %1175 = vmatpush.bf16.msra.mxu1 %v3896_v26  ;;  %5277 = vst [vmem:[#allocation95_spill] sm:$0xff] %v4123_v60  ;;  %1118 = vmatpush.bf16.msrb.mxu2 %v4123_v60  ;;  %v4129_v26 = vor.u32 %v3352_v9, %v3062_v33  ;;  %v3348_v33 = vld [vmem:[#allocation10 + $0x34] sm:$0xf0]  ;;  %v3346_v9 = vld [vmem:[#allocation10 + $0x2c] sm:$0xf] }
  0xad   :  { %1201 = vmatpush.bf16.msra.mxu3 %v3901_v31  ;;  %v3350_v31 = vld [vmem:[#allocation10 + $0x4c] sm:$0xf]  ;;  %5279 = vst [vmem:[#allocation97_spill] sm:$0xff] %v4131_v54 }
  0xae   :  { %5278 = vst [vmem:[#allocation96_spill] sm:$0xff] %v4129_v26  ;;  %v4135_v25 = vor.u32 %v3350_v31, %v3064_v47  ;;  %v3342_v60 = vld [vmem:[#allocation10 + $0xc] sm:$0xf] }
  0xaf   :  { %1093 = vmatpush.bf16.msrb.mxu0 %v4129_v26 }
  0xb0   :  { %1176 = vmatpush.bf16.msra.mxu1 %v3908_v39  ;;  %5281 = vst [vmem:[#allocation99_spill] sm:$0xff] %v4135_v25  ;;  %1119 = vmatpush.bf16.msrb.mxu2 %v4135_v25 }
  0xb1   :  { %1202 = vmatpush.bf16.msra.mxu3 %v3913_v46  ;;  %v3046_v46 = vld [vmem:[#allocation10 + $0x28] sm:$0xf] }
  0xb2   :  { %v4144_v19 = vor.u32 %v3348_v33, %v3046_v46  ;;  %v5285_v46 = vperm.slane %v4131_v54, 0 }
  0xb4   :  { %1177 = vmatpush.bf16.msra.mxu1 %v3920_v58  ;;  %5283 = vst [vmem:[#allocation101_spill] sm:$0xff] %v4144_v19  ;;  %1094 = vmatpush.bf16.msrb.mxu0 %v4144_v19 }
  0xb5   :  { %1203 = vmatpush.bf16.msra.mxu3 %v3925_v0  ;;  %v3344_v0 = vld [vmem:[#allocation10 + $0x14] sm:$0xf0] }
  0xb7   :  { %v433_v11 = vpop.f32.mrf.mxu0 }
  0xb8   :  { %v447_v2 = vpop.f32.mrf.mxu1  ;;  %1178 = vmatpush.bf16.msra.mxu1 %v3932_v17  ;;  %v4156_v33 = vadd.f32 %v433_v11, %v5285_v46 }
  0xb9   :  { %1204 = vmatpush.bf16.msra.mxu3 %v3937_v20 }
  0xbc   :  { %1271 = vmatpush.bf16.msrb.mxu1 %v3939_v21  ;;  %v5288_v21 = vperm.slane %v4131_v54, 1 }
  0xbd   :  { %1297 = vmatpush.bf16.msrb.mxu3 %v3941_v22 }
  0xbe   :  { %v4165_v17 = vadd.f32 %v447_v2, %v5288_v21  ;;  %v5110_v2 = vperm.slane %v4131_v54, 3 }
  0xbf   :  { %v461_v7 = vpop.f32.mrf.mxu2  ;;  %v4133_v14 = vpop.f32.mrf.mxu0 }
  0xc0   :  { %5280 = vst [vmem:[#allocation98_spill] sm:$0xff] %v4133_v14  ;;  %v4138_v39 = vpop.f32.mrf.mxu1  ;;  %v3048_v14 = vld [vmem:[#allocation10 + $0x38] sm:$0xf0]  ;;  %1272 = vmatpush.bf16.msrb.mxu1 %v3950_v36 }
  0xc1   :  { %v475_v41 = vpop.f32.mrf.mxu3  ;;  %5282 = vst [vmem:[#allocation100_spill] sm:$0xff] %v4138_v39  ;;  %v4147_v47 = vor.u32 %v3346_v9, %v3048_v14  ;;  %v3030_v39 = vld [vmem:[#allocation10 + $0x8] sm:$0xf]  ;;  %v3032_v9 = vld [vmem:[#allocation10 + $0x18] sm:$0xf0]  ;;  %1298 = vmatpush.bf16.msrb.mxu3 %v3955_v45 }
  0xc2   :  { %v4160_v14 = vor.u32 %v3344_v0, %v3030_v39  ;;  %v5109_v39 = vperm.slane %v4131_v54, 2  ;;  %v4186_v46 = vadd.f32 %v475_v41, %v5110_v2 }
  0xc3   :  { %5284 = vst [vmem:[#allocation102_spill] sm:$0xff] %v4147_v47  ;;  %1120 = vmatpush.bf16.msrb.mxu2 %v4147_v47  ;;  %v4169_v47 = vor.u32 %v3342_v60, %v3032_v9 }
  0xc4   :  { %5287 = vst [vmem:[#allocation104_spill] sm:$0xff] %v4160_v14  ;;  %1095 = vmatpush.bf16.msrb.mxu0 %v4160_v14  ;;  %1273 = vmatpush.bf16.msrb.mxu1 %v3959_v52 }
  0xc5   :  { %5290 = vst [vmem:[#allocation106_spill] sm:$0xff] %v4169_v47  ;;  %1299 = vmatpush.bf16.msrb.mxu3 %v3963_v57 }
  0xc7   :  { %v4158_v31 = vpop.f32.mrf.mxu2  ;;  %1121 = vmatpush.bf16.msrb.mxu2 %v4169_v47 }
  0xc8   :  { %5286 = vst [vmem:[#allocation103_spill] sm:$0xff] %v4158_v31  ;;  %1274 = vmatpush.bf16.msrb.mxu1 %v3966_v5 }
  0xc9   :  { %v4167_v58 = vpop.f32.mrf.mxu3  ;;  %1300 = vmatpush.bf16.msrb.mxu3 %v3969_v6 }
  0xca   :  { %5289 = vst [vmem:[#allocation105_spill] sm:$0xff] %v4167_v58 }
  0xcc   :  { %1275 = vmatpush.bf16.msrb.mxu1 %v3972_v16 }
  0xcd   :  { %1301 = vmatpush.bf16.msrb.mxu3 %v3975_v23 }
  0xd0   :  { %1276 = vmatpush.bf16.msrb.mxu1 %v3978_v32 }
  0xd1   :  { %1302 = vmatpush.bf16.msrb.mxu3 %v3981_v34 }
  0xd4   :  { %1277 = vmatpush.bf16.msrb.mxu1 %v3984_v50 }
  0xd5   :  { %1303 = vmatpush.bf16.msrb.mxu3 %v3987_v51 }
  0xd7   :  { %v649_v20 = vpop.f32.mrf.mxu0 }
  0xd8   :  { %v692_v19 = vadd.f32 %v649_v20, %v4156_v33  ;;  %v662_v11 = vpop.f32.mrf.mxu1  ;;  %v4182_v20 = vadd.f32 %v461_v7, %v5109_v39  ;;  %1278 = vmatpush.bf16.msrb.mxu1 %v3990_v24 }
  0xd9   :  { %v693_v0 = vadd.f32 %v662_v11, %v4165_v17  ;;  %1304 = vmatpush.bf16.msrb.mxu3 %v3993_v28 }
  0xda   :  { %v696_v21 = vmul.f32 0.5, %v692_v19 }
  0xdb   :  { %v700_v60 = vmul.f32 0.5, %v693_v0 }
  0xdc   :  { %3422 = vtanh.f32 %v696_v21 }
  0xdd   :  { %3424 = vtanh.f32 %v700_v60 }
  0xdf   :  { %v675_v9 = vpop.f32.mrf.mxu2  ;;  %v651_v31 = vpop.f32.mrf.mxu0 }
  0xe0   :  { %v694_v19 = vadd.f32 %v675_v9, %v4182_v20  ;;  %v664_v21 = vpop.f32.mrf.mxu1 }
  0xe1   :  { %v688_v11 = vpop.f32.mrf.mxu3 }
  0xe2   :  { %v695_v0 = vadd.f32 %v688_v11, %v4186_v46  ;;  %3426 = vtanh.f32 %v694_v19  ;;  %v3423_v7 = vpop.eup %3422 }
  0xe3   :  { %v3425_v60 = vpop.eup %3424  ;;  %v698_v41 = vadd.f32 1.0, %v3423_v7 }
  0xe4   :  { %v705_v39 = vmul.f32 0.5, %v695_v0  ;;  %v702_v2 = vadd.f32 1.0, %v3425_v60  ;;  %v5292_v60 = vld [vmem:[#allocation67_spill] sm:$0xff] }
  0xe5   :  { %v699_v58 = vmul.f32 0.5, %v698_v41  ;;  %v5293_v41 = vld [vmem:[#allocation27_spill] sm:$0xff] }
  0xe6   :  { %3428 = vtanh.f32 %v705_v39  ;;  %v703_v9 = vmul.f32 0.5, %v702_v2 }
  0xe7   :  { %v677_v54 = vpop.f32.mrf.mxu2 }
  0xe8   :  { %v3427_v31 = vpop.eup %3426  ;;  %v709_v21 = vmul.f32 0.0, %v703_v9  ;;  %v5294_v9 = vld [vmem:[#allocation29_spill] sm:$0xff] }
  0xe9   :  { %v690_v11 = vpop.f32.mrf.mxu3  ;;  %v710_v5 = vmul.f32 %v3427_v31, %v699_v58  ;;  %v5295_v31 = vld [vmem:[#allocation70_spill] sm:$0xff] }
  0xea   :  { %v5296_v11 = vld [vmem:[#allocation71_spill] sm:$0xff] }
  0xeb   :  { %v4196_v0 = vadd.f32 %v710_v5, %v709_v21  ;;  %v5291_v5 = vld [vmem:[#allocation66_spill] sm:$0xff]  ;;  %v5297_v21 = vld [vmem:[#allocation31_spill] sm:$0xff] }
  0xec   :  { %v3429_v19 = vpop.eup %3428 }
  0xed   :  { %3430 = vtanh.f32 %v4196_v0  ;;  %v707_v39 = vadd.f32 1.0, %v3429_v19  ;;  %v5298_v19 = vld [vmem:[#allocation33_spill] sm:$0xff] }
  0xef   :  { %v708_v54 = vmul.f32 0.5, %v707_v39  ;;  %v5299_v39 = vld [vmem:[#allocation74_spill] sm:$0xff] }
  0xf3   :  { %v3431_v2 = vpop.eup %3430 }
  0xf4   :  { %v713_v58 = vmul.f32 %v3431_v2, %v708_v54  ;;  %v5300_v54 = vld [vmem:[#allocation35_spill] sm:$0xff]  ;;  %v5301_v2 = vld [vmem:[#allocation37_spill] sm:$0xff] }
  0xf6   :  { %v714_v7 = vpack.c.bf16 %v713_v58, %v713_v58  ;;  %v5302_v58 = vld [vmem:[#allocation39_spill] sm:$0xff] }
  0xf8   :  { %1044 = vmatmul.bf16.vlgmr.msra.gmra.mxu0 %v714_v7  ;;  %1070 = vmatmul.bf16.vlgmr.msra.gmra.mxu2 %v714_v7 }
  0xf9   :  { %1179 = vmatmul.bf16.vlgmr.msra.gmra.mxu1 %v714_v7  ;;  %1205 = vmatmul.bf16.vlgmr.msra.gmra.mxu3 %v714_v7 }
  0xfa   :  { %1158 = vmatpush.bf16.msra.mxu0 %v3847_v40  ;;  %1184 = vmatpush.bf16.msra.mxu2 %v3851_v43 }
  0xfb   :  { %1323 = vmatpush.bf16.msra.mxu1 %v3995_v29  ;;  %1349 = vmatpush.bf16.msra.mxu3 %v3997_v30  ;;  %v5317_v30 = vld [vmem:[#allocation81_spill] sm:$0xff] }
  0xfe   :  { %1159 = vmatpush.bf16.msra.mxu0 %v3856_v53  ;;  %1185 = vmatpush.bf16.msra.mxu2 %v3862_v55 }
  0xff   :  { %1324 = vmatpush.bf16.msra.mxu1 %v4002_v61  ;;  %1350 = vmatpush.bf16.msra.mxu3 %v4005_v62  ;;  %v5313_v62 = vld [vmem:[#allocation73_spill] sm:$0xff]  ;;  %v5316_v61 = vld [vmem:[#allocation80_spill] sm:$0xff] }
 0x102   :  { %1160 = vmatpush.bf16.msra.mxu0 %v3868_v1  ;;  %1186 = vmatpush.bf16.msra.mxu2 %v3874_v3 }
 0x103   :  { %1325 = vmatpush.bf16.msra.mxu1 %v4013_v35  ;;  %1351 = vmatpush.bf16.msra.mxu3 %v4016_v48  ;;  %v5311_v48 = vld [vmem:[#allocation69_spill] sm:$0xff]  ;;  %v5312_v35 = vld [vmem:[#allocation72_spill] sm:$0xff] }
 0x106   :  { %1161 = vmatpush.bf16.msra.mxu0 %v3880_v13  ;;  %1187 = vmatpush.bf16.msra.mxu2 %v3886_v15 }
 0x107   :  { %1326 = vmatpush.bf16.msra.mxu1 %v5291_v5  ;;  %1352 = vmatpush.bf16.msra.mxu3 %v5292_v60  ;;  %v5305_v60 = vld [vmem:[#allocation45_spill] sm:$0xff]  ;;  %v5310_v5 = vld [vmem:[#allocation68_spill] sm:$0xff] }
 0x108   :  { %1096 = vmatmul.bf16.vlgmr.msrb.gmra.mxu0 %v714_v7  ;;  %1122 = vmatmul.bf16.vlgmr.msrb.gmra.mxu2 %v714_v7 }
 0x10a   :  { %1162 = vmatpush.bf16.msra.mxu0 %v5293_v41  ;;  %1188 = vmatpush.bf16.msra.mxu2 %v5294_v9 }
 0x10b   :  { %1327 = vmatpush.bf16.msra.mxu1 %v5295_v31  ;;  %1353 = vmatpush.bf16.msra.mxu3 %v5296_v11  ;;  %v5303_v31 = vld [vmem:[#allocation41_spill] sm:$0xff]  ;;  %v5304_v11 = vld [vmem:[#allocation44_spill] sm:$0xff] }
 0x10e   :  { %1163 = vmatpush.bf16.msra.mxu0 %v5297_v21  ;;  %1189 = vmatpush.bf16.msra.mxu2 %v5298_v19 }
 0x10f   :  { %1328 = vmatpush.bf16.msra.mxu1 %v5299_v39  ;;  %1354 = vmatpush.bf16.msra.mxu3 %v4052_v63  ;;  %v5306_v63 = vld [vmem:[#allocation60_spill] sm:$0xff]  ;;  %v5307_v39 = vld [vmem:[#allocation61_spill] sm:$0xff] }
 0x112   :  { %1164 = vmatpush.bf16.msra.mxu0 %v5300_v54  ;;  %1190 = vmatpush.bf16.msra.mxu2 %v5301_v2 }
 0x113   :  { %1329 = vmatpush.bf16.msra.mxu1 %v4061_v8  ;;  %1355 = vmatpush.bf16.msra.mxu3 %v4063_v44  ;;  %v5308_v8 = vld [vmem:[#allocation64_spill] sm:$0xff]  ;;  %v5309_v44 = vld [vmem:[#allocation65_spill] sm:$0xff] }
 0x116   :  { %1165 = vmatpush.bf16.msra.mxu0 %v5302_v58  ;;  %1191 = vmatpush.bf16.msra.mxu2 %v5303_v31 }
 0x117   :  { %1330 = vmatpush.bf16.msra.mxu1 %v4072_v37  ;;  %1356 = vmatpush.bf16.msra.mxu3 %v4075_v49  ;;  %v5314_v37 = vld [vmem:[#allocation76_spill] sm:$0xff]  ;;  %v5315_v49 = vld [vmem:[#allocation77_spill] sm:$0xff] }
 0x119   :  { %1166 = vmatmul.bf16.vlgmr.msra.gmra.mxu0 %v714_v7  ;;  %1192 = vmatmul.bf16.vlgmr.msra.gmra.mxu2 %v714_v7  ;;  %v1058_v7 = vpop.f32.mrf.mxu1 }
 0x11a   :  { %1258 = vmatpush.bf16.msrb.mxu0 %v5304_v11  ;;  %1284 = vmatpush.bf16.msrb.mxu2 %v5305_v60 }
 0x11e   :  { %1259 = vmatpush.bf16.msrb.mxu0 %v5306_v63  ;;  %1285 = vmatpush.bf16.msrb.mxu2 %v5307_v39 }
 0x122   :  { %1260 = vmatpush.bf16.msrb.mxu0 %v5308_v8  ;;  %1286 = vmatpush.bf16.msrb.mxu2 %v5309_v44 }
 0x126   :  { %1261 = vmatpush.bf16.msrb.mxu0 %v5310_v5  ;;  %1287 = vmatpush.bf16.msrb.mxu2 %v5311_v48  ;;  %v1084_v48 = vpop.f32.mrf.mxu3 }
 0x12a   :  { %1262 = vmatpush.bf16.msrb.mxu0 %v5312_v35  ;;  %1288 = vmatpush.bf16.msrb.mxu2 %v5313_v62  ;;  %v1060_v35 = vpop.f32.mrf.mxu1 }
 0x12e   :  { %1263 = vmatpush.bf16.msrb.mxu0 %v5314_v37  ;;  %1289 = vmatpush.bf16.msrb.mxu2 %v5315_v49  ;;  %v5318_v49 = vld [vmem:[#allocation91_spill] sm:$0xff] }
 0x132   :  { %1264 = vmatpush.bf16.msrb.mxu0 %v5316_v61  ;;  %1290 = vmatpush.bf16.msrb.mxu2 %v5317_v30  ;;  %v1086_v61 = vpop.f32.mrf.mxu3  ;;  %v1110_v30 = vpop.f32.mrf.mxu1 }
 0x136   :  { %1265 = vmatpush.bf16.msrb.mxu0 %v4083_v18  ;;  %1291 = vmatpush.bf16.msrb.mxu2 %v4085_v4  ;;  %v5319_v4 = vld [vmem:[#allocation94_spill] sm:$0xff] }
 0x13a   :  { %1310 = vmatpush.bf16.msra.mxu0 %v4087_v27  ;;  %1336 = vmatpush.bf16.msra.mxu2 %v4090_v56  ;;  %v5320_v27 = vld [vmem:[#allocation95_spill] sm:$0xff]  ;;  %v1136_v35 = vpop.f32.mrf.mxu3  ;;  %v1112_v56 = vpop.f32.mrf.mxu1 }
 0x13e   :  { %1311 = vmatpush.bf16.msra.mxu0 %v4097_v10  ;;  %1337 = vmatpush.bf16.msra.mxu2 %v4099_v38  ;;  %v5321_v38 = vld [vmem:[#allocation101_spill] sm:$0xff] }
 0x142   :  { %1312 = vmatpush.bf16.msra.mxu0 %v4105_v59  ;;  %1338 = vmatpush.bf16.msra.mxu2 %v5318_v49  ;;  %v5322_v59 = vld [vmem:[#allocation102_spill] sm:$0xff]  ;;  %v1138_v61 = vpop.f32.mrf.mxu3 }
 0x146   :  { %1313 = vmatpush.bf16.msra.mxu0 %v4113_v12  ;;  %1339 = vmatpush.bf16.msra.mxu2 %v4115_v42 }
 0x14a   :  { %1314 = vmatpush.bf16.msra.mxu0 %v5319_v4  ;;  %1340 = vmatpush.bf16.msra.mxu2 %v5320_v27  ;;  %v238_v4 = vld [vmem:[%s5007_s5] sm:$0xf]  ;;  %s3771_s5 = smov 96  }
 0x14b   :  { %v4271_v27 = vperm.slane %v238_v4, 0  ;;  %v4277_v37 = vperm.slane %v238_v4, 2  ;;  %v4280_v28 = vperm.slane %v238_v4, 3 }
 0x14d   :  { %5323 = vst [vmem:[#allocation27_spill] sm:$0xff] %v4271_v27 }
 0x14e   :  { %1315 = vmatpush.bf16.msra.mxu0 %v4129_v26  ;;  %1341 = vmatpush.bf16.msra.mxu2 %v4135_v25  ;;  %v4274_v25 = vperm.slane %v238_v4, 1  ;;  %5325 = vst [vmem:[#allocation31_spill] sm:$0xff] %v4277_v37 }
 0x150   :  { %5324 = vst [vmem:[#allocation29_spill] sm:$0xff] %v4274_v25 }
 0x152   :  { %1316 = vmatpush.bf16.msra.mxu0 %v5321_v38  ;;  %1342 = vmatpush.bf16.msra.mxu2 %v5322_v59 }
 0x156   :  { %1317 = vmatpush.bf16.msra.mxu0 %v4160_v14  ;;  %1343 = vmatpush.bf16.msra.mxu2 %v4169_v47 }
 0x175   :  { %v1045_v56 = vpop.f32.mrf.mxu0 }
 0x176   :  { %v1046_v26 = vadd.f32 %v1045_v56, %v4271_v27  ;;  %v1180_v42 = vpop.f32.mrf.mxu1 }
 0x178   :  { %v1059_v38 = vadd.f32 %v1058_v7, %v1046_v26 }
 0x17a   :  { %v1140_v14 = vmul.f32 0.5, %v1059_v38 }
 0x17b   :  { %v1071_v12 = vpop.f32.mrf.mxu2 }
 0x17c   :  { %v1072_v61 = vadd.f32 %v1071_v12, %v4274_v25  ;;  %v1206_v59 = vpop.f32.mrf.mxu3  ;;  %3432 = vtanh.f32 %v1140_v14 }
 0x17d   :  { %v1047_v49 = vpop.f32.mrf.mxu0 }
 0x17e   :  { %v1085_v47 = vadd.f32 %v1084_v48, %v1072_v61  ;;  %v1182_v10 = vpop.f32.mrf.mxu1  ;;  %v1215_v48 = vrot.slane %v1180_v42, 6 }
 0x180   :  { %v1144_v18 = vmul.f32 0.5, %v1085_v47 }
 0x182   :  { %3434 = vtanh.f32 %v1144_v18  ;;  %v3433_v29 = vpop.eup %3432 }
 0x183   :  { %v1073_v62 = vpop.f32.mrf.mxu2  ;;  %v1142_v49 = vadd.f32 1.0, %v3433_v29 }
 0x184   :  { %v1208_v5 = vpop.f32.mrf.mxu3 }
 0x185   :  { %v1097_v56 = vpop.f32.mrf.mxu0  ;;  %v1143_v62 = vmul.f32 0.5, %v1142_v49  ;;  %v1223_v5 = vadd.f32 %v1215_v48, %v4165_v17 }
 0x186   :  { %v1098_v27 = vadd.f32 %v1097_v56, %v4277_v37 }
 0x188   :  { %v3435_v26 = vpop.eup %3434  ;;  %v1111_v7 = vadd.f32 %v1110_v30, %v1098_v27  ;;  %v1230_v30 = vmul.f32 0.5, %v1223_v5 }
 0x189   :  { %v1146_v12 = vadd.f32 1.0, %v3435_v26 }
 0x18a   :  { %3436 = vtanh.f32 %v1111_v7  ;;  %v1217_v7 = vrot.slane %v1206_v59, 6 }
 0x18b   :  { %v1123_v10 = vpop.f32.mrf.mxu2  ;;  %v1147_v18 = vmul.f32 0.5, %v1146_v12 }
 0x18c   :  { %v1124_v38 = vadd.f32 %v1123_v10, %v4280_v28 }
 0x18d   :  { %v1099_v47 = vpop.f32.mrf.mxu0  ;;  %v1153_v37 = vmul.f32 0.0, %v1147_v18 }
 0x18e   :  { %v1137_v14 = vadd.f32 %v1136_v35, %v1124_v38  ;;  %v1225_v38 = vadd.f32 %v1217_v7, %v4186_v46  ;;  %v1240_v7 = vrot.slane %v4196_v0, 6  ;;  %v5331_v0 = vld [vmem:[#allocation24_spill] sm:$0xff] }
 0x190   :  { %v3437_v61 = vpop.eup %3436  ;;  %v1149_v56 = vmul.f32 0.5, %v1137_v14 }
 0x191   :  { %v1154_v25 = vmul.f32 %v3437_v61, %v1143_v62 }
 0x192   :  { %3438 = vtanh.f32 %v1149_v56  ;;  %v1235_v56 = vmul.f32 0.5, %v1225_v38 }
 0x193   :  { %v4284_v27 = vadd.f32 %v1154_v25, %v1153_v37  ;;  %v1125_v4 = vpop.f32.mrf.mxu2 }
 0x195   :  { %3440 = vtanh.f32 %v4284_v27 }
 0x196   :  { %v1167_v42 = vpop.f32.mrf.mxu0  ;;  %3442 = vtanh.f32 %v1230_v30 }
 0x197   :  { %v1214_v29 = vrot.slane %v1167_v42, 6 }
 0x198   :  { %v3439_v26 = vpop.eup %3438 }
 0x199   :  { %v1151_v35 = vadd.f32 1.0, %v3439_v26  ;;  %v1222_v12 = vadd.f32 %v1214_v29, %v4156_v33 }
 0x19b   :  { %v3441_v49 = vpop.eup %3440  ;;  %v1152_v48 = vmul.f32 0.5, %v1151_v35  ;;  %v1226_v10 = vmul.f32 0.5, %v1222_v12  ;;  %v5326_v12 = vld [vmem:[#allocation19_spill] sm:$0xff] }
 0x19c   :  { %v1193_v18 = vpop.f32.mrf.mxu2  ;;  %v3443_v47 = vpop.eup %3442 }
 0x19d   :  { %v1157_v37 = vmul.f32 %v3441_v49, %v1152_v48  ;;  %3444 = vtanh.f32 %v1226_v10  ;;  %v1216_v25 = vrot.slane %v1193_v18, 6  ;;  %v1232_v61 = vadd.f32 1.0, %v3443_v47  ;;  %v5327_v49 = vld [vmem:[#allocation20_spill] sm:$0xff] }
 0x19e   :  { %v1169_v14 = vpop.f32.mrf.mxu0 }
 0x19f   :  { %v1248_v62 = vrot.slane %v1157_v37, 6  ;;  %v1224_v5 = vadd.f32 %v1216_v25, %v4182_v20  ;;  %v1233_v42 = vmul.f32 0.5, %v1232_v61  ;;  %v5328_v37 = vld [vmem:[#allocation21_spill] sm:$0xff]  ;;  %v5329_v25 = vld [vmem:[#allocation22_spill] sm:$0xff] }
 0x1a1   :  { %3446 = vtanh.f32 %v1224_v5  ;;  %v1251_v59 = vpack.c.bf16 %v1248_v62, %v1248_v62  ;;  %v1242_v10 = vmul.f32 %v1240_v7, %v1233_v42  ;;  %v5330_v62 = vld [vmem:[#allocation23_spill] sm:$0xff] }
 0x1a2   :  { %3448 = vtanh.f32 %v1235_v56  ;;  %v5332_v56 = vld [vmem:[#allocation25_spill] sm:$0xff] }
 0x1a3   :  { %v3445_v30 = vpop.eup %3444  ;;  %v1255_v4 = vrot.slane %v1251_v59, 1  ;;  %v5333_v59 = vld [vmem:[#allocation26_spill] sm:$0xff] }
 0x1a4   :  { %v1228_v29 = vadd.f32 1.0, %v3445_v30  ;;  %v1195_v26 = vpop.f32.mrf.mxu2 }
 0x1a5   :  { %1279 = vmatmul.bf16.vlgmr.msrb.gmra.mxu1 %v1255_v4  ;;  %1305 = vmatmul.bf16.vlgmr.msrb.gmra.mxu3 %v1255_v4  ;;  %v5335_v26 = vld [vmem:[#allocation30_spill] sm:$0xff] }
 0x1a6   :  { %v1229_v35 = vmul.f32 0.5, %v1228_v29  ;;  %1393 = vmatpush.bf16.msrb.mxu1 %v5326_v12  ;;  %1419 = vmatpush.bf16.msrb.mxu3 %v5327_v49  ;;  %v5334_v29 = vld [vmem:[#allocation28_spill] sm:$0xff] }
 0x1a7   :  { %v3447_v48 = vpop.eup %3446 }
 0x1a8   :  { %v1243_v38 = vmul.f32 %v3447_v48, %v1229_v35  ;;  %v3449_v18 = vpop.eup %3448  ;;  %v5336_v35 = vld [vmem:[#allocation32_spill] sm:$0xff]  ;;  %v5337_v48 = vld [vmem:[#allocation34_spill] sm:$0xff] }
 0x1a9   :  { %v1237_v14 = vadd.f32 1.0, %v3449_v18  ;;  %v5341_v18 = vld [vmem:[#allocation42_spill] sm:$0xff] }
 0x1aa   :  { %v4293_v47 = vadd.f32 %v1243_v38, %v1242_v10  ;;  %1394 = vmatpush.bf16.msrb.mxu1 %v5328_v37  ;;  %1420 = vmatpush.bf16.msrb.mxu3 %v5329_v25  ;;  %v5339_v10 = vld [vmem:[#allocation38_spill] sm:$0xff]  ;;  %v5340_v38 = vld [vmem:[#allocation40_spill] sm:$0xff] }
 0x1ab   :  { %v1238_v5 = vmul.f32 0.5, %v1237_v14  ;;  %v5342_v14 = vld [vmem:[#allocation43_spill] sm:$0xff] }
 0x1ac   :  { %3450 = vtanh.f32 %v4293_v47 }
 0x1ae   :  { %1395 = vmatpush.bf16.msrb.mxu1 %v5330_v62  ;;  %1421 = vmatpush.bf16.msrb.mxu3 %v5331_v0 }
 0x1b2   :  { %v3451_v61 = vpop.eup %3450  ;;  %1396 = vmatpush.bf16.msrb.mxu1 %v5332_v56  ;;  %1422 = vmatpush.bf16.msrb.mxu3 %v5333_v59 }
 0x1b3   :  { %v1246_v30 = vmul.f32 %v3451_v61, %v1238_v5  ;;  %v5343_v5 = vld [vmem:[#allocation46_spill] sm:$0xff]  ;;  %v5344_v61 = vld [vmem:[#allocation55_spill] sm:$0xff] }
 0x1b5   :  { %v1250_v42 = vpack.c.bf16 %v1246_v30, %v1246_v30  ;;  %1331 = vmatmul.bf16.vlgmr.msra.gmra.mxu1 %v1255_v4  ;;  %1357 = vmatmul.bf16.vlgmr.msra.gmra.mxu3 %v1255_v4  ;;  %v5338_v4 = vld [vmem:[#allocation36_spill] sm:$0xff] }
 0x1b6   :  { %1397 = vmatpush.bf16.msrb.mxu1 %v5334_v29  ;;  %1423 = vmatpush.bf16.msrb.mxu3 %v5335_v26  ;;  %v5345_v30 = vld [vmem:[#allocation56_spill] sm:$0xff] }
 0x1b7   :  { %v1254_v7 = vrot.slane %v1250_v42, 1  ;;  %v5346_v42 = vld [vmem:[#allocation57_spill] sm:$0xff] }
 0x1b9   :  { %1266 = vmatmul.bf16.vlgmr.msrb.gmra.mxu0 %v1254_v7  ;;  %1292 = vmatmul.bf16.vlgmr.msrb.gmra.mxu2 %v1254_v7 }
 0x1ba   :  { %1380 = vmatpush.bf16.msrb.mxu0 %v3847_v40  ;;  %1406 = vmatpush.bf16.msrb.mxu2 %v3851_v43 }
 0x1bb   :  { %1398 = vmatpush.bf16.msrb.mxu1 %v5336_v35  ;;  %1424 = vmatpush.bf16.msrb.mxu3 %v5337_v48 }
 0x1be   :  { %1381 = vmatpush.bf16.msrb.mxu0 %v3856_v53  ;;  %1407 = vmatpush.bf16.msrb.mxu2 %v3862_v55 }
 0x1bf   :  { %1399 = vmatpush.bf16.msrb.mxu1 %v5338_v4  ;;  %1425 = vmatpush.bf16.msrb.mxu3 %v5339_v10 }
 0x1c2   :  { %1382 = vmatpush.bf16.msrb.mxu0 %v3868_v1  ;;  %1408 = vmatpush.bf16.msrb.mxu2 %v3874_v3 }
 0x1c3   :  { %1400 = vmatpush.bf16.msrb.mxu1 %v5340_v38  ;;  %1426 = vmatpush.bf16.msrb.mxu3 %v5341_v18 }
 0x1c6   :  { %1383 = vmatpush.bf16.msrb.mxu0 %v3880_v13  ;;  %1401 = vmatmul.bf16.vlgmr.msrb.gmra.mxu1 %v1254_v7 }
 0x1c7   :  { %1493 = vmatpush.bf16.msra.mxu1 %v5342_v14  ;;  %1519 = vmatpush.bf16.msra.mxu3 %v3941_v22 }
 0x1c8   :  { %1409 = vmatpush.bf16.msrb.mxu2 %v3886_v15  ;;  %1427 = vmatmul.bf16.vlgmr.msrb.gmra.mxu3 %v1254_v7 }
 0x1c9   :  { %1318 = vmatmul.bf16.vlgmr.msra.gmra.mxu0 %v1254_v7  ;;  %1344 = vmatmul.bf16.vlgmr.msra.gmra.mxu2 %v1254_v7 }
 0x1ca   :  { %1384 = vmatpush.bf16.msrb.mxu0 %v5293_v41 }
 0x1cb   :  { %1494 = vmatpush.bf16.msra.mxu1 %v3950_v36  ;;  %1520 = vmatpush.bf16.msra.mxu3 %v3955_v45 }
 0x1cc   :  { %1410 = vmatpush.bf16.msrb.mxu2 %v5294_v9 }
 0x1ce   :  { %1385 = vmatpush.bf16.msrb.mxu0 %v5297_v21 }
 0x1cf   :  { %1495 = vmatpush.bf16.msra.mxu1 %v3959_v52  ;;  %1521 = vmatpush.bf16.msra.mxu3 %v3963_v57 }
 0x1d0   :  { %1411 = vmatpush.bf16.msrb.mxu2 %v5298_v19 }
 0x1d2   :  { %1386 = vmatpush.bf16.msrb.mxu0 %v5300_v54  ;;  %v5389_v54 = vld [vmem:[#allocation31_spill] sm:$0xff] }
 0x1d3   :  { %1496 = vmatpush.bf16.msra.mxu1 %v5343_v5  ;;  %1522 = vmatpush.bf16.msra.mxu3 %v3969_v6 }
 0x1d4   :  { %1412 = vmatpush.bf16.msrb.mxu2 %v5301_v2 }
 0x1d6   :  { %1387 = vmatpush.bf16.msrb.mxu0 %v5302_v58  ;;  %v5388_v58 = vld [vmem:[#allocation29_spill] sm:$0xff] }
 0x1d7   :  { %1497 = vmatpush.bf16.msra.mxu1 %v3972_v16  ;;  %1523 = vmatpush.bf16.msra.mxu3 %v3975_v23 }
 0x1d8   :  { %1413 = vmatpush.bf16.msrb.mxu2 %v5303_v31 }
 0x1d9   :  { %1388 = vmatmul.bf16.vlgmr.msrb.gmra.mxu0 %v1254_v7 }
 0x1da   :  { %1480 = vmatpush.bf16.msra.mxu0 %v5304_v11 }
 0x1db   :  { %1498 = vmatpush.bf16.msra.mxu1 %v3978_v32  ;;  %1524 = vmatpush.bf16.msra.mxu3 %v3981_v34 }
 0x1dc   :  { %1506 = vmatpush.bf16.msra.mxu2 %v5305_v60  ;;  %v5387_v60 = vld [vmem:[#allocation27_spill] sm:$0xff] }
 0x1dd   :  { %1414 = vmatmul.bf16.vlgmr.msrb.gmra.mxu2 %v1254_v7  ;;  %v5347_v7 = vld [vmem:[#allocation68_spill] sm:$0xff] }
 0x1de   :  { %1481 = vmatpush.bf16.msra.mxu0 %v5306_v63  ;;  %v5348_v63 = vld [vmem:[#allocation69_spill] sm:$0xff] }
 0x1df   :  { %1499 = vmatpush.bf16.msra.mxu1 %v3984_v50  ;;  %1525 = vmatpush.bf16.msra.mxu3 %v3987_v51  ;;  %v5350_v50 = vld [vmem:[#allocation59_spill] sm:$0xff]  ;;  %v5351_v51 = vld [vmem:[#allocation72_spill] sm:$0xff] }
 0x1e0   :  { %1507 = vmatpush.bf16.msra.mxu2 %v5307_v39  ;;  %v5349_v39 = vld [vmem:[#allocation58_spill] sm:$0xff] }
 0x1e2   :  { %1482 = vmatpush.bf16.msra.mxu0 %v5308_v8  ;;  %v5352_v8 = vld [vmem:[#allocation73_spill] sm:$0xff] }
 0x1e3   :  { %1500 = vmatpush.bf16.msra.mxu1 %v3990_v24  ;;  %1526 = vmatpush.bf16.msra.mxu3 %v5344_v61  ;;  %v5354_v24 = vld [vmem:[#allocation63_spill] sm:$0xff]  ;;  %v5355_v61 = vld [vmem:[#allocation76_spill] sm:$0xff] }
 0x1e4   :  { %1508 = vmatpush.bf16.msra.mxu2 %v5309_v44  ;;  %v5353_v44 = vld [vmem:[#allocation62_spill] sm:$0xff] }
 0x1e6   :  { %1483 = vmatpush.bf16.msra.mxu0 %v5347_v7  ;;  %v5358_v7 = vld [vmem:[#allocation67_spill] sm:$0xff] }
 0x1e7   :  { %1545 = vmatpush.bf16.msrb.mxu1 %v5345_v30  ;;  %1571 = vmatpush.bf16.msrb.mxu3 %v5346_v42  ;;  %v5356_v30 = vld [vmem:[#allocation77_spill] sm:$0xff]  ;;  %v5357_v42 = vld [vmem:[#allocation66_spill] sm:$0xff] }
 0x1e8   :  { %1509 = vmatpush.bf16.msra.mxu2 %v5348_v63  ;;  %v5359_v63 = vld [vmem:[#allocation80_spill] sm:$0xff] }
 0x1ea   :  { %1484 = vmatpush.bf16.msra.mxu0 %v5351_v51  ;;  %v5362_v51 = vld [vmem:[#allocation71_spill] sm:$0xff] }
 0x1eb   :  { %1546 = vmatpush.bf16.msrb.mxu1 %v5349_v39  ;;  %1572 = vmatpush.bf16.msrb.mxu3 %v5350_v50  ;;  %v5360_v39 = vld [vmem:[#allocation81_spill] sm:$0xff]  ;;  %v5361_v50 = vld [vmem:[#allocation70_spill] sm:$0xff] }
 0x1ec   :  { %1510 = vmatpush.bf16.msra.mxu2 %v5352_v8  ;;  %v5363_v8 = vld [vmem:[#allocation84_spill] sm:$0xff] }
 0x1ee   :  { %1485 = vmatpush.bf16.msra.mxu0 %v5355_v61  ;;  %v5366_v61 = vld [vmem:[#allocation87_spill] sm:$0xff] }
 0x1ef   :  { %1547 = vmatpush.bf16.msrb.mxu1 %v5353_v44  ;;  %1573 = vmatpush.bf16.msrb.mxu3 %v5354_v24  ;;  %v5364_v44 = vld [vmem:[#allocation85_spill] sm:$0xff]  ;;  %v5365_v24 = vld [vmem:[#allocation86_spill] sm:$0xff] }
 0x1f0   :  { %1511 = vmatpush.bf16.msra.mxu2 %v5356_v30  ;;  %v5367_v30 = vld [vmem:[#allocation74_spill] sm:$0xff] }
 0x1f2   :  { %1486 = vmatpush.bf16.msra.mxu0 %v5359_v63  ;;  %v5370_v63 = vld [vmem:[#allocation89_spill] sm:$0xff] }
 0x1f3   :  { %1548 = vmatpush.bf16.msrb.mxu1 %v5357_v42  ;;  %1574 = vmatpush.bf16.msrb.mxu3 %v5358_v7  ;;  %v5368_v42 = vld [vmem:[#allocation75_spill] sm:$0xff]  ;;  %v5369_v7 = vld [vmem:[#allocation88_spill] sm:$0xff] }
 0x1f4   :  { %1512 = vmatpush.bf16.msra.mxu2 %v5360_v39  ;;  %v5371_v39 = vld [vmem:[#allocation78_spill] sm:$0xff] }
 0x1f6   :  { %1487 = vmatpush.bf16.msra.mxu0 %v5363_v8  ;;  %v5374_v8 = vld [vmem:[#allocation91_spill] sm:$0xff] }
 0x1f7   :  { %1549 = vmatpush.bf16.msrb.mxu1 %v5361_v50  ;;  %1575 = vmatpush.bf16.msrb.mxu3 %v5362_v51  ;;  %v5372_v50 = vld [vmem:[#allocation79_spill] sm:$0xff]  ;;  %v5373_v51 = vld [vmem:[#allocation90_spill] sm:$0xff] }
 0x1f8   :  { %1513 = vmatpush.bf16.msra.mxu2 %v5364_v44  ;;  %v5375_v44 = vld [vmem:[#allocation82_spill] sm:$0xff] }
 0x1fa   :  { %1532 = vmatpush.bf16.msrb.mxu0 %v5365_v24  ;;  %v5376_v24 = vld [vmem:[#allocation83_spill] sm:$0xff] }
 0x1fb   :  { %1550 = vmatpush.bf16.msrb.mxu1 %v5367_v30  ;;  %1576 = vmatpush.bf16.msrb.mxu3 %v5368_v42  ;;  %v5378_v30 = vld [vmem:[#allocation93_spill] sm:$0xff]  ;;  %v5379_v42 = vld [vmem:[#allocation94_spill] sm:$0xff] }
 0x1fc   :  { %1558 = vmatpush.bf16.msrb.mxu2 %v5366_v61  ;;  %v5377_v61 = vld [vmem:[#allocation92_spill] sm:$0xff] }
 0x1fe   :  { %1533 = vmatpush.bf16.msrb.mxu0 %v5369_v7  ;;  %v5380_v7 = vld [vmem:[#allocation95_spill] sm:$0xff] }
 0x1ff   :  { %1551 = vmatpush.bf16.msrb.mxu1 %v5371_v39  ;;  %1577 = vmatpush.bf16.msrb.mxu3 %v5372_v50  ;;  %v5382_v39 = vld [vmem:[#allocation99_spill] sm:$0xff]  ;;  %v5383_v50 = vld [vmem:[#allocation101_spill] sm:$0xff] }
 0x200   :  { %1559 = vmatpush.bf16.msrb.mxu2 %v5370_v63  ;;  %v5381_v63 = vld [vmem:[#allocation96_spill] sm:$0xff] }
 0x202   :  { %1534 = vmatpush.bf16.msrb.mxu0 %v5373_v51  ;;  %v5384_v51 = vld [vmem:[#allocation102_spill] sm:$0xff] }
 0x203   :  { %1552 = vmatpush.bf16.msrb.mxu1 %v5375_v44  ;;  %1578 = vmatpush.bf16.msrb.mxu3 %v5376_v24  ;;  %v5386_v44 = vld [vmem:[#allocation106_spill] sm:$0xff] }
 0x204   :  { %1560 = vmatpush.bf16.msrb.mxu2 %v5374_v8  ;;  %v5385_v8 = vld [vmem:[#allocation104_spill] sm:$0xff] }
 0x206   :  { %1535 = vmatpush.bf16.msrb.mxu0 %v5377_v61 }
 0x208   :  { %1561 = vmatpush.bf16.msrb.mxu2 %v5378_v30 }
 0x20a   :  { %1536 = vmatpush.bf16.msrb.mxu0 %v5379_v42 }
 0x20c   :  { %1562 = vmatpush.bf16.msrb.mxu2 %v5380_v7 }
 0x20e   :  { %1537 = vmatpush.bf16.msrb.mxu0 %v5381_v63 }
 0x210   :  { %1563 = vmatpush.bf16.msrb.mxu2 %v5382_v39 }
 0x212   :  { %1538 = vmatpush.bf16.msrb.mxu0 %v5383_v50 }
 0x214   :  { %1564 = vmatpush.bf16.msrb.mxu2 %v5384_v51 }
 0x216   :  { %1539 = vmatpush.bf16.msrb.mxu0 %v5385_v8 }
 0x218   :  { %1565 = vmatpush.bf16.msrb.mxu2 %v5386_v44 }
 0x222   :  { %v1280_v24 = vpop.f32.mrf.mxu1 }
 0x228   :  { %v1306_v61 = vpop.f32.mrf.mxu3 }
 0x22a   :  { %v1282_v34 = vpop.f32.mrf.mxu1 }
 0x230   :  { %v1308_v30 = vpop.f32.mrf.mxu3 }
 0x232   :  { %v1332_v32 = vpop.f32.mrf.mxu1 }
 0x236   :  { %v1267_v42 = vpop.f32.mrf.mxu0 }
 0x237   :  { %v1268_v7 = vadd.f32 %v1267_v42, %v5387_v60 }
 0x238   :  { %v1358_v11 = vpop.f32.mrf.mxu3 }
 0x239   :  { %v1281_v63 = vadd.f32 %v1280_v24, %v1268_v7 }
 0x23a   :  { %v1334_v31 = vpop.f32.mrf.mxu1 }
 0x23b   :  { %v1362_v23 = vmul.f32 0.5, %v1281_v63 }
 0x23c   :  { %v1293_v39 = vpop.f32.mrf.mxu2 }
 0x23d   :  { %v1294_v50 = vadd.f32 %v1293_v39, %v5388_v58  ;;  %3452 = vtanh.f32 %v1362_v23 }
 0x23e   :  { %v1269_v51 = vpop.f32.mrf.mxu0 }
 0x23f   :  { %v1307_v16 = vadd.f32 %v1306_v61, %v1294_v50 }
 0x240   :  { %v1360_v8 = vpop.f32.mrf.mxu3 }
 0x241   :  { %v1366_v2 = vmul.f32 0.5, %v1307_v16 }
 0x243   :  { %3454 = vtanh.f32 %v1366_v2  ;;  %v1402_v44 = vpop.f32.mrf.mxu1  ;;  %v3453_v5 = vpop.eup %3452 }
 0x244   :  { %v1295_v34 = vpop.f32.mrf.mxu2  ;;  %v1364_v39 = vadd.f32 1.0, %v3453_v5  ;;  %v1437_v63 = vrot.slane %v1402_v44, 4 }
 0x246   :  { %v1319_v30 = vpop.f32.mrf.mxu0  ;;  %v1365_v2 = vmul.f32 0.5, %v1364_v39  ;;  %v1445_v61 = vadd.f32 %v1437_v63, %v4165_v17 }
 0x247   :  { %v1320_v6 = vadd.f32 %v1319_v30, %v5389_v54 }
 0x249   :  { %v3455_v42 = vpop.eup %3454  ;;  %v1333_v60 = vadd.f32 %v1332_v32, %v1320_v6 }
 0x24a   :  { %v1368_v24 = vadd.f32 1.0, %v3455_v42 }
 0x24b   :  { %v1428_v31 = vpop.f32.mrf.mxu3  ;;  %3456 = vtanh.f32 %v1333_v60  ;;  %v1404_v7 = vpop.f32.mrf.mxu1  ;;  %v1452_v60 = vmul.f32 0.5, %v1445_v61 }
 0x24c   :  { %v1345_v51 = vpop.f32.mrf.mxu2  ;;  %v1369_v16 = vmul.f32 0.5, %v1368_v24  ;;  %v1439_v7 = vrot.slane %v1428_v31, 4 }
 0x24d   :  { %v1346_v50 = vadd.f32 %v1345_v51, %v4280_v28 }
 0x24e   :  { %v1321_v23 = vpop.f32.mrf.mxu0  ;;  %v1375_v54 = vmul.f32 %v1369_v16, %v4284_v27  ;;  %v1447_v16 = vadd.f32 %v1439_v7, %v4186_v46 }
 0x24f   :  { %v1359_v8 = vadd.f32 %v1358_v11, %v1346_v50 }
 0x251   :  { %v3457_v34 = vpop.eup %3456  ;;  %v1371_v30 = vmul.f32 0.5, %v1359_v8 }
 0x252   :  { %v1376_v6 = vmul.f32 %v3457_v34, %v1365_v2 }
 0x253   :  { %v1430_v32 = vpop.f32.mrf.mxu3  ;;  %3458 = vtanh.f32 %v1371_v30 }
 0x254   :  { %v4396_v42 = vadd.f32 %v1376_v6, %v1375_v54  ;;  %v1347_v44 = vpop.f32.mrf.mxu2  ;;  %v1457_v32 = vmul.f32 0.5, %v1447_v16 }
 0x256   :  { %3460 = vtanh.f32 %v4396_v42  ;;  %v1389_v5 = vpop.f32.mrf.mxu0 }
 0x257   :  { %v1436_v24 = vrot.slane %v1389_v5, 4  ;;  %3462 = vtanh.f32 %v1452_v60 }
 0x259   :  { %v3459_v11 = vpop.eup %3458  ;;  %v1444_v39 = vadd.f32 %v1436_v24, %v4156_v33 }
 0x25a   :  { %v1373_v63 = vadd.f32 1.0, %v3459_v11 }
 0x25b   :  { %v1448_v51 = vmul.f32 0.5, %v1444_v39  ;;  %v1462_v39 = vrot.slane %v4293_v47, 6 }
 0x25c   :  { %v3461_v50 = vpop.eup %3460  ;;  %v1374_v27 = vmul.f32 0.5, %v1373_v63 }
 0x25d   :  { %3464 = vtanh.f32 %v1448_v51  ;;  %v3463_v54 = vpop.eup %3462 }
 0x25e   :  { %v1379_v8 = vmul.f32 %v3461_v50, %v1374_v27  ;;  %v1391_v61 = vpop.f32.mrf.mxu0  ;;  %v1454_v6 = vadd.f32 1.0, %v3463_v54 }
 0x260   :  { %v1415_v23 = vpop.f32.mrf.mxu2  ;;  %v1470_v34 = vrot.slane %v1379_v8, 4  ;;  %v1455_v24 = vmul.f32 0.5, %v1454_v6  ;;  %v5392_v6 = vld [vmem:[#allocation35_spill] sm:$0xff] }
 0x261   :  { %v1438_v2 = vrot.slane %v1415_v23, 4 }
 0x262   :  { %v1473_v31 = vpack.c.bf16 %v1470_v34, %v1470_v34  ;;  %v1464_v51 = vmul.f32 %v1462_v39, %v1455_v24  ;;  %v5390_v34 = vld [vmem:[#allocation46_spill] sm:$0xff]  ;;  %v5398_v24 = vld [vmem:[#allocation44_spill] sm:$0xff]  ;;  %v5401_v39 = vld [vmem:[#allocation51_spill] sm:$0xff] }
 0x263   :  { %v1446_v30 = vadd.f32 %v1438_v2, %v4182_v20  ;;  %v3465_v60 = vpop.eup %3464 }
 0x264   :  { %v1450_v44 = vadd.f32 1.0, %v3465_v60  ;;  %v1477_v5 = vrot.slane %v1473_v31, 2  ;;  %v5394_v31 = vld [vmem:[#allocation48_spill] sm:$0xff]  ;;  %v5395_v60 = vld [vmem:[#allocation49_spill] sm:$0xff] }
 0x265   :  { %3466 = vtanh.f32 %v1446_v30  ;;  %v5391_v30 = vld [vmem:[#allocation47_spill] sm:$0xff] }
 0x266   :  { %3468 = vtanh.f32 %v1457_v32  ;;  %v1451_v7 = vmul.f32 0.5, %v1450_v44  ;;  %1501 = vmatmul.bf16.vlgmr.msra.gmra.mxu1 %v1477_v5  ;;  %1527 = vmatmul.bf16.vlgmr.msra.gmra.mxu3 %v1477_v5  ;;  %v5393_v32 = vld [vmem:[#allocation37_spill] sm:$0xff]  ;;  %v5396_v44 = vld [vmem:[#allocation39_spill] sm:$0xff] }
 0x267   :  { %1615 = vmatpush.bf16.msra.mxu1 %v5326_v12  ;;  %1641 = vmatpush.bf16.msra.mxu3 %v5327_v49 }
 0x268   :  { %v1417_v11 = vpop.f32.mrf.mxu2 }
 0x269   :  { %v5399_v11 = vld [vmem:[#allocation45_spill] sm:$0xff] }
 0x26b   :  { %v3467_v63 = vpop.eup %3466  ;;  %1616 = vmatpush.bf16.msra.mxu1 %v5328_v37  ;;  %1642 = vmatpush.bf16.msra.mxu3 %v5329_v25 }
 0x26c   :  { %v1465_v50 = vmul.f32 %v3467_v63, %v1451_v7  ;;  %v3469_v27 = vpop.eup %3468  ;;  %v5400_v7 = vld [vmem:[#allocation50_spill] sm:$0xff]  ;;  %v5402_v63 = vld [vmem:[#allocation60_spill] sm:$0xff] }
 0x26d   :  { %v1459_v23 = vadd.f32 1.0, %v3469_v27  ;;  %v5405_v27 = vld [vmem:[#allocation53_spill] sm:$0xff] }
 0x26e   :  { %v4405_v16 = vadd.f32 %v1465_v50, %v1464_v51  ;;  %v5403_v51 = vld [vmem:[#allocation61_spill] sm:$0xff]  ;;  %v5404_v50 = vld [vmem:[#allocation52_spill] sm:$0xff] }
 0x26f   :  { %1617 = vmatpush.bf16.msra.mxu1 %v5330_v62  ;;  %1643 = vmatpush.bf16.msra.mxu3 %v5331_v0  ;;  %v1460_v47 = vmul.f32 0.5, %v1459_v23  ;;  %v5406_v23 = vld [vmem:[#allocation64_spill] sm:$0xff] }
 0x270   :  { %3470 = vtanh.f32 %v4405_v16 }
 0x273   :  { %1618 = vmatpush.bf16.msra.mxu1 %v5332_v56  ;;  %1644 = vmatpush.bf16.msra.mxu3 %v5333_v59 }
 0x276   :  { %v3471_v54 = vpop.eup %3470  ;;  %1553 = vmatmul.bf16.vlgmr.msrb.gmra.mxu1 %v1477_v5  ;;  %1579 = vmatmul.bf16.vlgmr.msrb.gmra.mxu3 %v1477_v5  ;;  %v5397_v5 = vld [vmem:[#allocation41_spill] sm:$0xff] }
 0x277   :  { %v1468_v8 = vmul.f32 %v3471_v54, %v1460_v47  ;;  %1619 = vmatpush.bf16.msra.mxu1 %v5334_v29  ;;  %1645 = vmatpush.bf16.msra.mxu3 %v5335_v26  ;;  %v5407_v47 = vld [vmem:[#allocation65_spill] sm:$0xff]  ;;  %v5408_v54 = vld [vmem:[#allocation54_spill] sm:$0xff] }
 0x279   :  { %v1472_v2 = vpack.c.bf16 %v1468_v8, %v1468_v8  ;;  %v5409_v8 = vld [vmem:[#allocation55_spill] sm:$0xff] }
 0x27b   :  { %v1476_v61 = vrot.slane %v1472_v2, 2  ;;  %1620 = vmatpush.bf16.msra.mxu1 %v5336_v35  ;;  %1646 = vmatpush.bf16.msra.mxu3 %v5337_v48  ;;  %v5410_v2 = vld [vmem:[#allocation56_spill] sm:$0xff] }
 0x27d   :  { %1488 = vmatmul.bf16.vlgmr.msra.gmra.mxu0 %v1476_v61  ;;  %1514 = vmatmul.bf16.vlgmr.msra.gmra.mxu2 %v1476_v61 }
 0x27e   :  { %1602 = vmatpush.bf16.msra.mxu0 %v3847_v40  ;;  %1628 = vmatpush.bf16.msra.mxu2 %v3851_v43 }
 0x27f   :  { %1621 = vmatpush.bf16.msra.mxu1 %v5338_v4  ;;  %1647 = vmatpush.bf16.msra.mxu3 %v5339_v10 }
 0x282   :  { %1603 = vmatpush.bf16.msra.mxu0 %v3856_v53  ;;  %1629 = vmatpush.bf16.msra.mxu2 %v3862_v55 }
 0x283   :  { %1622 = vmatpush.bf16.msra.mxu1 %v5340_v38  ;;  %1648 = vmatpush.bf16.msra.mxu3 %v5341_v18 }
 0x286   :  { %1604 = vmatpush.bf16.msra.mxu0 %v3868_v1  ;;  %1630 = vmatpush.bf16.msra.mxu2 %v3874_v3 }
 0x287   :  { %1715 = vmatpush.bf16.msrb.mxu1 %v5342_v14  ;;  %1741 = vmatpush.bf16.msrb.mxu3 %v3941_v22 }
 0x288   :  { %1623 = vmatmul.bf16.vlgmr.msra.gmra.mxu1 %v1476_v61  ;;  %1649 = vmatmul.bf16.vlgmr.msra.gmra.mxu3 %v1476_v61 }
 0x28a   :  { %1605 = vmatpush.bf16.msra.mxu0 %v3880_v13  ;;  %1631 = vmatpush.bf16.msra.mxu2 %v3886_v15 }
 0x28b   :  { %1716 = vmatpush.bf16.msrb.mxu1 %v3950_v36  ;;  %1742 = vmatpush.bf16.msrb.mxu3 %v3955_v45 }
 0x28d   :  { %1540 = vmatmul.bf16.vlgmr.msrb.gmra.mxu0 %v1476_v61  ;;  %1566 = vmatmul.bf16.vlgmr.msrb.gmra.mxu2 %v1476_v61 }
 0x28e   :  { %1606 = vmatpush.bf16.msra.mxu0 %v5293_v41  ;;  %1632 = vmatpush.bf16.msra.mxu2 %v5294_v9 }
 0x28f   :  { %1717 = vmatpush.bf16.msrb.mxu1 %v3959_v52  ;;  %1743 = vmatpush.bf16.msrb.mxu3 %v3963_v57 }
 0x292   :  { %1607 = vmatpush.bf16.msra.mxu0 %v5297_v21  ;;  %1633 = vmatpush.bf16.msra.mxu2 %v5298_v19 }
 0x293   :  { %1718 = vmatpush.bf16.msrb.mxu1 %v5390_v34  ;;  %1744 = vmatpush.bf16.msrb.mxu3 %v5391_v30 }
 0x296   :  { %1608 = vmatpush.bf16.msra.mxu0 %v5392_v6  ;;  %1634 = vmatpush.bf16.msra.mxu2 %v5393_v32  ;;  %v5453_v6 = vld [vmem:[#allocation31_spill] sm:$0xff] }
 0x297   :  { %1719 = vmatpush.bf16.msrb.mxu1 %v5394_v31  ;;  %1745 = vmatpush.bf16.msrb.mxu3 %v5395_v60 }
 0x29a   :  { %1609 = vmatpush.bf16.msra.mxu0 %v5396_v44  ;;  %1635 = vmatpush.bf16.msra.mxu2 %v5397_v5 }
 0x29b   :  { %1720 = vmatpush.bf16.msrb.mxu1 %v5400_v7  ;;  %1746 = vmatpush.bf16.msrb.mxu3 %v5401_v39  ;;  %v5411_v39 = vld [vmem:[#allocation57_spill] sm:$0xff] }
 0x29d   :  { %1610 = vmatmul.bf16.vlgmr.msra.gmra.mxu0 %v1476_v61  ;;  %1636 = vmatmul.bf16.vlgmr.msra.gmra.mxu2 %v1476_v61  ;;  %v5412_v61 = vld [vmem:[#allocation68_spill] sm:$0xff] }
 0x29e   :  { %1702 = vmatpush.bf16.msrb.mxu0 %v5398_v24  ;;  %1728 = vmatpush.bf16.msrb.mxu2 %v5399_v11  ;;  %v5452_v24 = vld [vmem:[#allocation27_spill] sm:$0xff] }
 0x29f   :  { %1721 = vmatpush.bf16.msrb.mxu1 %v5404_v50  ;;  %1747 = vmatpush.bf16.msrb.mxu3 %v5405_v27  ;;  %v5415_v50 = vld [vmem:[#allocation59_spill] sm:$0xff]  ;;  %v5416_v27 = vld [vmem:[#allocation72_spill] sm:$0xff] }
 0x2a2   :  { %1703 = vmatpush.bf16.msrb.mxu0 %v5402_v63  ;;  %1729 = vmatpush.bf16.msrb.mxu2 %v5403_v51  ;;  %v5413_v63 = vld [vmem:[#allocation69_spill] sm:$0xff]  ;;  %v5414_v51 = vld [vmem:[#allocation58_spill] sm:$0xff] }
 0x2a3   :  { %1722 = vmatpush.bf16.msrb.mxu1 %v5408_v54  ;;  %1748 = vmatpush.bf16.msrb.mxu3 %v5409_v8  ;;  %v5419_v54 = vld [vmem:[#allocation63_spill] sm:$0xff]  ;;  %v5420_v8 = vld [vmem:[#allocation76_spill] sm:$0xff] }
 0x2a6   :  { %1704 = vmatpush.bf16.msrb.mxu0 %v5406_v23  ;;  %1730 = vmatpush.bf16.msrb.mxu2 %v5407_v47  ;;  %v5417_v23 = vld [vmem:[#allocation73_spill] sm:$0xff]  ;;  %v5418_v47 = vld [vmem:[#allocation62_spill] sm:$0xff] }
 0x2a7   :  { %1767 = vmatpush.bf16.msra.mxu1 %v5410_v2  ;;  %1793 = vmatpush.bf16.msra.mxu3 %v5411_v39  ;;  %v5421_v2 = vld [vmem:[#allocation77_spill] sm:$0xff]  ;;  %v5422_v39 = vld [vmem:[#allocation66_spill] sm:$0xff] }
 0x2aa   :  { %1705 = vmatpush.bf16.msrb.mxu0 %v5412_v61  ;;  %1731 = vmatpush.bf16.msrb.mxu2 %v5413_v63  ;;  %v5423_v61 = vld [vmem:[#allocation67_spill] sm:$0xff]  ;;  %v5424_v63 = vld [vmem:[#allocation80_spill] sm:$0xff] }
 0x2ab   :  { %1768 = vmatpush.bf16.msra.mxu1 %v5414_v51  ;;  %1794 = vmatpush.bf16.msra.mxu3 %v5415_v50  ;;  %v5425_v51 = vld [vmem:[#allocation81_spill] sm:$0xff]  ;;  %v5426_v50 = vld [vmem:[#allocation70_spill] sm:$0xff] }
 0x2ae   :  { %1706 = vmatpush.bf16.msrb.mxu0 %v5416_v27  ;;  %1732 = vmatpush.bf16.msrb.mxu2 %v5417_v23  ;;  %v5427_v27 = vld [vmem:[#allocation71_spill] sm:$0xff]  ;;  %v5428_v23 = vld [vmem:[#allocation84_spill] sm:$0xff] }
 0x2af   :  { %1769 = vmatpush.bf16.msra.mxu1 %v5418_v47  ;;  %1795 = vmatpush.bf16.msra.mxu3 %v5419_v54  ;;  %v5429_v47 = vld [vmem:[#allocation85_spill] sm:$0xff]  ;;  %v5430_v54 = vld [vmem:[#allocation86_spill] sm:$0xff] }
 0x2b2   :  { %1707 = vmatpush.bf16.msrb.mxu0 %v5420_v8  ;;  %1733 = vmatpush.bf16.msrb.mxu2 %v5421_v2  ;;  %v5431_v8 = vld [vmem:[#allocation87_spill] sm:$0xff]  ;;  %v5432_v2 = vld [vmem:[#allocation74_spill] sm:$0xff] }
 0x2b3   :  { %1770 = vmatpush.bf16.msra.mxu1 %v5422_v39  ;;  %1796 = vmatpush.bf16.msra.mxu3 %v5423_v61  ;;  %v5433_v39 = vld [vmem:[#allocation75_spill] sm:$0xff]  ;;  %v5434_v61 = vld [vmem:[#allocation88_spill] sm:$0xff] }
 0x2b6   :  { %1708 = vmatpush.bf16.msrb.mxu0 %v5424_v63  ;;  %1734 = vmatpush.bf16.msrb.mxu2 %v5425_v51  ;;  %v5435_v63 = vld [vmem:[#allocation89_spill] sm:$0xff]  ;;  %v5436_v51 = vld [vmem:[#allocation78_spill] sm:$0xff] }
 0x2b7   :  { %1771 = vmatpush.bf16.msra.mxu1 %v5426_v50  ;;  %1797 = vmatpush.bf16.msra.mxu3 %v5427_v27  ;;  %v5437_v50 = vld [vmem:[#allocation79_spill] sm:$0xff]  ;;  %v5438_v27 = vld [vmem:[#allocation90_spill] sm:$0xff] }
 0x2ba   :  { %1709 = vmatpush.bf16.msrb.mxu0 %v5428_v23  ;;  %1735 = vmatpush.bf16.msrb.mxu2 %v5429_v47  ;;  %v5439_v23 = vld [vmem:[#allocation91_spill] sm:$0xff]  ;;  %v5440_v47 = vld [vmem:[#allocation82_spill] sm:$0xff] }
 0x2bb   :  { %1772 = vmatpush.bf16.msra.mxu1 %v5432_v2  ;;  %1798 = vmatpush.bf16.msra.mxu3 %v5433_v39  ;;  %v5443_v2 = vld [vmem:[#allocation93_spill] sm:$0xff]  ;;  %v5444_v39 = vld [vmem:[#allocation94_spill] sm:$0xff] }
 0x2be   :  { %1754 = vmatpush.bf16.msra.mxu0 %v5430_v54  ;;  %1780 = vmatpush.bf16.msra.mxu2 %v5431_v8  ;;  %v5441_v54 = vld [vmem:[#allocation83_spill] sm:$0xff]  ;;  %v5442_v8 = vld [vmem:[#allocation92_spill] sm:$0xff] }
 0x2bf   :  { %1773 = vmatpush.bf16.msra.mxu1 %v5436_v51  ;;  %1799 = vmatpush.bf16.msra.mxu3 %v5437_v50  ;;  %v5447_v51 = vld [vmem:[#allocation99_spill] sm:$0xff]  ;;  %v5448_v50 = vld [vmem:[#allocation101_spill] sm:$0xff] }
 0x2c2   :  { %1755 = vmatpush.bf16.msra.mxu0 %v5434_v61  ;;  %1781 = vmatpush.bf16.msra.mxu2 %v5435_v63  ;;  %v5445_v61 = vld [vmem:[#allocation95_spill] sm:$0xff]  ;;  %v5446_v63 = vld [vmem:[#allocation96_spill] sm:$0xff] }
 0x2c3   :  { %1774 = vmatpush.bf16.msra.mxu1 %v5440_v47  ;;  %1800 = vmatpush.bf16.msra.mxu3 %v5441_v54  ;;  %v5451_v47 = vld [vmem:[#allocation106_spill] sm:$0xff] }
 0x2c6   :  { %1756 = vmatpush.bf16.msra.mxu0 %v5438_v27  ;;  %1782 = vmatpush.bf16.msra.mxu2 %v5439_v23  ;;  %v5449_v27 = vld [vmem:[#allocation102_spill] sm:$0xff]  ;;  %v5450_v23 = vld [vmem:[#allocation104_spill] sm:$0xff] }
 0x2ca   :  { %1757 = vmatpush.bf16.msra.mxu0 %v5442_v8  ;;  %1783 = vmatpush.bf16.msra.mxu2 %v5443_v2 }
 0x2ce   :  { %1758 = vmatpush.bf16.msra.mxu0 %v5444_v39  ;;  %1784 = vmatpush.bf16.msra.mxu2 %v5445_v61 }
 0x2d2   :  { %1759 = vmatpush.bf16.msra.mxu0 %v5446_v63  ;;  %1785 = vmatpush.bf16.msra.mxu2 %v5447_v51 }
 0x2d6   :  { %1760 = vmatpush.bf16.msra.mxu0 %v5448_v50  ;;  %1786 = vmatpush.bf16.msra.mxu2 %v5449_v27 }
 0x2da   :  { %1761 = vmatpush.bf16.msra.mxu0 %v5450_v23  ;;  %1787 = vmatpush.bf16.msra.mxu2 %v5451_v47 }
 0x2e3   :  { %v1502_v54 = vpop.f32.mrf.mxu1 }
 0x2e9   :  { %v1528_v8 = vpop.f32.mrf.mxu3 }
 0x2eb   :  { %v1504_v7 = vpop.f32.mrf.mxu1 }
 0x2f1   :  { %v1530_v2 = vpop.f32.mrf.mxu3 }
 0x2f3   :  { %v1554_v11 = vpop.f32.mrf.mxu1 }
 0x2f9   :  { %v1580_v5 = vpop.f32.mrf.mxu3 }
 0x2fa   :  { %v1489_v39 = vpop.f32.mrf.mxu0 }
 0x2fb   :  { %v1490_v61 = vadd.f32 %v1489_v39, %v5452_v24  ;;  %v1556_v44 = vpop.f32.mrf.mxu1 }
 0x2fd   :  { %v1503_v63 = vadd.f32 %v1502_v54, %v1490_v61 }
 0x2ff   :  { %v1584_v60 = vmul.f32 0.5, %v1503_v63 }
 0x300   :  { %v1515_v51 = vpop.f32.mrf.mxu2 }
 0x301   :  { %v1516_v50 = vadd.f32 %v1515_v51, %v5388_v58  ;;  %v1582_v23 = vpop.f32.mrf.mxu3  ;;  %3472 = vtanh.f32 %v1584_v60 }
 0x302   :  { %v1491_v27 = vpop.f32.mrf.mxu0 }
 0x303   :  { %v1529_v31 = vadd.f32 %v1528_v8, %v1516_v50 }
 0x305   :  { %v1588_v32 = vmul.f32 0.5, %v1529_v31  ;;  %v1624_v47 = vpop.f32.mrf.mxu1 }
 0x306   :  { %v1659_v63 = vrot.slane %v1624_v47, 2 }
 0x307   :  { %3474 = vtanh.f32 %v1588_v32  ;;  %v3473_v34 = vpop.eup %3472 }
 0x308   :  { %v1517_v7 = vpop.f32.mrf.mxu2  ;;  %v1586_v51 = vadd.f32 1.0, %v3473_v34  ;;  %v1667_v8 = vadd.f32 %v1659_v63, %v4165_v17 }
 0x30a   :  { %v1541_v2 = vpop.f32.mrf.mxu0  ;;  %v1587_v23 = vmul.f32 0.5, %v1586_v51 }
 0x30b   :  { %v1542_v30 = vadd.f32 %v1541_v2, %v5453_v6  ;;  %v1650_v44 = vpop.f32.mrf.mxu3 }
 0x30d   :  { %v3475_v39 = vpop.eup %3474  ;;  %v1555_v24 = vadd.f32 %v1554_v11, %v1542_v30  ;;  %v1626_v61 = vpop.f32.mrf.mxu1 }
 0x30e   :  { %v1590_v54 = vadd.f32 1.0, %v3475_v39  ;;  %v1661_v61 = vrot.slane %v1650_v44, 2 }
 0x30f   :  { %3476 = vtanh.f32 %v1555_v24  ;;  %v1674_v24 = vmul.f32 0.5, %v1667_v8 }
 0x310   :  { %v1567_v27 = vpop.f32.mrf.mxu2  ;;  %v1591_v31 = vmul.f32 0.5, %v1590_v54 }
 0x311   :  { %v1568_v50 = vadd.f32 %v1567_v27, %v4280_v28 }
 0x312   :  { %v1543_v60 = vpop.f32.mrf.mxu0  ;;  %v1597_v6 = vmul.f32 %v1591_v31, %v4396_v42 }
 0x313   :  { %v1581_v32 = vadd.f32 %v1580_v5, %v1568_v50  ;;  %v1652_v11 = vpop.f32.mrf.mxu3  ;;  %v1669_v50 = vadd.f32 %v1661_v61, %v4186_v46 }
 0x315   :  { %v3477_v7 = vpop.eup %3476  ;;  %v1593_v2 = vmul.f32 0.5, %v1581_v32 }
 0x316   :  { %v1598_v30 = vmul.f32 %v3477_v7, %v1587_v23 }
 0x317   :  { %3478 = vtanh.f32 %v1593_v2 }
 0x318   :  { %v4508_v39 = vadd.f32 %v1598_v30, %v1597_v6  ;;  %v1569_v34 = vpop.f32.mrf.mxu2  ;;  %v1679_v30 = vmul.f32 0.5, %v1669_v50 }
 0x31a   :  { %3480 = vtanh.f32 %v4508_v39  ;;  %v1611_v47 = vpop.f32.mrf.mxu0 }
 0x31b   :  { %v1658_v54 = vrot.slane %v1611_v47, 2  ;;  %3482 = vtanh.f32 %v1674_v24 }
 0x31d   :  { %v3479_v5 = vpop.eup %3478  ;;  %v1666_v17 = vadd.f32 %v1658_v54, %v4156_v33  ;;  %v1684_v54 = vrot.slane %v4405_v16, 6 }
 0x31e   :  { %v1595_v51 = vadd.f32 1.0, %v3479_v5 }
 0x31f   :  { %v1670_v63 = vmul.f32 0.5, %v1666_v17 }
 0x320   :  { %v3481_v27 = vpop.eup %3480  ;;  %v1596_v42 = vmul.f32 0.5, %v1595_v51  ;;  %v1637_v31 = vpop.f32.mrf.mxu2 }
 0x321   :  { %3484 = vtanh.f32 %v1670_v63  ;;  %v3483_v6 = vpop.eup %3482  ;;  %v1660_v32 = vrot.slane %v1637_v31, 2 }
 0x322   :  { %v1601_v60 = vmul.f32 %v3481_v27, %v1596_v42  ;;  %v1613_v23 = vpop.f32.mrf.mxu0  ;;  %v1676_v2 = vadd.f32 1.0, %v3483_v6  ;;  %v5454_v6 = vld [vmem:[#allocation46_spill] sm:$0xff] }
 0x323   :  { %v1668_v7 = vadd.f32 %v1660_v32, %v4182_v20  ;;  %v5456_v32 = vld [vmem:[#allocation35_spill] sm:$0xff]  ;;  %v5457_v23 = vld [vmem:[#allocation37_spill] sm:$0xff] }
 0x324   :  { %v1692_v8 = vrot.slane %v1601_v60, 2  ;;  %v1677_v34 = vmul.f32 0.5, %v1676_v2  ;;  %v5455_v60 = vld [vmem:[#allocation47_spill] sm:$0xff] }
 0x325   :  { %3486 = vtanh.f32 %v1668_v7  ;;  %v5459_v7 = vld [vmem:[#allocation49_spill] sm:$0xff]  ;;  %v5460_v2 = vld [vmem:[#allocation39_spill] sm:$0xff] }
 0x326   :  { %v1695_v44 = vpack.c.bf16 %v1692_v8, %v1692_v8  ;;  %3488 = vtanh.f32 %v1679_v30  ;;  %v1686_v5 = vmul.f32 %v1684_v54, %v1677_v34  ;;  %v5458_v8 = vld [vmem:[#allocation48_spill] sm:$0xff]  ;;  %v5461_v30 = vld [vmem:[#allocation41_spill] sm:$0xff] }
 0x327   :  { %v3485_v33 = vpop.eup %3484  ;;  %v5466_v34 = vld [vmem:[#allocation60_spill] sm:$0xff]  ;;  %v5469_v54 = vld [vmem:[#allocation53_spill] sm:$0xff] }
 0x328   :  { %v1672_v11 = vadd.f32 1.0, %v3485_v33  ;;  %v1699_v24 = vrot.slane %v1695_v44, 3  ;;  %v1639_v47 = vpop.f32.mrf.mxu2  ;;  %v5462_v44 = vld [vmem:[#allocation44_spill] sm:$0xff]  ;;  %v5463_v33 = vld [vmem:[#allocation45_spill] sm:$0xff] }
 0x329   :  { %v5467_v47 = vld [vmem:[#allocation61_spill] sm:$0xff] }
 0x32a   :  { %v1673_v46 = vmul.f32 0.5, %v1672_v11  ;;  %1723 = vmatmul.bf16.vlgmr.msrb.gmra.mxu1 %v1699_v24  ;;  %1749 = vmatmul.bf16.vlgmr.msrb.gmra.mxu3 %v1699_v24  ;;  %v5464_v11 = vld [vmem:[#allocation50_spill] sm:$0xff] }
 0x32b   :  { %1837 = vmatpush.bf16.msrb.mxu1 %v5326_v12  ;;  %1863 = vmatpush.bf16.msrb.mxu3 %v5327_v49  ;;  %v3487_v20 = vpop.eup %3486 }
 0x32c   :  { %v1687_v61 = vmul.f32 %v3487_v20, %v1673_v46  ;;  %v3489_v17 = vpop.eup %3488  ;;  %v5468_v46 = vld [vmem:[#allocation52_spill] sm:$0xff] }
 0x32d   :  { %v1681_v63 = vadd.f32 1.0, %v3489_v17  ;;  %v5470_v20 = vld [vmem:[#allocation64_spill] sm:$0xff]  ;;  %v5473_v17 = vld [vmem:[#allocation55_spill] sm:$0xff] }
 0x32e   :  { %v4517_v51 = vadd.f32 %v1687_v61, %v1686_v5  ;;  %v5471_v5 = vld [vmem:[#allocation65_spill] sm:$0xff]  ;;  %v5472_v61 = vld [vmem:[#allocation54_spill] sm:$0xff] }
 0x32f   :  { %1838 = vmatpush.bf16.msrb.mxu1 %v5328_v37  ;;  %1864 = vmatpush.bf16.msrb.mxu3 %v5329_v25  ;;  %v1682_v16 = vmul.f32 0.5, %v1681_v63  ;;  %v5474_v63 = vld [vmem:[#allocation56_spill] sm:$0xff] }
 0x330   :  { %3490 = vtanh.f32 %v4517_v51 }
 0x333   :  { %1839 = vmatpush.bf16.msrb.mxu1 %v5330_v62  ;;  %1865 = vmatpush.bf16.msrb.mxu3 %v5331_v0 }
 0x336   :  { %v3491_v27 = vpop.eup %3490 }
 0x337   :  { %1840 = vmatpush.bf16.msrb.mxu1 %v5332_v56  ;;  %1866 = vmatpush.bf16.msrb.mxu3 %v5333_v59  ;;  %v1690_v42 = vmul.f32 %v3491_v27, %v1682_v16  ;;  %v5475_v16 = vld [vmem:[#allocation57_spill] sm:$0xff]  ;;  %v5476_v27 = vld [vmem:[#allocation68_spill] sm:$0xff] }
 0x339   :  { %v1694_v50 = vpack.c.bf16 %v1690_v42, %v1690_v42  ;;  %v5477_v42 = vld [vmem:[#allocation69_spill] sm:$0xff] }
 0x33a   :  { %1775 = vmatmul.bf16.vlgmr.msra.gmra.mxu1 %v1699_v24  ;;  %1801 = vmatmul.bf16.vlgmr.msra.gmra.mxu3 %v1699_v24  ;;  %v5465_v24 = vld [vmem:[#allocation51_spill] sm:$0xff] }
 0x33b   :  { %1841 = vmatpush.bf16.msrb.mxu1 %v5334_v29  ;;  %1867 = vmatpush.bf16.msrb.mxu3 %v5335_v26  ;;  %v1698_v31 = vrot.slane %v1694_v50, 3  ;;  %v5478_v50 = vld [vmem:[#allocation58_spill] sm:$0xff] }
 0x33d   :  { %1710 = vmatmul.bf16.vlgmr.msrb.gmra.mxu0 %v1698_v31  ;;  %1736 = vmatmul.bf16.vlgmr.msrb.gmra.mxu2 %v1698_v31 }
 0x33e   :  { %1824 = vmatpush.bf16.msrb.mxu0 %v3847_v40  ;;  %1850 = vmatpush.bf16.msrb.mxu2 %v3851_v43 }
 0x33f   :  { %1842 = vmatpush.bf16.msrb.mxu1 %v5336_v35  ;;  %1868 = vmatpush.bf16.msrb.mxu3 %v5337_v48 }
 0x342   :  { %1825 = vmatpush.bf16.msrb.mxu0 %v3856_v53  ;;  %1851 = vmatpush.bf16.msrb.mxu2 %v3862_v55 }
 0x343   :  { %1843 = vmatpush.bf16.msrb.mxu1 %v5338_v4  ;;  %1869 = vmatpush.bf16.msrb.mxu3 %v5339_v10 }
 0x346   :  { %1826 = vmatpush.bf16.msrb.mxu0 %v3868_v1  ;;  %1852 = vmatpush.bf16.msrb.mxu2 %v3874_v3 }
 0x347   :  { %1844 = vmatpush.bf16.msrb.mxu1 %v5340_v38  ;;  %1870 = vmatpush.bf16.msrb.mxu3 %v5341_v18 }
 0x34a   :  { %1827 = vmatpush.bf16.msrb.mxu0 %v3880_v13  ;;  %1845 = vmatmul.bf16.vlgmr.msrb.gmra.mxu1 %v1698_v31 }
 0x34b   :  { %1916 = vmatpush.bf16.msra.mxu1 %v5342_v14  ;;  %1942 = vmatpush.bf16.msra.mxu3 %v3941_v22 }
 0x34c   :  { %1853 = vmatpush.bf16.msrb.mxu2 %v3886_v15  ;;  %1871 = vmatmul.bf16.vlgmr.msrb.gmra.mxu3 %v1698_v31 }
 0x34d   :  { %1762 = vmatmul.bf16.vlgmr.msra.gmra.mxu0 %v1698_v31  ;;  %1788 = vmatmul.bf16.vlgmr.msra.gmra.mxu2 %v1698_v31 }
 0x34e   :  { %1828 = vmatpush.bf16.msrb.mxu0 %v5293_v41 }
 0x34f   :  { %1917 = vmatpush.bf16.msra.mxu1 %v3950_v36  ;;  %1943 = vmatpush.bf16.msra.mxu3 %v3955_v45 }
 0x350   :  { %1854 = vmatpush.bf16.msrb.mxu2 %v5294_v9 }
 0x352   :  { %1829 = vmatpush.bf16.msrb.mxu0 %v5297_v21 }
 0x353   :  { %1918 = vmatpush.bf16.msra.mxu1 %v3959_v52  ;;  %1944 = vmatpush.bf16.msra.mxu3 %v3963_v57 }
 0x354   :  { %1855 = vmatpush.bf16.msrb.mxu2 %v5298_v19 }
 0x356   :  { %1830 = vmatpush.bf16.msrb.mxu0 %v5456_v32 }
 0x357   :  { %1919 = vmatpush.bf16.msra.mxu1 %v5454_v6  ;;  %1945 = vmatpush.bf16.msra.mxu3 %v5455_v60 }
 0x358   :  { %1856 = vmatpush.bf16.msrb.mxu2 %v5457_v23 }
 0x35a   :  { %1831 = vmatpush.bf16.msrb.mxu0 %v5460_v2  ;;  %v5517_v2 = vld [vmem:[#allocation31_spill] sm:$0xff] }
 0x35b   :  { %1920 = vmatpush.bf16.msra.mxu1 %v5458_v8  ;;  %1946 = vmatpush.bf16.msra.mxu3 %v5459_v7 }
 0x35c   :  { %1857 = vmatpush.bf16.msrb.mxu2 %v5461_v30 }
 0x35d   :  { %1832 = vmatmul.bf16.vlgmr.msrb.gmra.mxu0 %v1698_v31 }
 0x35e   :  { %1903 = vmatpush.bf16.msra.mxu0 %v5462_v44 }
 0x35f   :  { %1921 = vmatpush.bf16.msra.mxu1 %v5464_v11  ;;  %1947 = vmatpush.bf16.msra.mxu3 %v5465_v24 }
 0x360   :  { %1929 = vmatpush.bf16.msra.mxu2 %v5463_v33 }
 0x361   :  { %1858 = vmatmul.bf16.vlgmr.msrb.gmra.mxu2 %v1698_v31  ;;  %v5479_v31 = vld [vmem:[#allocation59_spill] sm:$0xff] }
 0x362   :  { %1904 = vmatpush.bf16.msra.mxu0 %v5466_v34  ;;  %v5516_v34 = vld [vmem:[#allocation27_spill] sm:$0xff] }
 0x363   :  { %1922 = vmatpush.bf16.msra.mxu1 %v5468_v46  ;;  %1948 = vmatpush.bf16.msra.mxu3 %v5469_v54  ;;  %v5480_v54 = vld [vmem:[#allocation72_spill] sm:$0xff] }
 0x364   :  { %1930 = vmatpush.bf16.msra.mxu2 %v5467_v47 }
 0x366   :  { %1905 = vmatpush.bf16.msra.mxu0 %v5470_v20  ;;  %v5481_v20 = vld [vmem:[#allocation73_spill] sm:$0xff] }
 0x367   :  { %1923 = vmatpush.bf16.msra.mxu1 %v5472_v61  ;;  %1949 = vmatpush.bf16.msra.mxu3 %v5473_v17  ;;  %v5483_v61 = vld [vmem:[#allocation63_spill] sm:$0xff]  ;;  %v5484_v17 = vld [vmem:[#allocation76_spill] sm:$0xff] }
 0x368   :  { %1931 = vmatpush.bf16.msra.mxu2 %v5471_v5  ;;  %v5482_v5 = vld [vmem:[#allocation62_spill] sm:$0xff] }
 0x36a   :  { %1906 = vmatpush.bf16.msra.mxu0 %v5476_v27  ;;  %v5487_v27 = vld [vmem:[#allocation67_spill] sm:$0xff] }
 0x36b   :  { %1968 = vmatpush.bf16.msrb.mxu1 %v5474_v63  ;;  %1994 = vmatpush.bf16.msrb.mxu3 %v5475_v16  ;;  %v5485_v63 = vld [vmem:[#allocation77_spill] sm:$0xff]  ;;  %v5486_v16 = vld [vmem:[#allocation66_spill] sm:$0xff] }
 0x36c   :  { %1932 = vmatpush.bf16.msra.mxu2 %v5477_v42  ;;  %v5488_v42 = vld [vmem:[#allocation80_spill] sm:$0xff] }
 0x36e   :  { %1907 = vmatpush.bf16.msra.mxu0 %v5480_v54  ;;  %v5491_v54 = vld [vmem:[#allocation71_spill] sm:$0xff] }
 0x36f   :  { %1969 = vmatpush.bf16.msrb.mxu1 %v5478_v50  ;;  %1995 = vmatpush.bf16.msrb.mxu3 %v5479_v31  ;;  %v5489_v50 = vld [vmem:[#allocation81_spill] sm:$0xff]  ;;  %v5490_v31 = vld [vmem:[#allocation70_spill] sm:$0xff] }
 0x370   :  { %1933 = vmatpush.bf16.msra.mxu2 %v5481_v20  ;;  %v5492_v20 = vld [vmem:[#allocation84_spill] sm:$0xff] }
 0x372   :  { %1908 = vmatpush.bf16.msra.mxu0 %v5484_v17  ;;  %v5495_v17 = vld [vmem:[#allocation87_spill] sm:$0xff] }
 0x373   :  { %1970 = vmatpush.bf16.msrb.mxu1 %v5482_v5  ;;  %1996 = vmatpush.bf16.msrb.mxu3 %v5483_v61  ;;  %v5493_v5 = vld [vmem:[#allocation85_spill] sm:$0xff]  ;;  %v5494_v61 = vld [vmem:[#allocation86_spill] sm:$0xff] }
 0x374   :  { %1934 = vmatpush.bf16.msra.mxu2 %v5485_v63  ;;  %v5496_v63 = vld [vmem:[#allocation74_spill] sm:$0xff] }
 0x376   :  { %1909 = vmatpush.bf16.msra.mxu0 %v5488_v42  ;;  %v5499_v42 = vld [vmem:[#allocation89_spill] sm:$0xff] }
 0x377   :  { %1971 = vmatpush.bf16.msrb.mxu1 %v5486_v16  ;;  %1997 = vmatpush.bf16.msrb.mxu3 %v5487_v27  ;;  %v5497_v16 = vld [vmem:[#allocation75_spill] sm:$0xff]  ;;  %v5498_v27 = vld [vmem:[#allocation88_spill] sm:$0xff] }
 0x378   :  { %1935 = vmatpush.bf16.msra.mxu2 %v5489_v50  ;;  %v5500_v50 = vld [vmem:[#allocation78_spill] sm:$0xff] }
 0x37a   :  { %1910 = vmatpush.bf16.msra.mxu0 %v5492_v20  ;;  %v5503_v20 = vld [vmem:[#allocation91_spill] sm:$0xff] }
 0x37b   :  { %1972 = vmatpush.bf16.msrb.mxu1 %v5490_v31  ;;  %1998 = vmatpush.bf16.msrb.mxu3 %v5491_v54  ;;  %v5501_v31 = vld [vmem:[#allocation79_spill] sm:$0xff]  ;;  %v5502_v54 = vld [vmem:[#allocation90_spill] sm:$0xff] }
 0x37c   :  { %1936 = vmatpush.bf16.msra.mxu2 %v5493_v5  ;;  %v5504_v5 = vld [vmem:[#allocation82_spill] sm:$0xff] }
 0x37e   :  { %1955 = vmatpush.bf16.msrb.mxu0 %v5494_v61  ;;  %v5505_v61 = vld [vmem:[#allocation83_spill] sm:$0xff] }
 0x37f   :  { %1973 = vmatpush.bf16.msrb.mxu1 %v5496_v63  ;;  %1999 = vmatpush.bf16.msrb.mxu3 %v5497_v16  ;;  %v5507_v63 = vld [vmem:[#allocation93_spill] sm:$0xff]  ;;  %v5508_v16 = vld [vmem:[#allocation94_spill] sm:$0xff] }
 0x380   :  { %1981 = vmatpush.bf16.msrb.mxu2 %v5495_v17  ;;  %v5506_v17 = vld [vmem:[#allocation92_spill] sm:$0xff] }
 0x382   :  { %1956 = vmatpush.bf16.msrb.mxu0 %v5498_v27  ;;  %v5509_v27 = vld [vmem:[#allocation95_spill] sm:$0xff] }
 0x383   :  { %1974 = vmatpush.bf16.msrb.mxu1 %v5500_v50  ;;  %2000 = vmatpush.bf16.msrb.mxu3 %v5501_v31  ;;  %v5511_v50 = vld [vmem:[#allocation99_spill] sm:$0xff]  ;;  %v5512_v31 = vld [vmem:[#allocation101_spill] sm:$0xff] }
 0x384   :  { %1982 = vmatpush.bf16.msrb.mxu2 %v5499_v42  ;;  %v5510_v42 = vld [vmem:[#allocation96_spill] sm:$0xff] }
 0x386   :  { %1957 = vmatpush.bf16.msrb.mxu0 %v5502_v54  ;;  %v5513_v54 = vld [vmem:[#allocation102_spill] sm:$0xff] }
 0x387   :  { %1975 = vmatpush.bf16.msrb.mxu1 %v5504_v5  ;;  %2001 = vmatpush.bf16.msrb.mxu3 %v5505_v61  ;;  %v5515_v5 = vld [vmem:[#allocation106_spill] sm:$0xff] }
 0x388   :  { %1983 = vmatpush.bf16.msrb.mxu2 %v5503_v20  ;;  %v5514_v20 = vld [vmem:[#allocation104_spill] sm:$0xff] }
 0x38a   :  { %1958 = vmatpush.bf16.msrb.mxu0 %v5506_v17 }
 0x38c   :  { %1984 = vmatpush.bf16.msrb.mxu2 %v5507_v63 }
 0x38e   :  { %1959 = vmatpush.bf16.msrb.mxu0 %v5508_v16 }
 0x390   :  { %1985 = vmatpush.bf16.msrb.mxu2 %v5509_v27 }
 0x392   :  { %1960 = vmatpush.bf16.msrb.mxu0 %v5510_v42 }
 0x394   :  { %1986 = vmatpush.bf16.msrb.mxu2 %v5511_v50 }
 0x396   :  { %1961 = vmatpush.bf16.msrb.mxu0 %v5512_v31 }
 0x398   :  { %1987 = vmatpush.bf16.msrb.mxu2 %v5513_v54 }
 0x39a   :  { %1962 = vmatpush.bf16.msrb.mxu0 %v5514_v20 }
 0x39c   :  { %1988 = vmatpush.bf16.msrb.mxu2 %v5515_v5 }
 0x3a7   :  { %v1724_v61 = vpop.f32.mrf.mxu1 }
 0x3ad   :  { %v1750_v17 = vpop.f32.mrf.mxu3 }
 0x3af   :  { %v1726_v46 = vpop.f32.mrf.mxu1 }
 0x3b5   :  { %v1752_v63 = vpop.f32.mrf.mxu3 }
 0x3b7   :  { %v1776_v47 = vpop.f32.mrf.mxu1 }
 0x3ba   :  { %v1711_v16 = vpop.f32.mrf.mxu0 }
 0x3bb   :  { %v1712_v27 = vadd.f32 %v1711_v16, %v5516_v34 }
 0x3bd   :  { %v1802_v24 = vpop.f32.mrf.mxu3  ;;  %v1725_v42 = vadd.f32 %v1724_v61, %v1712_v27  ;;  %v5518_v27 = vld [vmem:[#allocation97_spill] sm:$0xff] }
 0x3be   :  { %v5519_v23 = vperm.slane %v5518_v27, 1 }
 0x3bf   :  { %v1778_v11 = vpop.f32.mrf.mxu1  ;;  %v1806_v33 = vmul.f32 0.5, %v1725_v42 }
 0x3c0   :  { %v1737_v50 = vpop.f32.mrf.mxu2 }
 0x3c1   :  { %v1738_v31 = vadd.f32 %v1737_v50, %v5388_v58  ;;  %3492 = vtanh.f32 %v1806_v33  ;;  %v5520_v50 = vld [vmem:[#allocation100_spill] sm:$0xff] }
 0x3c2   :  { %v1713_v54 = vpop.f32.mrf.mxu0  ;;  %v4620_v42 = vadd.f32 %v5520_v50, %v5519_v23  ;;  %v5521_v50 = vperm.slane %v5518_v27, 0 }
 0x3c3   :  { %v1751_v44 = vadd.f32 %v1750_v17, %v1738_v31 }
 0x3c5   :  { %v1804_v20 = vpop.f32.mrf.mxu3  ;;  %v1810_v30 = vmul.f32 0.5, %v1751_v44 }
 0x3c7   :  { %3494 = vtanh.f32 %v1810_v30  ;;  %v1846_v5 = vpop.f32.mrf.mxu1  ;;  %v3493_v8 = vpop.eup %3492 }
 0x3c8   :  { %v1739_v46 = vpop.f32.mrf.mxu2  ;;  %v1808_v44 = vadd.f32 1.0, %v3493_v8  ;;  %v1877_v30 = vadd.f32 %v1846_v5, %v4620_v42  ;;  %v5522_v5 = vld [vmem:[#allocation98_spill] sm:$0xff] }
 0x3ca   :  { %v1763_v63 = vpop.f32.mrf.mxu0 }
 0x3cb   :  { %v1764_v7 = vadd.f32 %v1763_v63, %v5517_v2  ;;  %v1809_v63 = vmul.f32 0.5, %v1808_v44 }
 0x3cd   :  { %v3495_v16 = vpop.eup %3494  ;;  %v1777_v34 = vadd.f32 %v1776_v47, %v1764_v7  ;;  %v1884_v47 = vmul.f32 0.5, %v1877_v30 }
 0x3ce   :  { %v1812_v61 = vadd.f32 1.0, %v3495_v16 }
 0x3cf   :  { %v1872_v11 = vpop.f32.mrf.mxu3  ;;  %3496 = vtanh.f32 %v1777_v34  ;;  %v1848_v54 = vpop.f32.mrf.mxu1 }
 0x3d0   :  { %v1789_v33 = vpop.f32.mrf.mxu2  ;;  %v1813_v17 = vmul.f32 0.5, %v1812_v61  ;;  %v4630_v54 = vadd.f32 %v5522_v5, %v5521_v50 }
 0x3d1   :  { %v1790_v20 = vadd.f32 %v1789_v33, %v4280_v28  ;;  %v5524_v33 = vld [vmem:[#allocation105_spill] sm:$0xff] }
 0x3d2   :  { %v1765_v31 = vpop.f32.mrf.mxu0  ;;  %v1819_v2 = vmul.f32 %v1813_v17, %v4508_v39  ;;  %v5523_v39 = vperm.slane %v5518_v27, 3 }
 0x3d3   :  { %v1803_v46 = vadd.f32 %v1802_v24, %v1790_v20 }
 0x3d4   :  { %v4637_v30 = vadd.f32 %v5524_v33, %v5523_v39  ;;  %v1894_v33 = vrot.slane %v4517_v51, 6 }
 0x3d5   :  { %v3497_v7 = vpop.eup %3496  ;;  %v1815_v16 = vmul.f32 0.5, %v1803_v46  ;;  %v5525_v46 = vperm.slane %v5518_v27, 2 }
 0x3d6   :  { %v1820_v58 = vmul.f32 %v3497_v7, %v1809_v63  ;;  %v1879_v17 = vadd.f32 %v1872_v11, %v4637_v30  ;;  %v5526_v63 = vld [vmem:[#allocation103_spill] sm:$0xff] }
 0x3d7   :  { %v1874_v23 = vpop.f32.mrf.mxu3  ;;  %3498 = vtanh.f32 %v1815_v16  ;;  %v4643_v7 = vadd.f32 %v5526_v63, %v5525_v46 }
 0x3d8   :  { %v4625_v34 = vadd.f32 %v1820_v58, %v1819_v2  ;;  %v1791_v8 = vpop.f32.mrf.mxu2  ;;  %3500 = vtanh.f32 %v1884_v47 }
 0x3da   :  { %3502 = vtanh.f32 %v4625_v34  ;;  %v1833_v24 = vpop.f32.mrf.mxu0 }
 0x3db   :  { %v1876_v61 = vadd.f32 %v1833_v24, %v4630_v54  ;;  %v1889_v24 = vmul.f32 0.5, %v1879_v17 }
 0x3dd   :  { %v3499_v44 = vpop.eup %3498  ;;  %v1880_v58 = vmul.f32 0.5, %v1876_v61 }
 0x3de   :  { %v1817_v2 = vadd.f32 1.0, %v3499_v44  ;;  %v3501_v20 = vpop.eup %3500 }
 0x3df   :  { %3504 = vtanh.f32 %v1880_v58  ;;  %v1886_v5 = vadd.f32 1.0, %v3501_v20 }
 0x3e0   :  { %v3503_v31 = vpop.eup %3502  ;;  %v1818_v47 = vmul.f32 0.5, %v1817_v2 }
 0x3e1   :  { %v1887_v11 = vmul.f32 0.5, %v1886_v5  ;;  %v5529_v5 = vld [vmem:[#allocation49_spill] sm:$0xff] }
 0x3e2   :  { %v1823_v23 = vmul.f32 %v3503_v31, %v1818_v47  ;;  %v1835_v50 = vpop.f32.mrf.mxu0 }
 0x3e3   :  { %v1896_v31 = vmul.f32 %v1894_v33, %v1887_v11  ;;  %v5528_v50 = vld [vmem:[#allocation48_spill] sm:$0xff]  ;;  %v5534_v11 = vld [vmem:[#allocation50_spill] sm:$0xff] }
 0x3e4   :  { %v1859_v16 = vpop.f32.mrf.mxu2  ;;  %v1902_v61 = vpack.c.bf16 %v1823_v23, %v1823_v23  ;;  %v5536_v33 = vld [vmem:[#allocation60_spill] sm:$0xff] }
 0x3e5   :  { %v1878_v8 = vadd.f32 %v1859_v16, %v4643_v7  ;;  %v3505_v44 = vpop.eup %3504 }
 0x3e6   :  { %v1882_v39 = vadd.f32 1.0, %v3505_v44  ;;  %1924 = vmatmul.bf16.vlgmr.msra.gmra.mxu1 %v1902_v61  ;;  %1950 = vmatmul.bf16.vlgmr.msra.gmra.mxu3 %v1902_v61  ;;  %v5532_v44 = vld [vmem:[#allocation44_spill] sm:$0xff] }
 0x3e7   :  { %3506 = vtanh.f32 %v1878_v8  ;;  %2038 = vmatpush.bf16.msra.mxu1 %v5326_v12  ;;  %2064 = vmatpush.bf16.msra.mxu3 %v5327_v49  ;;  %v5527_v8 = vld [vmem:[#allocation37_spill] sm:$0xff] }
 0x3e8   :  { %3508 = vtanh.f32 %v1889_v24  ;;  %v1883_v27 = vmul.f32 0.5, %v1882_v39  ;;  %v5530_v24 = vld [vmem:[#allocation39_spill] sm:$0xff]  ;;  %v5533_v39 = vld [vmem:[#allocation45_spill] sm:$0xff] }
 0x3eb   :  { %2039 = vmatpush.bf16.msra.mxu1 %v5328_v37  ;;  %2065 = vmatpush.bf16.msra.mxu3 %v5329_v25 }
 0x3ec   :  { %v1861_v58 = vpop.f32.mrf.mxu2 }
 0x3ed   :  { %v3507_v2 = vpop.eup %3506  ;;  %v5537_v58 = vld [vmem:[#allocation61_spill] sm:$0xff] }
 0x3ee   :  { %v1897_v20 = vmul.f32 %v3507_v2, %v1883_v27  ;;  %v3509_v17 = vpop.eup %3508  ;;  %v5535_v27 = vld [vmem:[#allocation51_spill] sm:$0xff]  ;;  %v5538_v2 = vld [vmem:[#allocation52_spill] sm:$0xff] }
 0x3ef   :  { %2040 = vmatpush.bf16.msra.mxu1 %v5330_v62  ;;  %2066 = vmatpush.bf16.msra.mxu3 %v5331_v0  ;;  %v1891_v63 = vadd.f32 1.0, %v3509_v17  ;;  %v5541_v17 = vld [vmem:[#allocation65_spill] sm:$0xff] }
 0x3f0   :  { %v4651_v46 = vadd.f32 %v1897_v20, %v1896_v31  ;;  %v5539_v31 = vld [vmem:[#allocation53_spill] sm:$0xff]  ;;  %v5540_v20 = vld [vmem:[#allocation64_spill] sm:$0xff] }
 0x3f1   :  { %v1892_v51 = vmul.f32 0.5, %v1891_v63  ;;  %v5542_v63 = vld [vmem:[#allocation54_spill] sm:$0xff] }
 0x3f2   :  { %3510 = vtanh.f32 %v4651_v46 }
 0x3f3   :  { %2041 = vmatpush.bf16.msra.mxu1 %v5332_v56  ;;  %2067 = vmatpush.bf16.msra.mxu3 %v5333_v59 }
 0x3f6   :  { %1976 = vmatmul.bf16.vlgmr.msrb.gmra.mxu1 %v1902_v61  ;;  %2002 = vmatmul.bf16.vlgmr.msrb.gmra.mxu3 %v1902_v61  ;;  %v5531_v61 = vld [vmem:[#allocation41_spill] sm:$0xff] }
 0x3f7   :  { %2042 = vmatpush.bf16.msra.mxu1 %v5334_v29  ;;  %2068 = vmatpush.bf16.msra.mxu3 %v5335_v26 }
 0x3f8   :  { %v3511_v47 = vpop.eup %3510 }
 0x3f9   :  { %v1900_v16 = vmul.f32 %v3511_v47, %v1892_v51  ;;  %v5543_v51 = vld [vmem:[#allocation55_spill] sm:$0xff]  ;;  %v5544_v47 = vld [vmem:[#allocation56_spill] sm:$0xff] }
 0x3fb   :  { %v1901_v23 = vpack.c.bf16 %v1900_v16, %v1900_v16  ;;  %2043 = vmatpush.bf16.msra.mxu1 %v5336_v35  ;;  %2069 = vmatpush.bf16.msra.mxu3 %v5337_v48  ;;  %v5545_v16 = vld [vmem:[#allocation57_spill] sm:$0xff] }
 0x3fd   :  { %1911 = vmatmul.bf16.vlgmr.msra.gmra.mxu0 %v1901_v23  ;;  %1937 = vmatmul.bf16.vlgmr.msra.gmra.mxu2 %v1901_v23 }
 0x3fe   :  { %2025 = vmatpush.bf16.msra.mxu0 %v3847_v40  ;;  %2051 = vmatpush.bf16.msra.mxu2 %v3851_v43 }
 0x3ff   :  { %2044 = vmatpush.bf16.msra.mxu1 %v5338_v4  ;;  %2070 = vmatpush.bf16.msra.mxu3 %v5339_v10 }
 0x402   :  { %2026 = vmatpush.bf16.msra.mxu0 %v3856_v53  ;;  %2052 = vmatpush.bf16.msra.mxu2 %v3862_v55 }
 0x403   :  { %2045 = vmatpush.bf16.msra.mxu1 %v5340_v38  ;;  %2071 = vmatpush.bf16.msra.mxu3 %v5341_v18 }
 0x406   :  { %2027 = vmatpush.bf16.msra.mxu0 %v3868_v1  ;;  %2053 = vmatpush.bf16.msra.mxu2 %v3874_v3 }
 0x407   :  { %2138 = vmatpush.bf16.msrb.mxu1 %v5342_v14  ;;  %2164 = vmatpush.bf16.msrb.mxu3 %v3941_v22 }
 0x408   :  { %2046 = vmatmul.bf16.vlgmr.msra.gmra.mxu1 %v1901_v23  ;;  %2072 = vmatmul.bf16.vlgmr.msra.gmra.mxu3 %v1901_v23 }
 0x40a   :  { %2028 = vmatpush.bf16.msra.mxu0 %v3880_v13  ;;  %2054 = vmatpush.bf16.msra.mxu2 %v3886_v15 }
 0x40b   :  { %2139 = vmatpush.bf16.msrb.mxu1 %v3950_v36  ;;  %2165 = vmatpush.bf16.msrb.mxu3 %v3955_v45 }
 0x40d   :  { %1963 = vmatmul.bf16.vlgmr.msrb.gmra.mxu0 %v1901_v23  ;;  %1989 = vmatmul.bf16.vlgmr.msrb.gmra.mxu2 %v1901_v23 }
 0x40e   :  { %2029 = vmatpush.bf16.msra.mxu0 %v5293_v41  ;;  %2055 = vmatpush.bf16.msra.mxu2 %v5294_v9 }
 0x40f   :  { %2140 = vmatpush.bf16.msrb.mxu1 %v3959_v52  ;;  %2166 = vmatpush.bf16.msrb.mxu3 %v3963_v57 }
 0x412   :  { %2030 = vmatpush.bf16.msra.mxu0 %v5297_v21  ;;  %2056 = vmatpush.bf16.msra.mxu2 %v5298_v19 }
 0x413   :  { %2141 = vmatpush.bf16.msrb.mxu1 %v5454_v6  ;;  %2167 = vmatpush.bf16.msrb.mxu3 %v5455_v60 }
 0x416   :  { %2031 = vmatpush.bf16.msra.mxu0 %v5456_v32  ;;  %2057 = vmatpush.bf16.msra.mxu2 %v5527_v8  ;;  %v5588_v32 = vld [vmem:[#allocation31_spill] sm:$0xff] }
 0x417   :  { %2142 = vmatpush.bf16.msrb.mxu1 %v5528_v50  ;;  %2168 = vmatpush.bf16.msrb.mxu3 %v5529_v5 }
 0x41a   :  { %2032 = vmatpush.bf16.msra.mxu0 %v5530_v24  ;;  %2058 = vmatpush.bf16.msra.mxu2 %v5531_v61  ;;  %v5587_v24 = vld [vmem:[#allocation29_spill] sm:$0xff] }
 0x41b   :  { %2143 = vmatpush.bf16.msrb.mxu1 %v5534_v11  ;;  %2169 = vmatpush.bf16.msrb.mxu3 %v5535_v27 }
 0x41d   :  { %2033 = vmatmul.bf16.vlgmr.msra.gmra.mxu0 %v1901_v23  ;;  %2059 = vmatmul.bf16.vlgmr.msra.gmra.mxu2 %v1901_v23  ;;  %v5546_v23 = vld [vmem:[#allocation68_spill] sm:$0xff] }
 0x41e   :  { %2125 = vmatpush.bf16.msrb.mxu0 %v5532_v44  ;;  %2151 = vmatpush.bf16.msrb.mxu2 %v5533_v39  ;;  %v5586_v39 = vld [vmem:[#allocation27_spill] sm:$0xff] }
 0x41f   :  { %2144 = vmatpush.bf16.msrb.mxu1 %v5538_v2  ;;  %2170 = vmatpush.bf16.msrb.mxu3 %v5539_v31  ;;  %v5549_v2 = vld [vmem:[#allocation59_spill] sm:$0xff]  ;;  %v5550_v31 = vld [vmem:[#allocation72_spill] sm:$0xff] }
 0x422   :  { %2126 = vmatpush.bf16.msrb.mxu0 %v5536_v33  ;;  %2152 = vmatpush.bf16.msrb.mxu2 %v5537_v58  ;;  %v5547_v33 = vld [vmem:[#allocation69_spill] sm:$0xff]  ;;  %v5548_v58 = vld [vmem:[#allocation58_spill] sm:$0xff] }
 0x423   :  { %2145 = vmatpush.bf16.msrb.mxu1 %v5542_v63  ;;  %2171 = vmatpush.bf16.msrb.mxu3 %v5543_v51  ;;  %v5553_v63 = vld [vmem:[#allocation63_spill] sm:$0xff]  ;;  %v5554_v51 = vld [vmem:[#allocation76_spill] sm:$0xff] }
 0x426   :  { %2127 = vmatpush.bf16.msrb.mxu0 %v5540_v20  ;;  %2153 = vmatpush.bf16.msrb.mxu2 %v5541_v17  ;;  %v5551_v20 = vld [vmem:[#allocation73_spill] sm:$0xff]  ;;  %v5552_v17 = vld [vmem:[#allocation62_spill] sm:$0xff] }
 0x427   :  { %2190 = vmatpush.bf16.msra.mxu1 %v5544_v47  ;;  %2216 = vmatpush.bf16.msra.mxu3 %v5545_v16  ;;  %v5555_v47 = vld [vmem:[#allocation77_spill] sm:$0xff]  ;;  %v5556_v16 = vld [vmem:[#allocation66_spill] sm:$0xff] }
 0x42a   :  { %2128 = vmatpush.bf16.msrb.mxu0 %v5546_v23  ;;  %2154 = vmatpush.bf16.msrb.mxu2 %v5547_v33  ;;  %v5557_v23 = vld [vmem:[#allocation67_spill] sm:$0xff]  ;;  %v5558_v33 = vld [vmem:[#allocation80_spill] sm:$0xff] }
 0x42b   :  { %2191 = vmatpush.bf16.msra.mxu1 %v5548_v58  ;;  %2217 = vmatpush.bf16.msra.mxu3 %v5549_v2  ;;  %v5559_v58 = vld [vmem:[#allocation81_spill] sm:$0xff]  ;;  %v5560_v2 = vld [vmem:[#allocation70_spill] sm:$0xff] }
 0x42e   :  { %2129 = vmatpush.bf16.msrb.mxu0 %v5550_v31  ;;  %2155 = vmatpush.bf16.msrb.mxu2 %v5551_v20  ;;  %v5561_v31 = vld [vmem:[#allocation71_spill] sm:$0xff]  ;;  %v5562_v20 = vld [vmem:[#allocation84_spill] sm:$0xff] }
 0x42f   :  { %2192 = vmatpush.bf16.msra.mxu1 %v5552_v17  ;;  %2218 = vmatpush.bf16.msra.mxu3 %v5553_v63  ;;  %v5563_v17 = vld [vmem:[#allocation85_spill] sm:$0xff]  ;;  %v5564_v63 = vld [vmem:[#allocation86_spill] sm:$0xff] }
 0x432   :  { %2130 = vmatpush.bf16.msrb.mxu0 %v5554_v51  ;;  %2156 = vmatpush.bf16.msrb.mxu2 %v5555_v47  ;;  %v5565_v51 = vld [vmem:[#allocation87_spill] sm:$0xff]  ;;  %v5566_v47 = vld [vmem:[#allocation74_spill] sm:$0xff] }
 0x433   :  { %2193 = vmatpush.bf16.msra.mxu1 %v5556_v16  ;;  %2219 = vmatpush.bf16.msra.mxu3 %v5557_v23  ;;  %v5567_v16 = vld [vmem:[#allocation75_spill] sm:$0xff]  ;;  %v5568_v23 = vld [vmem:[#allocation88_spill] sm:$0xff] }
 0x436   :  { %2131 = vmatpush.bf16.msrb.mxu0 %v5558_v33  ;;  %2157 = vmatpush.bf16.msrb.mxu2 %v5559_v58  ;;  %v5569_v33 = vld [vmem:[#allocation89_spill] sm:$0xff]  ;;  %v5570_v58 = vld [vmem:[#allocation78_spill] sm:$0xff] }
 0x437   :  { %2194 = vmatpush.bf16.msra.mxu1 %v5560_v2  ;;  %2220 = vmatpush.bf16.msra.mxu3 %v5561_v31  ;;  %v5571_v2 = vld [vmem:[#allocation79_spill] sm:$0xff]  ;;  %v5572_v31 = vld [vmem:[#allocation90_spill] sm:$0xff] }
 0x43a   :  { %2132 = vmatpush.bf16.msrb.mxu0 %v5562_v20  ;;  %2158 = vmatpush.bf16.msrb.mxu2 %v5563_v17  ;;  %v5573_v20 = vld [vmem:[#allocation91_spill] sm:$0xff]  ;;  %v5574_v17 = vld [vmem:[#allocation82_spill] sm:$0xff] }
 0x43b   :  { %2195 = vmatpush.bf16.msra.mxu1 %v5566_v47  ;;  %2221 = vmatpush.bf16.msra.mxu3 %v5567_v16  ;;  %v5577_v47 = vld [vmem:[#allocation93_spill] sm:$0xff]  ;;  %v5578_v16 = vld [vmem:[#allocation94_spill] sm:$0xff] }
 0x43e   :  { %2177 = vmatpush.bf16.msra.mxu0 %v5564_v63  ;;  %2203 = vmatpush.bf16.msra.mxu2 %v5565_v51  ;;  %v5575_v63 = vld [vmem:[#allocation83_spill] sm:$0xff]  ;;  %v5576_v51 = vld [vmem:[#allocation92_spill] sm:$0xff] }
 0x43f   :  { %2196 = vmatpush.bf16.msra.mxu1 %v5570_v58  ;;  %2222 = vmatpush.bf16.msra.mxu3 %v5571_v2  ;;  %v5581_v58 = vld [vmem:[#allocation99_spill] sm:$0xff]  ;;  %v5582_v2 = vld [vmem:[#allocation101_spill] sm:$0xff] }
 0x442   :  { %2178 = vmatpush.bf16.msra.mxu0 %v5568_v23  ;;  %2204 = vmatpush.bf16.msra.mxu2 %v5569_v33  ;;  %v5579_v23 = vld [vmem:[#allocation95_spill] sm:$0xff]  ;;  %v5580_v33 = vld [vmem:[#allocation96_spill] sm:$0xff] }
 0x443   :  { %2197 = vmatpush.bf16.msra.mxu1 %v5574_v17  ;;  %2223 = vmatpush.bf16.msra.mxu3 %v5575_v63  ;;  %v5585_v17 = vld [vmem:[#allocation106_spill] sm:$0xff] }
 0x446   :  { %2179 = vmatpush.bf16.msra.mxu0 %v5572_v31  ;;  %2205 = vmatpush.bf16.msra.mxu2 %v5573_v20  ;;  %v5583_v31 = vld [vmem:[#allocation102_spill] sm:$0xff]  ;;  %v5584_v20 = vld [vmem:[#allocation104_spill] sm:$0xff] }
 0x44a   :  { %2180 = vmatpush.bf16.msra.mxu0 %v5576_v51  ;;  %2206 = vmatpush.bf16.msra.mxu2 %v5577_v47 }
 0x44e   :  { %2181 = vmatpush.bf16.msra.mxu0 %v5578_v16  ;;  %2207 = vmatpush.bf16.msra.mxu2 %v5579_v23 }
 0x452   :  { %2182 = vmatpush.bf16.msra.mxu0 %v5580_v33  ;;  %2208 = vmatpush.bf16.msra.mxu2 %v5581_v58 }
 0x456   :  { %2183 = vmatpush.bf16.msra.mxu0 %v5582_v2  ;;  %2209 = vmatpush.bf16.msra.mxu2 %v5583_v31 }
 0x45a   :  { %2184 = vmatpush.bf16.msra.mxu0 %v5584_v20  ;;  %2210 = vmatpush.bf16.msra.mxu2 %v5585_v17 }
 0x463   :  { %v1925_v63 = vpop.f32.mrf.mxu1 }
 0x469   :  { %v1951_v51 = vpop.f32.mrf.mxu3 }
 0x46b   :  { %v1927_v27 = vpop.f32.mrf.mxu1 }
 0x471   :  { %v1953_v47 = vpop.f32.mrf.mxu3 }
 0x473   :  { %v1977_v11 = vpop.f32.mrf.mxu1 }
 0x479   :  { %v2003_v44 = vpop.f32.mrf.mxu3 }
 0x47a   :  { %v1912_v16 = vpop.f32.mrf.mxu0 }
 0x47b   :  { %v1913_v23 = vadd.f32 %v1912_v16, %v5586_v39  ;;  %v1979_v61 = vpop.f32.mrf.mxu1 }
 0x47d   :  { %v1926_v33 = vadd.f32 %v1925_v63, %v1913_v23 }
 0x47f   :  { %v2007_v5 = vmul.f32 0.5, %v1926_v33 }
 0x480   :  { %v1938_v58 = vpop.f32.mrf.mxu2 }
 0x481   :  { %v1939_v2 = vadd.f32 %v1938_v58, %v5587_v24  ;;  %v2005_v20 = vpop.f32.mrf.mxu3  ;;  %3512 = vtanh.f32 %v2007_v5 }
 0x482   :  { %v1914_v31 = vpop.f32.mrf.mxu0 }
 0x483   :  { %v1952_v50 = vadd.f32 %v1951_v51, %v1939_v2 }
 0x485   :  { %v2011_v8 = vmul.f32 0.5, %v1952_v50  ;;  %v2047_v17 = vpop.f32.mrf.mxu1 }
 0x486   :  { %v2082_v33 = vrot.slane %v2047_v17, 6 }
 0x487   :  { %3514 = vtanh.f32 %v2011_v8  ;;  %v3513_v6 = vpop.eup %3512 }
 0x488   :  { %v1940_v27 = vpop.f32.mrf.mxu2  ;;  %v2009_v58 = vadd.f32 1.0, %v3513_v6  ;;  %v2090_v51 = vadd.f32 %v2082_v33, %v4620_v42 }
 0x48a   :  { %v1964_v47 = vpop.f32.mrf.mxu0  ;;  %v2010_v20 = vmul.f32 0.5, %v2009_v58 }
 0x48b   :  { %v1965_v60 = vadd.f32 %v1964_v47, %v5588_v32  ;;  %v2073_v61 = vpop.f32.mrf.mxu3 }
 0x48d   :  { %v3515_v16 = vpop.eup %3514  ;;  %v1978_v39 = vadd.f32 %v1977_v11, %v1965_v60  ;;  %v2049_v23 = vpop.f32.mrf.mxu1 }
 0x48e   :  { %v2013_v63 = vadd.f32 1.0, %v3515_v16  ;;  %v2084_v23 = vrot.slane %v2073_v61, 6 }
 0x48f   :  { %3516 = vtanh.f32 %v1978_v39  ;;  %v2097_v39 = vmul.f32 0.5, %v2090_v51 }
 0x490   :  { %v1990_v31 = vpop.f32.mrf.mxu2  ;;  %v2014_v50 = vmul.f32 0.5, %v2013_v63 }
 0x491   :  { %v1991_v2 = vadd.f32 %v1990_v31, %v4280_v28 }
 0x492   :  { %v1966_v5 = vpop.f32.mrf.mxu0  ;;  %v2020_v32 = vmul.f32 %v2014_v50, %v4625_v34  ;;  %v2092_v50 = vadd.f32 %v2084_v23, %v4637_v30 }
 0x493   :  { %v2004_v8 = vadd.f32 %v2003_v44, %v1991_v2  ;;  %v2075_v11 = vpop.f32.mrf.mxu3 }
 0x494   :  { %v2102_v11 = vmul.f32 0.5, %v2092_v50 }
 0x495   :  { %v3517_v27 = vpop.eup %3516  ;;  %v2016_v47 = vmul.f32 0.5, %v2004_v8 }
 0x496   :  { %v2021_v60 = vmul.f32 %v3517_v27, %v2010_v20 }
 0x497   :  { %3518 = vtanh.f32 %v2016_v47 }
 0x498   :  { %v4752_v16 = vadd.f32 %v2021_v60, %v2020_v32  ;;  %v1992_v6 = vpop.f32.mrf.mxu2 }
 0x49a   :  { %3520 = vtanh.f32 %v4752_v16  ;;  %v2034_v17 = vpop.f32.mrf.mxu0 }
 0x49b   :  { %v2081_v63 = vrot.slane %v2034_v17, 6  ;;  %3522 = vtanh.f32 %v2097_v39 }
 0x49d   :  { %v3519_v44 = vpop.eup %3518  ;;  %v2089_v58 = vadd.f32 %v2081_v63, %v4630_v54 }
 0x49e   :  { %v2018_v33 = vadd.f32 1.0, %v3519_v44 }
 0x49f   :  { %v2093_v31 = vmul.f32 0.5, %v2089_v58  ;;  %v2107_v58 = vrot.slane %v4651_v46, 6 }
 0x4a0   :  { %v3521_v2 = vpop.eup %3520  ;;  %v2019_v34 = vmul.f32 0.5, %v2018_v33  ;;  %v2060_v5 = vpop.f32.mrf.mxu2 }
 0x4a1   :  { %3524 = vtanh.f32 %v2093_v31  ;;  %v3523_v32 = vpop.eup %3522  ;;  %v2083_v20 = vrot.slane %v2060_v5, 6 }
 0x4a2   :  { %v2024_v8 = vmul.f32 %v3521_v2, %v2019_v34  ;;  %v2036_v51 = vpop.f32.mrf.mxu0  ;;  %v2099_v60 = vadd.f32 1.0, %v3523_v32 }
 0x4a3   :  { %v2091_v47 = vadd.f32 %v2083_v20, %v4643_v7 }
 0x4a4   :  { %v2115_v27 = vrot.slane %v2024_v8, 6  ;;  %v2100_v63 = vmul.f32 0.5, %v2099_v60  ;;  %v5591_v60 = vld [vmem:[#allocation35_spill] sm:$0xff] }
 0x4a5   :  { %3526 = vtanh.f32 %v2091_v47  ;;  %v5590_v47 = vld [vmem:[#allocation47_spill] sm:$0xff] }
 0x4a6   :  { %v2118_v61 = vpack.c.bf16 %v2115_v27, %v2115_v27  ;;  %3528 = vtanh.f32 %v2102_v11  ;;  %v2109_v31 = vmul.f32 %v2107_v58, %v2100_v63  ;;  %v5589_v27 = vld [vmem:[#allocation46_spill] sm:$0xff]  ;;  %v5592_v11 = vld [vmem:[#allocation37_spill] sm:$0xff]  ;;  %v5597_v63 = vld [vmem:[#allocation44_spill] sm:$0xff] }
 0x4a7   :  { %v3525_v39 = vpop.eup %3524  ;;  %v5600_v58 = vld [vmem:[#allocation51_spill] sm:$0xff] }
 0x4a8   :  { %v2122_v6 = vrot.slane %v2118_v61, 1  ;;  %v2095_v17 = vadd.f32 1.0, %v3525_v39  ;;  %v2062_v44 = vpop.f32.mrf.mxu2  ;;  %v5593_v61 = vld [vmem:[#allocation48_spill] sm:$0xff]  ;;  %v5594_v39 = vld [vmem:[#allocation49_spill] sm:$0xff] }
 0x4a9   :  { %v5598_v44 = vld [vmem:[#allocation45_spill] sm:$0xff] }
 0x4aa   :  { %v2096_v23 = vmul.f32 0.5, %v2095_v17  ;;  %2146 = vmatmul.bf16.vlgmr.msrb.gmra.mxu1 %v2122_v6  ;;  %2172 = vmatmul.bf16.vlgmr.msrb.gmra.mxu3 %v2122_v6  ;;  %v5596_v17 = vld [vmem:[#allocation41_spill] sm:$0xff] }
 0x4ab   :  { %2260 = vmatpush.bf16.msrb.mxu1 %v5326_v12  ;;  %2286 = vmatpush.bf16.msrb.mxu3 %v5327_v49  ;;  %v3527_v33 = vpop.eup %3526 }
 0x4ac   :  { %v2110_v2 = vmul.f32 %v3527_v33, %v2096_v23  ;;  %v3529_v34 = vpop.eup %3528  ;;  %v5599_v23 = vld [vmem:[#allocation50_spill] sm:$0xff]  ;;  %v5601_v33 = vld [vmem:[#allocation60_spill] sm:$0xff] }
 0x4ad   :  { %v2104_v5 = vadd.f32 1.0, %v3529_v34  ;;  %v5604_v34 = vld [vmem:[#allocation53_spill] sm:$0xff] }
 0x4ae   :  { %v4761_v50 = vadd.f32 %v2110_v2, %v2109_v31  ;;  %v5602_v31 = vld [vmem:[#allocation61_spill] sm:$0xff]  ;;  %v5603_v2 = vld [vmem:[#allocation52_spill] sm:$0xff] }
 0x4af   :  { %2261 = vmatpush.bf16.msrb.mxu1 %v5328_v37  ;;  %2287 = vmatpush.bf16.msrb.mxu3 %v5329_v25  ;;  %v2105_v46 = vmul.f32 0.5, %v2104_v5  ;;  %v5605_v5 = vld [vmem:[#allocation64_spill] sm:$0xff] }
 0x4b0   :  { %3530 = vtanh.f32 %v4761_v50 }
 0x4b3   :  { %2262 = vmatpush.bf16.msrb.mxu1 %v5330_v62  ;;  %2288 = vmatpush.bf16.msrb.mxu3 %v5331_v0 }
 0x4b6   :  { %v3531_v32 = vpop.eup %3530 }
 0x4b7   :  { %2263 = vmatpush.bf16.msrb.mxu1 %v5332_v56  ;;  %2289 = vmatpush.bf16.msrb.mxu3 %v5333_v59  ;;  %v2113_v8 = vmul.f32 %v3531_v32, %v2105_v46  ;;  %v5606_v46 = vld [vmem:[#allocation65_spill] sm:$0xff]  ;;  %v5607_v32 = vld [vmem:[#allocation54_spill] sm:$0xff] }
 0x4b9   :  { %v2117_v20 = vpack.c.bf16 %v2113_v8, %v2113_v8  ;;  %v5608_v8 = vld [vmem:[#allocation55_spill] sm:$0xff] }
 0x4ba   :  { %2198 = vmatmul.bf16.vlgmr.msra.gmra.mxu1 %v2122_v6  ;;  %2224 = vmatmul.bf16.vlgmr.msra.gmra.mxu3 %v2122_v6  ;;  %v5595_v6 = vld [vmem:[#allocation39_spill] sm:$0xff] }
 0x4bb   :  { %2264 = vmatpush.bf16.msrb.mxu1 %v5334_v29  ;;  %2290 = vmatpush.bf16.msrb.mxu3 %v5335_v26  ;;  %v2121_v51 = vrot.slane %v2117_v20, 1  ;;  %v5609_v20 = vld [vmem:[#allocation56_spill] sm:$0xff] }
 0x4bd   :  { %2133 = vmatmul.bf16.vlgmr.msrb.gmra.mxu0 %v2121_v51  ;;  %2159 = vmatmul.bf16.vlgmr.msrb.gmra.mxu2 %v2121_v51 }
 0x4be   :  { %2247 = vmatpush.bf16.msrb.mxu0 %v3847_v40  ;;  %2273 = vmatpush.bf16.msrb.mxu2 %v3851_v43 }
 0x4bf   :  { %2265 = vmatpush.bf16.msrb.mxu1 %v5336_v35  ;;  %2291 = vmatpush.bf16.msrb.mxu3 %v5337_v48 }
 0x4c2   :  { %2248 = vmatpush.bf16.msrb.mxu0 %v3856_v53  ;;  %2274 = vmatpush.bf16.msrb.mxu2 %v3862_v55 }
 0x4c3   :  { %2266 = vmatpush.bf16.msrb.mxu1 %v5338_v4  ;;  %2292 = vmatpush.bf16.msrb.mxu3 %v5339_v10 }
 0x4c6   :  { %2249 = vmatpush.bf16.msrb.mxu0 %v3868_v1  ;;  %2275 = vmatpush.bf16.msrb.mxu2 %v3874_v3 }
 0x4c7   :  { %2267 = vmatpush.bf16.msrb.mxu1 %v5340_v38  ;;  %2293 = vmatpush.bf16.msrb.mxu3 %v5341_v18 }
 0x4ca   :  { %2250 = vmatpush.bf16.msrb.mxu0 %v3880_v13  ;;  %2268 = vmatmul.bf16.vlgmr.msrb.gmra.mxu1 %v2121_v51 }
 0x4cb   :  { %2360 = vmatpush.bf16.msra.mxu1 %v5342_v14  ;;  %2386 = vmatpush.bf16.msra.mxu3 %v3941_v22 }
 0x4cc   :  { %2276 = vmatpush.bf16.msrb.mxu2 %v3886_v15  ;;  %2294 = vmatmul.bf16.vlgmr.msrb.gmra.mxu3 %v2121_v51 }
 0x4cd   :  { %2185 = vmatmul.bf16.vlgmr.msra.gmra.mxu0 %v2121_v51  ;;  %2211 = vmatmul.bf16.vlgmr.msra.gmra.mxu2 %v2121_v51 }
 0x4ce   :  { %2251 = vmatpush.bf16.msrb.mxu0 %v5293_v41 }
 0x4cf   :  { %2361 = vmatpush.bf16.msra.mxu1 %v3950_v36  ;;  %2387 = vmatpush.bf16.msra.mxu3 %v3955_v45 }
 0x4d0   :  { %2277 = vmatpush.bf16.msrb.mxu2 %v5294_v9 }
 0x4d2   :  { %2252 = vmatpush.bf16.msrb.mxu0 %v5297_v21 }
 0x4d3   :  { %2362 = vmatpush.bf16.msra.mxu1 %v3959_v52  ;;  %2388 = vmatpush.bf16.msra.mxu3 %v3963_v57 }
 0x4d4   :  { %2278 = vmatpush.bf16.msrb.mxu2 %v5298_v19 }
 0x4d6   :  { %2253 = vmatpush.bf16.msrb.mxu0 %v5591_v60  ;;  %v5652_v60 = vld [vmem:[#allocation31_spill] sm:$0xff] }
 0x4d7   :  { %2363 = vmatpush.bf16.msra.mxu1 %v5589_v27  ;;  %2389 = vmatpush.bf16.msra.mxu3 %v5590_v47 }
 0x4d8   :  { %2279 = vmatpush.bf16.msrb.mxu2 %v5592_v11 }
 0x4da   :  { %2254 = vmatpush.bf16.msrb.mxu0 %v5595_v6 }
 0x4db   :  { %2364 = vmatpush.bf16.msra.mxu1 %v5593_v61  ;;  %2390 = vmatpush.bf16.msra.mxu3 %v5594_v39 }
 0x4dc   :  { %2280 = vmatpush.bf16.msrb.mxu2 %v5596_v17 }
 0x4dd   :  { %2255 = vmatmul.bf16.vlgmr.msrb.gmra.mxu0 %v2121_v51 }
 0x4de   :  { %2347 = vmatpush.bf16.msra.mxu0 %v5597_v63  ;;  %v5651_v63 = vld [vmem:[#allocation27_spill] sm:$0xff] }
 0x4df   :  { %2365 = vmatpush.bf16.msra.mxu1 %v5599_v23  ;;  %2391 = vmatpush.bf16.msra.mxu3 %v5600_v58  ;;  %v5610_v58 = vld [vmem:[#allocation57_spill] sm:$0xff] }
 0x4e0   :  { %2373 = vmatpush.bf16.msra.mxu2 %v5598_v44 }
 0x4e1   :  { %2281 = vmatmul.bf16.vlgmr.msrb.gmra.mxu2 %v2121_v51  ;;  %v5611_v51 = vld [vmem:[#allocation68_spill] sm:$0xff] }
 0x4e2   :  { %2348 = vmatpush.bf16.msra.mxu0 %v5601_v33  ;;  %v5612_v33 = vld [vmem:[#allocation69_spill] sm:$0xff] }
 0x4e3   :  { %2366 = vmatpush.bf16.msra.mxu1 %v5603_v2  ;;  %2392 = vmatpush.bf16.msra.mxu3 %v5604_v34  ;;  %v5614_v2 = vld [vmem:[#allocation59_spill] sm:$0xff]  ;;  %v5615_v34 = vld [vmem:[#allocation72_spill] sm:$0xff] }
 0x4e4   :  { %2374 = vmatpush.bf16.msra.mxu2 %v5602_v31  ;;  %v5613_v31 = vld [vmem:[#allocation58_spill] sm:$0xff] }
 0x4e6   :  { %2349 = vmatpush.bf16.msra.mxu0 %v5605_v5  ;;  %v5616_v5 = vld [vmem:[#allocation73_spill] sm:$0xff] }
 0x4e7   :  { %2367 = vmatpush.bf16.msra.mxu1 %v5607_v32  ;;  %2393 = vmatpush.bf16.msra.mxu3 %v5608_v8  ;;  %v5618_v32 = vld [vmem:[#allocation63_spill] sm:$0xff]  ;;  %v5619_v8 = vld [vmem:[#allocation76_spill] sm:$0xff] }
 0x4e8   :  { %2375 = vmatpush.bf16.msra.mxu2 %v5606_v46  ;;  %v5617_v46 = vld [vmem:[#allocation62_spill] sm:$0xff] }
 0x4ea   :  { %2350 = vmatpush.bf16.msra.mxu0 %v5611_v51  ;;  %v5622_v51 = vld [vmem:[#allocation67_spill] sm:$0xff] }
 0x4eb   :  { %2412 = vmatpush.bf16.msrb.mxu1 %v5609_v20  ;;  %2438 = vmatpush.bf16.msrb.mxu3 %v5610_v58  ;;  %v5620_v20 = vld [vmem:[#allocation77_spill] sm:$0xff]  ;;  %v5621_v58 = vld [vmem:[#allocation66_spill] sm:$0xff] }
 0x4ec   :  { %2376 = vmatpush.bf16.msra.mxu2 %v5612_v33  ;;  %v5623_v33 = vld [vmem:[#allocation80_spill] sm:$0xff] }
 0x4ee   :  { %2351 = vmatpush.bf16.msra.mxu0 %v5615_v34  ;;  %v5626_v34 = vld [vmem:[#allocation71_spill] sm:$0xff] }
 0x4ef   :  { %2413 = vmatpush.bf16.msrb.mxu1 %v5613_v31  ;;  %2439 = vmatpush.bf16.msrb.mxu3 %v5614_v2  ;;  %v5624_v31 = vld [vmem:[#allocation81_spill] sm:$0xff]  ;;  %v5625_v2 = vld [vmem:[#allocation70_spill] sm:$0xff] }
 0x4f0   :  { %2377 = vmatpush.bf16.msra.mxu2 %v5616_v5  ;;  %v5627_v5 = vld [vmem:[#allocation84_spill] sm:$0xff] }
 0x4f2   :  { %2352 = vmatpush.bf16.msra.mxu0 %v5619_v8  ;;  %v5630_v8 = vld [vmem:[#allocation87_spill] sm:$0xff] }
 0x4f3   :  { %2414 = vmatpush.bf16.msrb.mxu1 %v5617_v46  ;;  %2440 = vmatpush.bf16.msrb.mxu3 %v5618_v32  ;;  %v5628_v46 = vld [vmem:[#allocation85_spill] sm:$0xff]  ;;  %v5629_v32 = vld [vmem:[#allocation86_spill] sm:$0xff] }
 0x4f4   :  { %2378 = vmatpush.bf16.msra.mxu2 %v5620_v20  ;;  %v5631_v20 = vld [vmem:[#allocation74_spill] sm:$0xff] }
 0x4f6   :  { %2353 = vmatpush.bf16.msra.mxu0 %v5623_v33  ;;  %v5634_v33 = vld [vmem:[#allocation89_spill] sm:$0xff] }
 0x4f7   :  { %2415 = vmatpush.bf16.msrb.mxu1 %v5621_v58  ;;  %2441 = vmatpush.bf16.msrb.mxu3 %v5622_v51  ;;  %v5632_v58 = vld [vmem:[#allocation75_spill] sm:$0xff]  ;;  %v5633_v51 = vld [vmem:[#allocation88_spill] sm:$0xff] }
 0x4f8   :  { %2379 = vmatpush.bf16.msra.mxu2 %v5624_v31  ;;  %v5635_v31 = vld [vmem:[#allocation78_spill] sm:$0xff] }
 0x4fa   :  { %2354 = vmatpush.bf16.msra.mxu0 %v5627_v5  ;;  %v5638_v5 = vld [vmem:[#allocation91_spill] sm:$0xff] }
 0x4fb   :  { %2416 = vmatpush.bf16.msrb.mxu1 %v5625_v2  ;;  %2442 = vmatpush.bf16.msrb.mxu3 %v5626_v34  ;;  %v5636_v2 = vld [vmem:[#allocation79_spill] sm:$0xff]  ;;  %v5637_v34 = vld [vmem:[#allocation90_spill] sm:$0xff] }
 0x4fc   :  { %2380 = vmatpush.bf16.msra.mxu2 %v5628_v46  ;;  %v5639_v46 = vld [vmem:[#allocation82_spill] sm:$0xff] }
 0x4fe   :  { %2399 = vmatpush.bf16.msrb.mxu0 %v5629_v32  ;;  %v5640_v32 = vld [vmem:[#allocation83_spill] sm:$0xff] }
 0x4ff   :  { %2417 = vmatpush.bf16.msrb.mxu1 %v5631_v20  ;;  %2443 = vmatpush.bf16.msrb.mxu3 %v5632_v58  ;;  %v5642_v20 = vld [vmem:[#allocation93_spill] sm:$0xff]  ;;  %v5643_v58 = vld [vmem:[#allocation94_spill] sm:$0xff] }
 0x500   :  { %2425 = vmatpush.bf16.msrb.mxu2 %v5630_v8  ;;  %v5641_v8 = vld [vmem:[#allocation92_spill] sm:$0xff] }
 0x502   :  { %2400 = vmatpush.bf16.msrb.mxu0 %v5633_v51  ;;  %v5644_v51 = vld [vmem:[#allocation95_spill] sm:$0xff] }
 0x503   :  { %2418 = vmatpush.bf16.msrb.mxu1 %v5635_v31  ;;  %2444 = vmatpush.bf16.msrb.mxu3 %v5636_v2  ;;  %v5646_v31 = vld [vmem:[#allocation99_spill] sm:$0xff]  ;;  %v5647_v2 = vld [vmem:[#allocation101_spill] sm:$0xff] }
 0x504   :  { %2426 = vmatpush.bf16.msrb.mxu2 %v5634_v33  ;;  %v5645_v33 = vld [vmem:[#allocation96_spill] sm:$0xff] }
 0x506   :  { %2401 = vmatpush.bf16.msrb.mxu0 %v5637_v34  ;;  %v5648_v34 = vld [vmem:[#allocation102_spill] sm:$0xff] }
 0x507   :  { %2419 = vmatpush.bf16.msrb.mxu1 %v5639_v46  ;;  %2445 = vmatpush.bf16.msrb.mxu3 %v5640_v32  ;;  %v5650_v46 = vld [vmem:[#allocation106_spill] sm:$0xff] }
 0x508   :  { %2427 = vmatpush.bf16.msrb.mxu2 %v5638_v5  ;;  %v5649_v5 = vld [vmem:[#allocation104_spill] sm:$0xff] }
 0x50a   :  { %2402 = vmatpush.bf16.msrb.mxu0 %v5641_v8 }
 0x50c   :  { %2428 = vmatpush.bf16.msrb.mxu2 %v5642_v20 }
 0x50e   :  { %2403 = vmatpush.bf16.msrb.mxu0 %v5643_v58 }
 0x510   :  { %2429 = vmatpush.bf16.msrb.mxu2 %v5644_v51 }
 0x512   :  { %2404 = vmatpush.bf16.msrb.mxu0 %v5645_v33 }
 0x514   :  { %2430 = vmatpush.bf16.msrb.mxu2 %v5646_v31 }
 0x516   :  { %2405 = vmatpush.bf16.msrb.mxu0 %v5647_v2 }
 0x518   :  { %2431 = vmatpush.bf16.msrb.mxu2 %v5648_v34 }
 0x51a   :  { %2406 = vmatpush.bf16.msrb.mxu0 %v5649_v5 }
 0x51c   :  { %2432 = vmatpush.bf16.msrb.mxu2 %v5650_v46 }
 0x527   :  { %v2147_v32 = vpop.f32.mrf.mxu1 }
 0x52d   :  { %v2173_v8 = vpop.f32.mrf.mxu3 }
 0x52f   :  { %v2149_v23 = vpop.f32.mrf.mxu1 }
 0x535   :  { %v2175_v20 = vpop.f32.mrf.mxu3 }
 0x537   :  { %v2199_v44 = vpop.f32.mrf.mxu1 }
 0x53a   :  { %v2134_v58 = vpop.f32.mrf.mxu0 }
 0x53b   :  { %v2135_v51 = vadd.f32 %v2134_v58, %v5651_v63 }
 0x53d   :  { %v2225_v17 = vpop.f32.mrf.mxu3  ;;  %v2148_v33 = vadd.f32 %v2147_v32, %v2135_v51 }
 0x53f   :  { %v2201_v6 = vpop.f32.mrf.mxu1  ;;  %v2229_v39 = vmul.f32 0.5, %v2148_v33 }
 0x540   :  { %v2160_v31 = vpop.f32.mrf.mxu2 }
 0x541   :  { %v2161_v2 = vadd.f32 %v2160_v31, %v5587_v24  ;;  %3532 = vtanh.f32 %v2229_v39 }
 0x542   :  { %v2136_v34 = vpop.f32.mrf.mxu0 }
 0x543   :  { %v2174_v61 = vadd.f32 %v2173_v8, %v2161_v2 }
 0x545   :  { %v2227_v5 = vpop.f32.mrf.mxu3  ;;  %v2233_v11 = vmul.f32 0.5, %v2174_v61 }
 0x547   :  { %3534 = vtanh.f32 %v2233_v11  ;;  %v2269_v46 = vpop.f32.mrf.mxu1  ;;  %v3533_v27 = vpop.eup %3532 }
 0x548   :  { %v2162_v23 = vpop.f32.mrf.mxu2  ;;  %v2231_v31 = vadd.f32 1.0, %v3533_v27  ;;  %v2304_v33 = vrot.slane %v2269_v46, 4 }
 0x54a   :  { %v2186_v20 = vpop.f32.mrf.mxu0  ;;  %v2232_v5 = vmul.f32 0.5, %v2231_v31  ;;  %v2312_v8 = vadd.f32 %v2304_v33, %v4620_v42 }
 0x54b   :  { %v2187_v47 = vadd.f32 %v2186_v20, %v5652_v60 }
 0x54d   :  { %v3535_v58 = vpop.eup %3534  ;;  %v2200_v63 = vadd.f32 %v2199_v44, %v2187_v47 }
 0x54e   :  { %v2235_v32 = vadd.f32 1.0, %v3535_v58 }
 0x54f   :  { %v2295_v6 = vpop.f32.mrf.mxu3  ;;  %3536 = vtanh.f32 %v2200_v63  ;;  %v2271_v51 = vpop.f32.mrf.mxu1  ;;  %v2319_v63 = vmul.f32 0.5, %v2312_v8 }
 0x550   :  { %v2212_v34 = vpop.f32.mrf.mxu2  ;;  %v2236_v61 = vmul.f32 0.5, %v2235_v32  ;;  %v2306_v51 = vrot.slane %v2295_v6, 4 }
 0x551   :  { %v2213_v2 = vadd.f32 %v2212_v34, %v4280_v28 }
 0x552   :  { %v2188_v39 = vpop.f32.mrf.mxu0  ;;  %v2242_v60 = vmul.f32 %v2236_v61, %v4752_v16  ;;  %v2314_v61 = vadd.f32 %v2306_v51, %v4637_v30 }
 0x553   :  { %v2226_v11 = vadd.f32 %v2225_v17, %v2213_v2 }
 0x555   :  { %v3537_v23 = vpop.eup %3536  ;;  %v2238_v20 = vmul.f32 0.5, %v2226_v11 }
 0x556   :  { %v2243_v47 = vmul.f32 %v3537_v23, %v2232_v5 }
 0x557   :  { %v2297_v44 = vpop.f32.mrf.mxu3  ;;  %3538 = vtanh.f32 %v2238_v20 }
 0x558   :  { %v4864_v58 = vadd.f32 %v2243_v47, %v2242_v60  ;;  %v2214_v27 = vpop.f32.mrf.mxu2  ;;  %v2324_v44 = vmul.f32 0.5, %v2314_v61 }
 0x55a   :  { %3540 = vtanh.f32 %v4864_v58  ;;  %v2256_v46 = vpop.f32.mrf.mxu0 }
 0x55b   :  { %v2303_v32 = vrot.slane %v2256_v46, 4  ;;  %3542 = vtanh.f32 %v2319_v63 }
 0x55d   :  { %v3539_v17 = vpop.eup %3538  ;;  %v2311_v31 = vadd.f32 %v2303_v32, %v4630_v54 }
 0x55e   :  { %v2240_v33 = vadd.f32 1.0, %v3539_v17 }
 0x55f   :  { %v2315_v34 = vmul.f32 0.5, %v2311_v31  ;;  %v2329_v31 = vrot.slane %v4761_v50, 6 }
 0x560   :  { %v3541_v2 = vpop.eup %3540  ;;  %v2241_v16 = vmul.f32 0.5, %v2240_v33 }
 0x561   :  { %3544 = vtanh.f32 %v2315_v34  ;;  %v3543_v60 = vpop.eup %3542 }
 0x562   :  { %v2246_v11 = vmul.f32 %v3541_v2, %v2241_v16  ;;  %v2258_v8 = vpop.f32.mrf.mxu0  ;;  %v2321_v47 = vadd.f32 1.0, %v3543_v60 }
 0x563   :  { %v5686_v8 = vld [vmem:[#allocation67_spill] sm:$0xff] }
 0x564   :  { %v2282_v39 = vpop.f32.mrf.mxu2  ;;  %v2337_v23 = vrot.slane %v2246_v11, 4  ;;  %v2322_v32 = vmul.f32 0.5, %v2321_v47  ;;  %v5684_v11 = vld [vmem:[#allocation77_spill] sm:$0xff]  ;;  %v5689_v47 = vld [vmem:[#allocation70_spill] sm:$0xff] }
 0x565   :  { %v2305_v5 = vrot.slane %v2282_v39, 4 }
 0x566   :  { %v2340_v6 = vpack.c.bf16 %v2337_v23, %v2337_v23  ;;  %v2331_v34 = vmul.f32 %v2329_v31, %v2322_v32  ;;  %v5687_v23 = vld [vmem:[#allocation80_spill] sm:$0xff]  ;;  %v5695_v32 = vld [vmem:[#allocation74_spill] sm:$0xff]  ;;  %v5698_v31 = vld [vmem:[#allocation89_spill] sm:$0xff] }
 0x567   :  { %v2313_v20 = vadd.f32 %v2305_v5, %v4643_v7  ;;  %v3545_v63 = vpop.eup %3544  ;;  %v5685_v5 = vld [vmem:[#allocation66_spill] sm:$0xff] }
 0x568   :  { %v2344_v27 = vrot.slane %v2340_v6, 2  ;;  %v2317_v46 = vadd.f32 1.0, %v3545_v63  ;;  %v5691_v6 = vld [vmem:[#allocation84_spill] sm:$0xff]  ;;  %v5692_v63 = vld [vmem:[#allocation85_spill] sm:$0xff] }
 0x569   :  { %3546 = vtanh.f32 %v2313_v20  ;;  %v5688_v20 = vld [vmem:[#allocation81_spill] sm:$0xff] }
 0x56a   :  { %3548 = vtanh.f32 %v2324_v44  ;;  %v2318_v51 = vmul.f32 0.5, %v2317_v46  ;;  %2368 = vmatmul.bf16.vlgmr.msra.gmra.mxu1 %v2344_v27  ;;  %2394 = vmatmul.bf16.vlgmr.msra.gmra.mxu3 %v2344_v27  ;;  %v5690_v44 = vld [vmem:[#allocation71_spill] sm:$0xff] }
 0x56b   :  { %2482 = vmatpush.bf16.msra.mxu1 %v5326_v12  ;;  %2508 = vmatpush.bf16.msra.mxu3 %v5327_v49  ;;  %v5694_v46 = vld [vmem:[#allocation87_spill] sm:$0xff] }
 0x56c   :  { %v2284_v17 = vpop.f32.mrf.mxu2 }
 0x56d   :  { %v5696_v17 = vld [vmem:[#allocation75_spill] sm:$0xff] }
 0x56f   :  { %v3547_v33 = vpop.eup %3546  ;;  %2483 = vmatpush.bf16.msra.mxu1 %v5328_v37  ;;  %2509 = vmatpush.bf16.msra.mxu3 %v5329_v25  ;;  %v5670_v25 = vld [vmem:[#allocation65_spill] sm:$0xff] }
 0x570   :  { %v2332_v2 = vmul.f32 %v3547_v33, %v2318_v51  ;;  %v3549_v16 = vpop.eup %3548  ;;  %v5697_v51 = vld [vmem:[#allocation88_spill] sm:$0xff]  ;;  %v5699_v33 = vld [vmem:[#allocation78_spill] sm:$0xff] }
 0x571   :  { %v2326_v39 = vadd.f32 1.0, %v3549_v16  ;;  %v5702_v16 = vld [vmem:[#allocation91_spill] sm:$0xff] }
 0x572   :  { %v4873_v61 = vadd.f32 %v2332_v2, %v2331_v34  ;;  %v5700_v34 = vld [vmem:[#allocation79_spill] sm:$0xff]  ;;  %v5701_v2 = vld [vmem:[#allocation90_spill] sm:$0xff] }
 0x573   :  { %2484 = vmatpush.bf16.msra.mxu1 %v5330_v62  ;;  %2510 = vmatpush.bf16.msra.mxu3 %v5331_v0  ;;  %v2327_v12 = vmul.f32 0.5, %v2326_v39  ;;  %v5671_v62 = vld [vmem:[#allocation54_spill] sm:$0xff]  ;;  %v5672_v0 = vld [vmem:[#allocation55_spill] sm:$0xff] }
 0x574   :  { %3550 = vtanh.f32 %v4873_v61  ;;  %v5703_v39 = vld [vmem:[#allocation82_spill] sm:$0xff] }
 0x577   :  { %2485 = vmatpush.bf16.msra.mxu1 %v5332_v56  ;;  %2511 = vmatpush.bf16.msra.mxu3 %v5333_v59  ;;  %v5673_v56 = vld [vmem:[#allocation56_spill] sm:$0xff]  ;;  %v5674_v59 = vld [vmem:[#allocation57_spill] sm:$0xff] }
 0x57a   :  { %v3551_v50 = vpop.eup %3550  ;;  %2420 = vmatmul.bf16.vlgmr.msrb.gmra.mxu1 %v2344_v27  ;;  %2446 = vmatmul.bf16.vlgmr.msrb.gmra.mxu3 %v2344_v27  ;;  %v5693_v27 = vld [vmem:[#allocation86_spill] sm:$0xff] }
 0x57b   :  { %v2335_v49 = vmul.f32 %v3551_v50, %v2327_v12  ;;  %2486 = vmatpush.bf16.msra.mxu1 %v5334_v29  ;;  %2512 = vmatpush.bf16.msra.mxu3 %v5335_v26  ;;  %v5675_v29 = vld [vmem:[#allocation68_spill] sm:$0xff]  ;;  %v5676_v26 = vld [vmem:[#allocation69_spill] sm:$0xff]  ;;  %v5704_v12 = vld [vmem:[#allocation83_spill] sm:$0xff] }
 0x57c   :  { %v5705_v50 = vld [vmem:[#allocation92_spill] sm:$0xff] }
 0x57d   :  { %v2339_v60 = vpack.c.bf16 %v2335_v49, %v2335_v49  ;;  %v5706_v49 = vld [vmem:[#allocation93_spill] sm:$0xff] }
 0x57f   :  { %v2343_v37 = vrot.slane %v2339_v60, 2  ;;  %2487 = vmatpush.bf16.msra.mxu1 %v5336_v35  ;;  %2513 = vmatpush.bf16.msra.mxu3 %v5337_v48  ;;  %v5677_v35 = vld [vmem:[#allocation58_spill] sm:$0xff]  ;;  %v5678_v48 = vld [vmem:[#allocation59_spill] sm:$0xff] }
 0x580   :  { %v5707_v60 = vld [vmem:[#allocation94_spill] sm:$0xff] }
 0x581   :  { %2355 = vmatmul.bf16.vlgmr.msra.gmra.mxu0 %v2343_v37  ;;  %2381 = vmatmul.bf16.vlgmr.msra.gmra.mxu2 %v2343_v37 }
 0x582   :  { %2469 = vmatpush.bf16.msra.mxu0 %v3847_v40  ;;  %2495 = vmatpush.bf16.msra.mxu2 %v3851_v43  ;;  %v5653_v40 = vld [vmem:[#allocation46_spill] sm:$0xff]  ;;  %v5654_v43 = vld [vmem:[#allocation47_spill] sm:$0xff] }
 0x583   :  { %2488 = vmatpush.bf16.msra.mxu1 %v5338_v4  ;;  %2514 = vmatpush.bf16.msra.mxu3 %v5339_v10  ;;  %v5679_v4 = vld [vmem:[#allocation72_spill] sm:$0xff]  ;;  %v5680_v10 = vld [vmem:[#allocation73_spill] sm:$0xff] }
 0x586   :  { %2470 = vmatpush.bf16.msra.mxu0 %v3856_v53  ;;  %2496 = vmatpush.bf16.msra.mxu2 %v3862_v55  ;;  %v5655_v53 = vld [vmem:[#allocation35_spill] sm:$0xff]  ;;  %v5656_v55 = vld [vmem:[#allocation37_spill] sm:$0xff] }
 0x587   :  { %2489 = vmatpush.bf16.msra.mxu1 %v5340_v38  ;;  %2515 = vmatpush.bf16.msra.mxu3 %v5341_v18  ;;  %v5681_v38 = vld [vmem:[#allocation62_spill] sm:$0xff]  ;;  %v5682_v18 = vld [vmem:[#allocation63_spill] sm:$0xff] }
 0x58a   :  { %2471 = vmatpush.bf16.msra.mxu0 %v3868_v1  ;;  %2497 = vmatpush.bf16.msra.mxu2 %v3874_v3  ;;  %v5657_v1 = vld [vmem:[#allocation48_spill] sm:$0xff]  ;;  %v5658_v3 = vld [vmem:[#allocation49_spill] sm:$0xff] }
 0x58b   :  { %2582 = vmatpush.bf16.msrb.mxu1 %v5342_v14  ;;  %2608 = vmatpush.bf16.msrb.mxu3 %v3941_v22  ;;  %v5661_v22 = vld [vmem:[#allocation44_spill] sm:$0xff] }
 0x58c   :  { %2490 = vmatmul.bf16.vlgmr.msra.gmra.mxu1 %v2343_v37  ;;  %2516 = vmatmul.bf16.vlgmr.msra.gmra.mxu3 %v2343_v37  ;;  %v5683_v14 = vld [vmem:[#allocation76_spill] sm:$0xff] }
 0x58e   :  { %2472 = vmatpush.bf16.msra.mxu0 %v3880_v13  ;;  %2498 = vmatpush.bf16.msra.mxu2 %v3886_v15  ;;  %v5659_v13 = vld [vmem:[#allocation39_spill] sm:$0xff]  ;;  %v5660_v15 = vld [vmem:[#allocation41_spill] sm:$0xff] }
 0x58f   :  { %2583 = vmatpush.bf16.msrb.mxu1 %v3950_v36  ;;  %2609 = vmatpush.bf16.msrb.mxu3 %v3955_v45  ;;  %v5662_v36 = vld [vmem:[#allocation45_spill] sm:$0xff]  ;;  %v5663_v45 = vld [vmem:[#allocation50_spill] sm:$0xff] }
 0x591   :  { %2407 = vmatmul.bf16.vlgmr.msrb.gmra.mxu0 %v2343_v37  ;;  %2433 = vmatmul.bf16.vlgmr.msrb.gmra.mxu2 %v2343_v37 }
 0x592   :  { %2473 = vmatpush.bf16.msra.mxu0 %v5293_v41  ;;  %2499 = vmatpush.bf16.msra.mxu2 %v5294_v9  ;;  %v5666_v41 = vld [vmem:[#allocation61_spill] sm:$0xff]  ;;  %v5667_v9 = vld [vmem:[#allocation52_spill] sm:$0xff] }
 0x593   :  { %2584 = vmatpush.bf16.msrb.mxu1 %v3959_v52  ;;  %2610 = vmatpush.bf16.msrb.mxu3 %v3963_v57  ;;  %v5664_v52 = vld [vmem:[#allocation51_spill] sm:$0xff]  ;;  %v5665_v57 = vld [vmem:[#allocation60_spill] sm:$0xff] }
 0x596   :  { %2474 = vmatpush.bf16.msra.mxu0 %v5297_v21  ;;  %2500 = vmatpush.bf16.msra.mxu2 %v5298_v19  ;;  %v5668_v21 = vld [vmem:[#allocation53_spill] sm:$0xff]  ;;  %v5669_v19 = vld [vmem:[#allocation64_spill] sm:$0xff] }
 0x597   :  { %2585 = vmatpush.bf16.msrb.mxu1 %v5653_v40  ;;  %2611 = vmatpush.bf16.msrb.mxu3 %v5654_v43  ;;  %v5709_v40 = vld [vmem:[#allocation96_spill] sm:$0xff]  ;;  %v5710_v43 = vld [vmem:[#allocation99_spill] sm:$0xff] }
 0x59a   :  { %2475 = vmatpush.bf16.msra.mxu0 %v5655_v53  ;;  %2501 = vmatpush.bf16.msra.mxu2 %v5656_v55  ;;  %v5711_v53 = vld [vmem:[#allocation101_spill] sm:$0xff]  ;;  %v5712_v55 = vld [vmem:[#allocation102_spill] sm:$0xff] }
 0x59b   :  { %2586 = vmatpush.bf16.msrb.mxu1 %v5657_v1  ;;  %2612 = vmatpush.bf16.msrb.mxu3 %v5658_v3  ;;  %v5713_v1 = vld [vmem:[#allocation104_spill] sm:$0xff]  ;;  %v5714_v3 = vld [vmem:[#allocation106_spill] sm:$0xff] }
 0x59e   :  { %2476 = vmatpush.bf16.msra.mxu0 %v5659_v13  ;;  %2502 = vmatpush.bf16.msra.mxu2 %v5660_v15 }
 0x59f   :  { %2587 = vmatpush.bf16.msrb.mxu1 %v5663_v45  ;;  %2613 = vmatpush.bf16.msrb.mxu3 %v5664_v52 }
 0x5a1   :  { %2477 = vmatmul.bf16.vlgmr.msra.gmra.mxu0 %v2343_v37  ;;  %2503 = vmatmul.bf16.vlgmr.msra.gmra.mxu2 %v2343_v37  ;;  %v5708_v37 = vld [vmem:[#allocation95_spill] sm:$0xff] }
 0x5a2   :  { %2569 = vmatpush.bf16.msrb.mxu0 %v5661_v22  ;;  %2595 = vmatpush.bf16.msrb.mxu2 %v5662_v36 }
 0x5a3   :  { %2588 = vmatpush.bf16.msrb.mxu1 %v5667_v9  ;;  %2614 = vmatpush.bf16.msrb.mxu3 %v5668_v21 }
 0x5a6   :  { %2570 = vmatpush.bf16.msrb.mxu0 %v5665_v57  ;;  %2596 = vmatpush.bf16.msrb.mxu2 %v5666_v41  ;;  %v5715_v57 = vld [vmem:[#allocation27_spill] sm:$0xff] }
 0x5a7   :  { %2589 = vmatpush.bf16.msrb.mxu1 %v5671_v62  ;;  %2615 = vmatpush.bf16.msrb.mxu3 %v5672_v0 }
 0x5aa   :  { %2571 = vmatpush.bf16.msrb.mxu0 %v5669_v19  ;;  %2597 = vmatpush.bf16.msrb.mxu2 %v5670_v25 }
 0x5ab   :  { %2634 = vmatpush.bf16.msra.mxu1 %v5673_v56  ;;  %2660 = vmatpush.bf16.msra.mxu3 %v5674_v59 }
 0x5ae   :  { %2572 = vmatpush.bf16.msrb.mxu0 %v5675_v29  ;;  %2598 = vmatpush.bf16.msrb.mxu2 %v5676_v26 }
 0x5af   :  { %2635 = vmatpush.bf16.msra.mxu1 %v5677_v35  ;;  %2661 = vmatpush.bf16.msra.mxu3 %v5678_v48 }
 0x5b2   :  { %2573 = vmatpush.bf16.msrb.mxu0 %v5679_v4  ;;  %2599 = vmatpush.bf16.msrb.mxu2 %v5680_v10  ;;  %v5716_v10 = vld [vmem:[#allocation31_spill] sm:$0xff] }
 0x5b3   :  { %2636 = vmatpush.bf16.msra.mxu1 %v5681_v38  ;;  %2662 = vmatpush.bf16.msra.mxu3 %v5682_v18 }
 0x5b6   :  { %2574 = vmatpush.bf16.msrb.mxu0 %v5683_v14  ;;  %2600 = vmatpush.bf16.msrb.mxu2 %v5684_v11 }
 0x5b7   :  { %2637 = vmatpush.bf16.msra.mxu1 %v5685_v5  ;;  %2663 = vmatpush.bf16.msra.mxu3 %v5686_v8 }
 0x5ba   :  { %2575 = vmatpush.bf16.msrb.mxu0 %v5687_v23  ;;  %2601 = vmatpush.bf16.msrb.mxu2 %v5688_v20 }
 0x5bb   :  { %2638 = vmatpush.bf16.msra.mxu1 %v5689_v47  ;;  %2664 = vmatpush.bf16.msra.mxu3 %v5690_v44 }
 0x5be   :  { %2576 = vmatpush.bf16.msrb.mxu0 %v5691_v6  ;;  %2602 = vmatpush.bf16.msrb.mxu2 %v5692_v63 }
 0x5bf   :  { %2639 = vmatpush.bf16.msra.mxu1 %v5695_v32  ;;  %2665 = vmatpush.bf16.msra.mxu3 %v5696_v17 }
 0x5c2   :  { %2621 = vmatpush.bf16.msra.mxu0 %v5693_v27  ;;  %2647 = vmatpush.bf16.msra.mxu2 %v5694_v46 }
 0x5c3   :  { %2640 = vmatpush.bf16.msra.mxu1 %v5699_v33  ;;  %2666 = vmatpush.bf16.msra.mxu3 %v5700_v34 }
 0x5c6   :  { %2622 = vmatpush.bf16.msra.mxu0 %v5697_v51  ;;  %2648 = vmatpush.bf16.msra.mxu2 %v5698_v31 }
 0x5c7   :  { %2641 = vmatpush.bf16.msra.mxu1 %v5703_v39  ;;  %2667 = vmatpush.bf16.msra.mxu3 %v5704_v12 }
 0x5ca   :  { %2623 = vmatpush.bf16.msra.mxu0 %v5701_v2  ;;  %2649 = vmatpush.bf16.msra.mxu2 %v5702_v16 }
 0x5ce   :  { %2624 = vmatpush.bf16.msra.mxu0 %v5705_v50  ;;  %2650 = vmatpush.bf16.msra.mxu2 %v5706_v49 }
 0x5d2   :  { %2625 = vmatpush.bf16.msra.mxu0 %v5707_v60  ;;  %2651 = vmatpush.bf16.msra.mxu2 %v5708_v37 }
 0x5d6   :  { %2626 = vmatpush.bf16.msra.mxu0 %v5709_v40  ;;  %2652 = vmatpush.bf16.msra.mxu2 %v5710_v43 }
 0x5da   :  { %2627 = vmatpush.bf16.msra.mxu0 %v5711_v53  ;;  %2653 = vmatpush.bf16.msra.mxu2 %v5712_v55 }
 0x5de   :  { %2628 = vmatpush.bf16.msra.mxu0 %v5713_v1  ;;  %2654 = vmatpush.bf16.msra.mxu2 %v5714_v3 }
 0x5e7   :  { %v2369_v13 = vpop.f32.mrf.mxu1 }
 0x5ed   :  { %v2395_v15 = vpop.f32.mrf.mxu3 }
 0x5ef   :  { %v2371_v22 = vpop.f32.mrf.mxu1 }
 0x5f5   :  { %v2397_v36 = vpop.f32.mrf.mxu3 }
 0x5f7   :  { %v2421_v45 = vpop.f32.mrf.mxu1 }
 0x5fd   :  { %v2447_v9 = vpop.f32.mrf.mxu3 }
 0x5fe   :  { %v2356_v52 = vpop.f32.mrf.mxu0 }
 0x5ff   :  { %v2357_v41 = vadd.f32 %v2356_v52, %v5715_v57  ;;  %v2423_v19 = vpop.f32.mrf.mxu1 }
 0x601   :  { %v2370_v21 = vadd.f32 %v2369_v13, %v2357_v41 }
 0x603   :  { %v2451_v0 = vmul.f32 0.5, %v2370_v21 }
 0x604   :  { %v2382_v25 = vpop.f32.mrf.mxu2 }
 0x605   :  { %v2383_v62 = vadd.f32 %v2382_v25, %v5587_v24  ;;  %v2449_v29 = vpop.f32.mrf.mxu3  ;;  %3552 = vtanh.f32 %v2451_v0  ;;  %v2551_v0 = vrot.slane %v4873_v61, 6 }
 0x606   :  { %v2358_v56 = vpop.f32.mrf.mxu0 }
 0x607   :  { %v2396_v59 = vadd.f32 %v2395_v15, %v2383_v62 }
 0x609   :  { %v2455_v26 = vmul.f32 0.5, %v2396_v59  ;;  %v2491_v35 = vpop.f32.mrf.mxu1 }
 0x60a   :  { %v2526_v47 = vrot.slane %v2491_v35, 2 }
 0x60b   :  { %3554 = vtanh.f32 %v2455_v26  ;;  %v3553_v18 = vpop.eup %3552 }
 0x60c   :  { %v2384_v48 = vpop.f32.mrf.mxu2  ;;  %v2453_v20 = vadd.f32 1.0, %v3553_v18  ;;  %v2534_v17 = vadd.f32 %v2526_v47, %v4620_v42 }
 0x60e   :  { %v2408_v4 = vpop.f32.mrf.mxu0  ;;  %v2454_v32 = vmul.f32 0.5, %v2453_v20  ;;  %v2541_v16 = vmul.f32 0.5, %v2534_v17 }
 0x60f   :  { %v2409_v38 = vadd.f32 %v2408_v4, %v5716_v10  ;;  %v2517_v8 = vpop.f32.mrf.mxu3 }
 0x610   :  { %v2528_v37 = vrot.slane %v2517_v8, 2 }
 0x611   :  { %v3555_v14 = vpop.eup %3554  ;;  %v2422_v11 = vadd.f32 %v2421_v45, %v2409_v38  ;;  %v2493_v23 = vpop.f32.mrf.mxu1 }
 0x612   :  { %v2457_v5 = vadd.f32 1.0, %v3555_v14  ;;  %v2536_v55 = vadd.f32 %v2528_v37, %v4637_v30 }
 0x613   :  { %3556 = vtanh.f32 %v2422_v11 }
 0x614   :  { %v2434_v44 = vpop.f32.mrf.mxu2  ;;  %v2458_v63 = vmul.f32 0.5, %v2457_v5  ;;  %v2546_v41 = vmul.f32 0.5, %v2536_v55 }
 0x615   :  { %v2435_v6 = vadd.f32 %v2434_v44, %v4280_v28 }
 0x616   :  { %v2410_v27 = vpop.f32.mrf.mxu0  ;;  %v2464_v33 = vmul.f32 %v2458_v63, %v4864_v58 }
 0x617   :  { %v2448_v46 = vadd.f32 %v2447_v9, %v2435_v6  ;;  %v2519_v2 = vpop.f32.mrf.mxu3 }
 0x619   :  { %v3557_v51 = vpop.eup %3556  ;;  %v2460_v31 = vmul.f32 0.5, %v2448_v46 }
 0x61a   :  { %v2465_v34 = vmul.f32 %v3557_v51, %v2454_v32 }
 0x61b   :  { %3558 = vtanh.f32 %v2460_v31 }
 0x61c   :  { %v4976_v39 = vadd.f32 %v2465_v34, %v2464_v33  ;;  %v2436_v12 = vpop.f32.mrf.mxu2 }
 0x61e   :  { %3560 = vtanh.f32 %v4976_v39  ;;  %v2478_v50 = vpop.f32.mrf.mxu0 }
 0x61f   :  { %v2525_v49 = vrot.slane %v2478_v50, 2  ;;  %3562 = vtanh.f32 %v2541_v16 }
 0x621   :  { %v3559_v60 = vpop.eup %3558  ;;  %v2533_v42 = vadd.f32 %v2525_v49, %v4630_v54 }
 0x622   :  { %v2462_v40 = vadd.f32 1.0, %v3559_v60 }
 0x623   :  { %v2537_v43 = vmul.f32 0.5, %v2533_v42 }
 0x624   :  { %v3561_v53 = vpop.eup %3560  ;;  %v2463_v58 = vmul.f32 0.5, %v2462_v40  ;;  %v2504_v1 = vpop.f32.mrf.mxu2 }
 0x625   :  { %3564 = vtanh.f32 %v2537_v43  ;;  %v3563_v3 = vpop.eup %3562  ;;  %v2527_v15 = vrot.slane %v2504_v1, 2 }
 0x626   :  { %v2468_v13 = vmul.f32 %v3561_v53, %v2463_v58  ;;  %v2480_v22 = vpop.f32.mrf.mxu0  ;;  %v2543_v52 = vadd.f32 1.0, %v3563_v3 }
 0x627   :  { %v2535_v45 = vadd.f32 %v2527_v15, %v4643_v7 }
 0x628   :  { %v2559_v36 = vrot.slane %v2468_v13, 2  ;;  %v2544_v25 = vmul.f32 0.5, %v2543_v52 }
 0x629   :  { %3566 = vtanh.f32 %v2535_v45 }
 0x62a   :  { %v2562_v9 = vpack.c.bf16 %v2559_v36, %v2559_v36  ;;  %3568 = vtanh.f32 %v2546_v41  ;;  %v2553_v59 = vmul.f32 %v2551_v0, %v2544_v25 }
 0x62b   :  { %v3565_v54 = vpop.eup %3564 }
 0x62c   :  { %v2566_v21 = vrot.slane %v2562_v9, 3  ;;  %v2539_v19 = vadd.f32 1.0, %v3565_v54  ;;  %v2506_v62 = vpop.f32.mrf.mxu2 }
 0x62e   :  { %v2540_v30 = vmul.f32 0.5, %v2539_v19  ;;  %2590 = vmatmul.bf16.vlgmr.msrb.gmra.mxu1 %v2566_v21  ;;  %2616 = vmatmul.bf16.vlgmr.msrb.gmra.mxu3 %v2566_v21 }
 0x62f   :  { %v3567_v56 = vpop.eup %3566 }
 0x630   :  { %v2554_v29 = vmul.f32 %v3567_v56, %v2540_v30  ;;  %v3569_v26 = vpop.eup %3568  ;;  %v3421_v30 = vld [vmem:[%s5008_s6] ss:$0 sm:$0xff] }
 0x631   :  { %v2548_v35 = vadd.f32 1.0, %v3569_v26 }
 0x632   :  { %v2555_v7 = vadd.f32 %v2554_v29, %v2553_v59 }
 0x633   :  { %v2549_v48 = vmul.f32 0.5, %v2548_v35 }
 0x634   :  { %3570 = vtanh.f32 %v2555_v7 }
 0x63a   :  { %v3571_v4 = vpop.eup %3570 }
 0x63b   :  { %v2557_v38 = vmul.f32 %v3571_v4, %v2549_v48 }
 0x63d   :  { %v2561_v18 = vpack.c.bf16 %v2557_v38, %v2557_v38 }
 0x63e   :  { %2642 = vmatmul.bf16.vlgmr.msra.gmra.mxu1 %v2566_v21  ;;  %2668 = vmatmul.bf16.vlgmr.msra.gmra.mxu3 %v2566_v21 }
 0x63f   :  { %v2565_v14 = vrot.slane %v2561_v18, 3 }
 0x641   :  { %2577 = vmatmul.bf16.vlgmr.msrb.gmra.mxu0 %v2565_v14  ;;  %2603 = vmatmul.bf16.vlgmr.msrb.gmra.mxu2 %v2565_v14 }
 0x651   :  { %2629 = vmatmul.bf16.vlgmr.msra.gmra.mxu0 %v2565_v14  ;;  %2655 = vmatmul.bf16.vlgmr.msra.gmra.mxu2 %v2565_v14 }
 0x6ab   :  { %v2591_v11 = vpop.f32.mrf.mxu1 }
 0x6b1   :  { %v2617_v61 = vpop.f32.mrf.mxu3 }
 0x6b3   :  { %v2593_v5 = vpop.f32.mrf.mxu1 }
 0x6b9   :  { %v2619_v8 = vpop.f32.mrf.mxu3 }
 0x6bb   :  { %v2643_v23 = vpop.f32.mrf.mxu1 }
 0x6be   :  { %v2578_v20 = vpop.f32.mrf.mxu0 }
 0x6bf   :  { %v2579_v47 = vadd.f32 %v2578_v20, %v5715_v57 }
 0x6c1   :  { %v2669_v44 = vpop.f32.mrf.mxu3  ;;  %v2592_v6 = vadd.f32 %v2591_v11, %v2579_v47 }
 0x6c3   :  { %v2645_v63 = vpop.f32.mrf.mxu1  ;;  %v2673_v32 = vmul.f32 0.5, %v2592_v6 }
 0x6c4   :  { %v2604_v27 = vpop.f32.mrf.mxu2 }
 0x6c5   :  { %v2605_v46 = vadd.f32 %v2604_v27, %v5587_v24  ;;  %3572 = vtanh.f32 %v2673_v32 }
 0x6c6   :  { %v2580_v17 = vpop.f32.mrf.mxu0 }
 0x6c7   :  { %v2618_v51 = vadd.f32 %v2617_v61, %v2605_v46 }
 0x6c9   :  { %v2671_v31 = vpop.f32.mrf.mxu3  ;;  %v2677_v33 = vmul.f32 0.5, %v2618_v51 }
 0x6cb   :  { %3574 = vtanh.f32 %v2677_v33  ;;  %v3573_v12 = vpop.eup %3572 }
 0x6cc   :  { %v2606_v34 = vpop.f32.mrf.mxu2  ;;  %v2675_v60 = vadd.f32 1.0, %v3573_v12 }
 0x6ce   :  { %v2630_v2 = vpop.f32.mrf.mxu0  ;;  %v2676_v53 = vmul.f32 0.5, %v2675_v60 }
 0x6cf   :  { %v2631_v16 = vadd.f32 %v2630_v2, %v5716_v10 }
 0x6d1   :  { %v3575_v50 = vpop.eup %3574  ;;  %v2644_v57 = vadd.f32 %v2643_v23, %v2631_v16 }
 0x6d2   :  { %v2679_v49 = vadd.f32 1.0, %v3575_v50 }
 0x6d3   :  { %3576 = vtanh.f32 %v2644_v57 }
 0x6d4   :  { %v2656_v37 = vpop.f32.mrf.mxu2  ;;  %v2680_v42 = vmul.f32 0.5, %v2679_v49 }
 0x6d5   :  { %v2657_v24 = vadd.f32 %v2656_v37, %v4280_v28 }
 0x6d6   :  { %v2632_v40 = vpop.f32.mrf.mxu0  ;;  %v2686_v1 = vmul.f32 %v2680_v42, %v4976_v39 }
 0x6d7   :  { %v2670_v43 = vadd.f32 %v2669_v44, %v2657_v24 }
 0x6d9   :  { %v3577_v58 = vpop.eup %3576  ;;  %v2682_v55 = vmul.f32 0.5, %v2670_v43 }
 0x6da   :  { %v2687_v3 = vmul.f32 %v3577_v58, %v2676_v53 }
 0x6db   :  { %3578 = vtanh.f32 %v2682_v55 }
 0x6dc   :  { %v2688_v10 = vadd.f32 %v2687_v3, %v2686_v1  ;;  %v2658_v13 = vpop.f32.mrf.mxu2 }
 0x6de   :  { %3580 = vtanh.f32 %v2688_v10 }
 0x6e1   :  { %v3579_v15 = vpop.eup %3578 }
 0x6e2   :  { %v2684_v22 = vadd.f32 1.0, %v3579_v15 }
 0x6e4   :  { %v3581_v36 = vpop.eup %3580  ;;  %v2685_v45 = vmul.f32 0.5, %v2684_v22 }
 0x6e6   :  { %v2690_v52 = vmul.f32 %v3581_v36, %v2685_v45 }
 0x6e8   :  { %2694 = vrot.lane.b32.xlu0 %v2690_v52, %s3771_s5  ;;  %2692 = vst.msk [vmem:[#allocation12] sm:$0x3] %vm2691_vm0, %v2690_v52 }
 0x6f0   :  { %2699 = vrot.lane.b32.xlu0 %v2690_v52, %s3765_s23 }
 0x75a   :  { %v2695_v28 = vpop.permute.xlu0 %2694 }
 0x75b   :  { %2698 = vst.msk [vmem:[#allocation12 + $0x2] sm:$0x3] %vm2691_vm0, %v2695_v28  ;;  %v2707_v39 = vsub.f32 %v2690_v52, %v2695_v28  ;;  %v2704_v9 = vadd.f32 %v2695_v28, %v2690_v52 }
 0x75d   :  { %v2708_v41 = vand.u32 2147483647, %v2707_v39 }
 0x75f   :  { %2713 = vrot.lane.b32.xlu1 %v2708_v41, %s3771_s5 }
 0x762   :  { %v2700_v54 = vpop.permute.xlu0 %2699 }
 0x763   :  { %2703 = vst.msk [vmem:[#allocation12 + $0x4] sm:$0x3] %vm2691_vm0, %v2700_v54  ;;  %v2705_v21 = vadd.f32 %v2704_v9, %v2700_v54  ;;  %v2709_v19 = vsub.f32 %v2690_v52, %v2700_v54 }
 0x764   :  { %2746 = dma.vmem_to_hbm [thread:$0]  %s2739_s10, 96, %s2741_s13, [#allocation13], %s3773_s14, %s3773_s14, %s3774_s15  }
 0x765   :  { %v2710_v25 = vand.u32 2147483647, %v2709_v19  ;;  %v2706_v59 = vmul.f32 0.33333334, %v2705_v21 }
 0x767   :  { %v2711_v62 = vadd.f32 %v2710_v25, %v2708_v41 }
 0x7d1   :  { %v2714_v0 = vpop.permute.xlu1 %2713 }
 0x7d2   :  { %v2716_v56 = vadd.f32 %v2714_v0, %v2711_v62 }
 0x7d4   :  { %v2720_v29 = vmul.f32 %v3421_v30, %v2716_v56 }
 0x7d6   :  { %v2721_v26 = vsub.f32 %v2706_v59, %v2720_v29 }
 0x7d8   :  { %2722 = vst.msk [vmem:[#allocation11] sm:$0x3] %vm2691_vm0, %v2721_v26 }
 0x7d9   :  { %2733 = dma.vmem_to_hbm [thread:$0]  %s2729_s1, 32, %s2731_s19, [#allocation4]  }
 0x7da   :  { %3756 = dma.done.wait [#allocation4], 32  }
 0x7db   :  { %3757 = vsyncadd [#allocation4], 4294967264 }
 0x7dc   :  { %3758 = dma.done.wait [#allocation13], 96  }
 0x7dd   :  { %3759 = vsyncadd [#allocation13], 4294967200 }
 0x7de   :  { %2755 = vsyncpa [#allocation3], 1 }
 0x7df   :  { %2756 = vsyncpa [#allocation6], 1 }
 0x7e0   :  { %2757 = vsyncpa [#allocation9], 1 }
 0x7e1   :  { %2758 = vsyncpa [#allocation4], 1 }
 0x7e2   :  { %2759 = vsyncpa [#allocation13], 1 }

</bundles_post_ra>
